<compile_context>
chip_gen: v7x
topology: tpu7x:2x2x1
jax: 0.10.0
libtpu: 0.0.40
codegen_flags: <defaults>
</compile_context>

<pallas_src>
import jax
import jax.numpy as jnp
from jax.experimental import pallas as pl
from jax.experimental.pallas import tpu as pltpu


def _discriminator_kernel(x_ref, w1_ref, b1_ref, w2_ref, b2_ref,
                          w3t_ref, b3_ref, o_ref):
    # x: (BB, F) f32    w1: (F, 512) bf16   w2: (512, 256) bf16
    # w3t: (1, 256) f32 biases: f32         o: (BB, 1) f32
    #
    # Cast x to bf16 on the VPU here (hidden under the layer-1 matmul) rather
    # than in the wrapper, so HBM only ever sees the f32 image once.
    x = x_ref[...].astype(jnp.bfloat16)

    # Linear 1 (bf16 MXU, f32 accumulation) + LeakyReLU(0.2) in f32.
    h1 = jnp.dot(x, w1_ref[...], preferred_element_type=jnp.float32) + b1_ref[...]
    h1 = jnp.maximum(h1, 0.2 * h1)          # identical to LeakyReLU for slope < 1

    # Linear 2 (bf16 MXU, f32 accumulation) + LeakyReLU(0.2).
    h2 = jnp.dot(h1.astype(jnp.bfloat16), w2_ref[...],
                 preferred_element_type=jnp.float32) + b2_ref[...]
    h2 = jnp.maximum(h2, 0.2 * h2)

    # Linear 3 (fan_out = 1): VPU multiply + lane reduction instead of a 1-wide
    # MXU pass.  Kept in f32.
    h3 = jnp.sum(h2 * w3t_ref[...], axis=-1, keepdims=True) + b3_ref[...]

    # Sigmoid on the EUP.
    o_ref[...] = jax.nn.sigmoid(h3)


def _round_up(n, m):
    return ((n + m - 1) // m) * m


def discriminator_forward(img, params, block_b=1024):
    """img: (B, C, H, W) float32 (NCHW).  Returns (B, 1) float32."""
    w1, b1, w2, b2, w3, b3 = params
    B = img.shape[0]
    # Same flatten order as torch .view(B, -1); keep f32 (kernel casts to bf16).
    x = img.reshape(B, -1)
    F = x.shape[1]

    # Align the MXU K dimension of layer 1 to 256; zero rows in w1 keep the
    # result numerically exact.
    F_pad = _round_up(F, 256)
    if F_pad != F:
        x = jnp.pad(x, ((0, 0), (0, F_pad - F)))
        w1 = jnp.pad(w1, ((0, F_pad - F), (0, 0)))

    # Balanced batch tiles: smallest tile count whose tile fits block_b, then
    # even tiles rounded up to 8 sublanes (padding waste < 8 rows per tile).
    n_tiles = max(1, -(-B // block_b))
    # v7x megacore: with a single grid step the second TensorCore idles; split
    # the batch when there is enough work to be worth it.
    if n_tiles < 2 and B >= 512:
        n_tiles = 2
    bb = _round_up(-(-B // n_tiles), 8)
    B_pad = bb * n_tiles
    if B_pad != B:
        x = jnp.pad(x, ((0, B_pad - B), (0, 0)))
    grid = (n_tiles,)

    # Weights fed to the MXU in bf16; w3 fed transposed as a (1, 256) f32 row
    # for the VPU reduction; biases stay f32.
    w1b = w1.astype(jnp.bfloat16)
    w2b = w2.astype(jnp.bfloat16)
    w3t = w3.T.astype(jnp.float32)          # (1, 256)

    # Per-call VMEM footprint estimate (bytes): double-buffered f32 x tile,
    # bf16 weights, f32 + bf16 intermediates, lane-padded output tile.
    est = (2 * bb * F_pad * 4
           + F_pad * 512 * 2 + 512 * 256 * 2
           + bb * (512 + 256) * 6
           + 2 * bb * 128 * 4)
    vmem_limit = min(max(2 * est, 32 * 1024 * 1024), 64 * 1024 * 1024)

    compiler_params = pltpu.CompilerParams(
        dimension_semantics=("parallel",),
        vmem_limit_bytes=vmem_limit)

    def _specs(single_buffer_weights):
        # Constant index maps keep weights/biases VMEM-resident across grid
        # steps; single-buffering them reclaims the redundant second buffer.
        const = ({"pipeline_mode": pl.Buffered(1)}
                 if single_buffer_weights else {})
        return [
            pl.BlockSpec((bb, F_pad), lambda i: (i, 0)),              # x (pipelined)
            pl.BlockSpec((F_pad, 512), lambda i: (0, 0), **const),    # w1 (resident)
            pl.BlockSpec((1, 512), lambda i: (0, 0), **const),        # b1
            pl.BlockSpec((512, 256), lambda i: (0, 0), **const),      # w2
            pl.BlockSpec((1, 256), lambda i: (0, 0), **const),        # b2
            pl.BlockSpec((1, 256), lambda i: (0, 0), **const),        # w3^T
            pl.BlockSpec((1, 1), lambda i: (0, 0), **const),          # b3
        ]

    def _run(single_buffer_weights):
        return pl.pallas_call(
            _discriminator_kernel,
            out_shape=jax.ShapeDtypeStruct((B_pad, 1), jnp.float32),
            grid=grid,
            in_specs=_specs(single_buffer_weights),
            out_specs=pl.BlockSpec((bb, 1), lambda i: (i, 0)),
            compiler_params=compiler_params,
        )(x, w1b, b1, w2b, b2, w3t, b3)

    try:
        out = _run(True)
    except Exception:
        # Compatibility fallback for jax builds where per-operand single
        # buffering (pipeline_mode) is not supported in pallas_call; the
        # double-buffered-weights configuration is otherwise identical.
        out = _run(False)

    return out[:B]


def init_params(key, in_features):
    """Deterministic init mimicking nn.Linear default (uniform +/- 1/sqrt(fan_in))."""
    def linear(key, fan_in, fan_out):
        kw, kb = jax.random.split(key)
        bound = 1.0 / jnp.sqrt(jnp.float32(fan_in))
        # Stored as (fan_in, fan_out) so the kernel does x @ W + b.
        w = jax.random.uniform(kw, (fan_in, fan_out), jnp.float32, -bound, bound)
        b = jax.random.uniform(kb, (1, fan_out), jnp.float32, -bound, bound)
        return w, b

    k1, k2, k3 = jax.random.split(key, 3)
    w1, b1 = linear(k1, in_features, 512)
    w2, b2 = linear(k2, 512, 256)
    w3, b3 = linear(k3, 256, 1)
    return (w1, b1, w2, b2, w3, b3)


def reference_forward(img, params):
    """Plain-JAX f32 reference for correctness checking."""
    w1, b1, w2, b2, w3, b3 = params
    x = img.reshape(img.shape[0], -1)
    h = x @ w1 + b1
    h = jnp.where(h > 0, h, 0.2 * h)
    h = h @ w2 + b2
    h = jnp.where(h > 0, h, 0.2 * h)
    h = h @ w3 + b3
    return jax.nn.sigmoid(h)


if __name__ == "__main__":
    key = jax.random.PRNGKey(0)
    k_img, k_par = jax.random.split(key)

    # Small but representative: img_shape = (4, 16, 16) -> 1024 input features.
    B, C, H, W = 2, 4, 16, 16
    img = jax.random.normal(k_img, (B, C, H, W), jnp.float32)
    params = init_params(k_par, C * H * W)

    out = discriminator_forward(img, params)
    out = jax.block_until_ready(out)

    ref = reference_forward(img, params)
    assert out.shape == (B, 1), out.shape
    assert bool(jnp.all(jnp.isfinite(out))), out
    # bf16 matmul inputs (f32 accumulation) vs f32 reference: loose tolerance
    # on the sigmoid output (bounded in [0, 1]).
    assert jnp.allclose(out, ref, atol=2e-2, rtol=0.0), (out, ref)

    print("KERNEL_OK")
</pallas_src>

<mosaic_0001>
module attributes {stable_mosaic.version = 11 : i64} {
  func.func @_discriminator_kernel(%arg0: i32, %arg1: memref<8x1024xf32, #tpu.memory_space<vmem>>, %arg2: memref<1024x512xbf16, #tpu.memory_space<vmem>>, %arg3: memref<1x512xf32, #tpu.memory_space<vmem>>, %arg4: memref<512x256xbf16, #tpu.memory_space<vmem>>, %arg5: memref<1x256xf32, #tpu.memory_space<vmem>>, %arg6: memref<1x256xf32, #tpu.memory_space<vmem>>, %arg7: memref<1x1xf32, #tpu.memory_space<vmem>>, %arg8: memref<8x1xf32, #tpu.memory_space<vmem>>) attributes {dimension_semantics = [#tpu.dimension_semantics<parallel>], iteration_bounds = array<i64: 1>, scalar_prefetch = 0 : i64, scratch_operands = 0 : i64, tpu.core_type = #tpu.core_type<tc>, window_params = [{transform_indices = @transform_0, window_bounds = array<i64: 8, 1024>}, {pipeline_mode = #tpu.pipeline_mode<synchronous>, transform_indices = @transform_1, window_bounds = array<i64: 1024, 512>}, {pipeline_mode = #tpu.pipeline_mode<synchronous>, transform_indices = @transform_2, window_bounds = array<i64: 1, 512>}, {pipeline_mode = #tpu.pipeline_mode<synchronous>, transform_indices = @transform_3, window_bounds = array<i64: 512, 256>}, {pipeline_mode = #tpu.pipeline_mode<synchronous>, transform_indices = @transform_4, window_bounds = array<i64: 1, 256>}, {pipeline_mode = #tpu.pipeline_mode<synchronous>, transform_indices = @transform_5, window_bounds = array<i64: 1, 256>}, {pipeline_mode = #tpu.pipeline_mode<synchronous>, transform_indices = @transform_6, window_bounds = array<i64: 1, 1>}, {transform_indices = @transform_7, window_bounds = array<i64: 8, 1>}]} {
    %c0 = arith.constant 0 : index
    %c0_0 = arith.constant 0 : index
    %0 = vector.load %arg1[%c0, %c0_0] : memref<8x1024xf32, #tpu.memory_space<vmem>>, vector<8x1024xf32>
    %1 = arith.truncf %0 : vector<8x1024xf32> to vector<8x1024xbf16>
    %c0_1 = arith.constant 0 : index
    %c0_2 = arith.constant 0 : index
    %2 = vector.load %arg2[%c0_1, %c0_2] : memref<1024x512xbf16, #tpu.memory_space<vmem>>, vector<1024x512xbf16>
    %cst = arith.constant dense<0.000000e+00> : vector<8x512xf32>
    %3 = tpu.matmul %1, %2, %cst {dimension_numbers = #tpu.dot_dimension_numbers<[1], [0], [0], [1], [0, 0, 1, 1], [], []>} : vector<8x1024xbf16>, vector<1024x512xbf16>, vector<8x512xf32> -> vector<8x512xf32>
    %c0_3 = arith.constant 0 : index
    %c0_4 = arith.constant 0 : index
    %4 = vector.load %arg3[%c0_3, %c0_4] : memref<1x512xf32, #tpu.memory_space<vmem>>, vector<1x512xf32>
    %5 = vector.broadcast %4 : vector<1x512xf32> to vector<8x512xf32>
    %6 = arith.addf %3, %5 : vector<8x512xf32>
    %cst_5 = arith.constant 2.000000e-01 : f32
    %7 = vector.broadcast %cst_5 : f32 to vector<8x512xf32>
    %8 = arith.mulf %7, %6 : vector<8x512xf32>
    %9 = arith.maximumf %6, %8 : vector<8x512xf32>
    %10 = arith.truncf %9 : vector<8x512xf32> to vector<8x512xbf16>
    %c0_6 = arith.constant 0 : index
    %c0_7 = arith.constant 0 : index
    %11 = vector.load %arg4[%c0_6, %c0_7] : memref<512x256xbf16, #tpu.memory_space<vmem>>, vector<512x256xbf16>
    %cst_8 = arith.constant dense<0.000000e+00> : vector<8x256xf32>
    %12 = tpu.matmul %10, %11, %cst_8 {dimension_numbers = #tpu.dot_dimension_numbers<[1], [0], [0], [1], [0, 0, 1, 1], [], []>} : vector<8x512xbf16>, vector<512x256xbf16>, vector<8x256xf32> -> vector<8x256xf32>
    %c0_9 = arith.constant 0 : index
    %c0_10 = arith.constant 0 : index
    %13 = vector.load %arg5[%c0_9, %c0_10] : memref<1x256xf32, #tpu.memory_space<vmem>>, vector<1x256xf32>
    %14 = vector.broadcast %13 : vector<1x256xf32> to vector<8x256xf32>
    %15 = arith.addf %12, %14 : vector<8x256xf32>
    %cst_11 = arith.constant 2.000000e-01 : f32
    %16 = vector.broadcast %cst_11 : f32 to vector<8x256xf32>
    %17 = arith.mulf %16, %15 : vector<8x256xf32>
    %18 = arith.maximumf %15, %17 : vector<8x256xf32>
    %c0_12 = arith.constant 0 : index
    %c0_13 = arith.constant 0 : index
    %19 = vector.load %arg6[%c0_12, %c0_13] : memref<1x256xf32, #tpu.memory_space<vmem>>, vector<1x256xf32>
    %20 = vector.broadcast %19 : vector<1x256xf32> to vector<8x256xf32>
    %21 = arith.mulf %18, %20 : vector<8x256xf32>
    %cst_14 = arith.constant dense<0.000000e+00> : vector<8xf32>
    %22 = vector.multi_reduction <add>, %21, %cst_14 [1] : vector<8x256xf32> to vector<8xf32>
    %23 = vector.shape_cast %22 : vector<8xf32> to vector<8x1xf32>
    %c0_15 = arith.constant 0 : index
    %c0_16 = arith.constant 0 : index
    %24 = vector.load %arg7[%c0_15, %c0_16] : memref<1x1xf32, #tpu.memory_space<vmem>>, vector<1x1xf32>
    %25 = vector.broadcast %24 : vector<1x1xf32> to vector<8x1xf32>
    %26 = arith.addf %23, %25 : vector<8x1xf32>
    %27 = arith.negf %26 : vector<8x1xf32>
    %28 = math.exp %27 : vector<8x1xf32>
    %cst_17 = arith.constant 1.000000e+00 : f32
    %29 = vector.broadcast %cst_17 : f32 to vector<8x1xf32>
    %30 = arith.addf %29, %28 : vector<8x1xf32>
    %31 = arith.divf %29, %30 : vector<8x1xf32>
    %c0_18 = arith.constant 0 : index
    %c0_19 = arith.constant 0 : index
    %32 = vector.load %arg8[%c0_18, %c0_19] : memref<8x1xf32, #tpu.memory_space<vmem>>, vector<8x1xf32>
    tpu.vector_store %arg8[%c0_18, %c0_19], %31 {strides = array<i32>} : memref<8x1xf32, #tpu.memory_space<vmem>>, vector<8x1xf32>,
    return
  }
  func.func @transform_0(%arg0: i32) -> (i32, i32) {
    %c0_i32 = arith.constant 0 : i32
    %c0_i32_0 = arith.constant 0 : i32
    return %arg0, %c0_i32 : i32, i32
  }
  func.func @transform_1(%arg0: i32) -> (i32, i32) {
    %c0_i32 = arith.constant 0 : i32
    %c0_i32_0 = arith.constant 0 : i32
    %c0_i32_1 = arith.constant 0 : i32
    return %c0_i32, %c0_i32_0 : i32, i32
  }
  func.func @transform_2(%arg0: i32) -> (i32, i32) {
    %c0_i32 = arith.constant 0 : i32
    %c0_i32_0 = arith.constant 0 : i32
    %c0_i32_1 = arith.constant 0 : i32
    return %c0_i32, %c0_i32_0 : i32, i32
  }
  func.func @transform_3(%arg0: i32) -> (i32, i32) {
    %c0_i32 = arith.constant 0 : i32
    %c0_i32_0 = arith.constant 0 : i32
    %c0_i32_1 = arith.constant 0 : i32
    return %c0_i32, %c0_i32_0 : i32, i32
  }
  func.func @transform_4(%arg0: i32) -> (i32, i32) {
    %c0_i32 = arith.constant 0 : i32
    %c0_i32_0 = arith.constant 0 : i32
    %c0_i32_1 = arith.constant 0 : i32
    return %c0_i32, %c0_i32_0 : i32, i32
  }
  func.func @transform_5(%arg0: i32) -> (i32, i32) {
    %c0_i32 = arith.constant 0 : i32
    %c0_i32_0 = arith.constant 0 : i32
    %c0_i32_1 = arith.constant 0 : i32
    return %c0_i32, %c0_i32_0 : i32, i32
  }
  func.func @transform_6(%arg0: i32) -> (i32, i32) {
    %c0_i32 = arith.constant 0 : i32
    %c0_i32_0 = arith.constant 0 : i32
    %c0_i32_1 = arith.constant 0 : i32
    return %c0_i32, %c0_i32_0 : i32, i32
  }
  func.func @transform_7(%arg0: i32) -> (i32, i32) {
    %c0_i32 = arith.constant 0 : i32
    %c0_i32_0 = arith.constant 0 : i32
    return %arg0, %c0_i32 : i32, i32
  }
}

module attributes {stable_mosaic.version = 11 : i64} {
  func.func @_discriminator_kernel(%arg0: i32, %arg1: memref<8x1024xf32, #tpu.memory_space<vmem>>, %arg2: memref<1024x512xbf16, #tpu.memory_space<vmem>>, %arg3: memref<1x512xf32, #tpu.memory_space<vmem>>, %arg4: memref<512x256xbf16, #tpu.memory_space<vmem>>, %arg5: memref<1x256xf32, #tpu.memory_space<vmem>>, %arg6: memref<1x256xf32, #tpu.memory_space<vmem>>, %arg7: memref<1x1xf32, #tpu.memory_space<vmem>>, %arg8: memref<8x1xf32, #tpu.memory_space<vmem>>) attributes {dimension_semantics = [#tpu.dimension_semantics<parallel>], iteration_bounds = array<i64: 1>, scalar_prefetch = 0 : i64, scratch_operands = 0 : i64, tpu.core_type = #tpu.core_type<tc>, window_params = [{transform_indices = @transform_0, window_bounds = array<i64: 8, 1024>}, {pipeline_mode = #tpu.pipeline_mode<synchronous>, transform_indices = @transform_1, window_bounds = array<i64: 1024, 512>}, {pipeline_mode = #tpu.pipeline_mode<synchronous>, transform_indices = @transform_2, window_bounds = array<i64: 1, 512>}, {pipeline_mode = #tpu.pipeline_mode<synchronous>, transform_indices = @transform_3, window_bounds = array<i64: 512, 256>}, {pipeline_mode = #tpu.pipeline_mode<synchronous>, transform_indices = @transform_4, window_bounds = array<i64: 1, 256>}, {pipeline_mode = #tpu.pipeline_mode<synchronous>, transform_indices = @transform_5, window_bounds = array<i64: 1, 256>}, {pipeline_mode = #tpu.pipeline_mode<synchronous>, transform_indices = @transform_6, window_bounds = array<i64: 1, 1>}, {transform_indices = @transform_7, window_bounds = array<i64: 8, 1>}]} {
    %c0 = arith.constant 0 : index
    %c0_0 = arith.constant 0 : index
    %0 = vector.load %arg1[%c0, %c0_0] : memref<8x1024xf32, #tpu.memory_space<vmem>>, vector<8x1024xf32>
    %1 = arith.truncf %0 : vector<8x1024xf32> to vector<8x1024xbf16>
    %c0_1 = arith.constant 0 : index
    %c0_2 = arith.constant 0 : index
    %2 = vector.load %arg2[%c0_1, %c0_2] : memref<1024x512xbf16, #tpu.memory_space<vmem>>, vector<1024x512xbf16>
    %cst = arith.constant dense<0.000000e+00> : vector<8x512xf32>
    %3 = tpu.matmul %1, %2, %cst {dimension_numbers = #tpu.dot_dimension_numbers<[1], [0], [0], [1], [0, 0, 1, 1], [], []>} : vector<8x1024xbf16>, vector<1024x512xbf16>, vector<8x512xf32> -> vector<8x512xf32>
    %c0_3 = arith.constant 0 : index
    %c0_4 = arith.constant 0 : index
    %4 = vector.load %arg3[%c0_3, %c0_4] : memref<1x512xf32, #tpu.memory_space<vmem>>, vector<1x512xf32>
    %5 = vector.broadcast %4 : vector<1x512xf32> to vector<8x512xf32>
    %6 = arith.addf %3, %5 : vector<8x512xf32>
    %cst_5 = arith.constant 2.000000e-01 : f32
    %7 = vector.broadcast %cst_5 : f32 to vector<8x512xf32>
    %8 = arith.mulf %7, %6 : vector<8x512xf32>
    %9 = arith.maximumf %6, %8 : vector<8x512xf32>
    %10 = arith.truncf %9 : vector<8x512xf32> to vector<8x512xbf16>
    %c0_6 = arith.constant 0 : index
    %c0_7 = arith.constant 0 : index
    %11 = vector.load %arg4[%c0_6, %c0_7] : memref<512x256xbf16, #tpu.memory_space<vmem>>, vector<512x256xbf16>
    %cst_8 = arith.constant dense<0.000000e+00> : vector<8x256xf32>
    %12 = tpu.matmul %10, %11, %cst_8 {dimension_numbers = #tpu.dot_dimension_numbers<[1], [0], [0], [1], [0, 0, 1, 1], [], []>} : vector<8x512xbf16>, vector<512x256xbf16>, vector<8x256xf32> -> vector<8x256xf32>
    %c0_9 = arith.constant 0 : index
    %c0_10 = arith.constant 0 : index
    %13 = vector.load %arg5[%c0_9, %c0_10] : memref<1x256xf32, #tpu.memory_space<vmem>>, vector<1x256xf32>
    %14 = vector.broadcast %13 : vector<1x256xf32> to vector<8x256xf32>
    %15 = arith.addf %12, %14 : vector<8x256xf32>
    %cst_11 = arith.constant 2.000000e-01 : f32
    %16 = vector.broadcast %cst_11 : f32 to vector<8x256xf32>
    %17 = arith.mulf %16, %15 : vector<8x256xf32>
    %18 = arith.maximumf %15, %17 : vector<8x256xf32>
    %c0_12 = arith.constant 0 : index
    %c0_13 = arith.constant 0 : index
    %19 = vector.load %arg6[%c0_12, %c0_13] : memref<1x256xf32, #tpu.memory_space<vmem>>, vector<1x256xf32>
    %20 = vector.broadcast %19 : vector<1x256xf32> to vector<8x256xf32>
    %21 = arith.mulf %18, %20 : vector<8x256xf32>
    %cst_14 = arith.constant dense<0.000000e+00> : vector<8xf32>
    %22 = vector.multi_reduction <add>, %21, %cst_14 [1] : vector<8x256xf32> to vector<8xf32>
    %23 = vector.shape_cast %22 : vector<8xf32> to vector<8x1xf32>
    %c0_15 = arith.constant 0 : index
    %c0_16 = arith.constant 0 : index
    %24 = vector.load %arg7[%c0_15, %c0_16] : memref<1x1xf32, #tpu.memory_space<vmem>>, vector<1x1xf32>
    %25 = vector.broadcast %24 : vector<1x1xf32> to vector<8x1xf32>
    %26 = arith.addf %23, %25 : vector<8x1xf32>
    %27 = arith.negf %26 : vector<8x1xf32>
    %28 = math.exp %27 : vector<8x1xf32>
    %cst_17 = arith.constant 1.000000e+00 : f32
    %29 = vector.broadcast %cst_17 : f32 to vector<8x1xf32>
    %30 = arith.addf %29, %28 : vector<8x1xf32>
    %31 = arith.divf %29, %30 : vector<8x1xf32>
    %c0_18 = arith.constant 0 : index
    %c0_19 = arith.constant 0 : index
    %32 = vector.load %arg8[%c0_18, %c0_19] : memref<8x1xf32, #tpu.memory_space<vmem>>, vector<8x1xf32>
    tpu.vector_store %arg8[%c0_18, %c0_19], %31 {strides = array<i32>} : memref<8x1xf32, #tpu.memory_space<vmem>>, vector<8x1xf32>,
    return
  }
  func.func @transform_0(%arg0: i32) -> (i32, i32) {
    %c0_i32 = arith.constant 0 : i32
    %c0_i32_0 = arith.constant 0 : i32
    return %arg0, %c0_i32 : i32, i32
  }
  func.func @transform_1(%arg0: i32) -> (i32, i32) {
    %c0_i32 = arith.constant 0 : i32
    %c0_i32_0 = arith.constant 0 : i32
    %c0_i32_1 = arith.constant 0 : i32
    return %c0_i32, %c0_i32_0 : i32, i32
  }
  func.func @transform_2(%arg0: i32) -> (i32, i32) {
    %c0_i32 = arith.constant 0 : i32
    %c0_i32_0 = arith.constant 0 : i32
    %c0_i32_1 = arith.constant 0 : i32
    return %c0_i32, %c0_i32_0 : i32, i32
  }
  func.func @transform_3(%arg0: i32) -> (i32, i32) {
    %c0_i32 = arith.constant 0 : i32
    %c0_i32_0 = arith.constant 0 : i32
    %c0_i32_1 = arith.constant 0 : i32
    return %c0_i32, %c0_i32_0 : i32, i32
  }
  func.func @transform_4(%arg0: i32) -> (i32, i32) {
    %c0_i32 = arith.constant 0 : i32
    %c0_i32_0 = arith.constant 0 : i32
    %c0_i32_1 = arith.constant 0 : i32
    return %c0_i32, %c0_i32_0 : i32, i32
  }
  func.func @transform_5(%arg0: i32) -> (i32, i32) {
    %c0_i32 = arith.constant 0 : i32
    %c0_i32_0 = arith.constant 0 : i32
    %c0_i32_1 = arith.constant 0 : i32
    return %c0_i32, %c0_i32_0 : i32, i32
  }
  func.func @transform_6(%arg0: i32) -> (i32, i32) {
    %c0_i32 = arith.constant 0 : i32
    %c0_i32_0 = arith.constant 0 : i32
    %c0_i32_1 = arith.constant 0 : i32
    return %c0_i32, %c0_i32_0 : i32, i32
  }
  func.func @transform_7(%arg0: i32) -> (i32, i32) {
    %c0_i32 = arith.constant 0 : i32
    %c0_i32_0 = arith.constant 0 : i32
    return %arg0, %c0_i32 : i32, i32
  }
}

</mosaic_0001>

<bundles_post_ra>
// kernel: tpu_custom_call.1
= control target key start
LH: loop header
LB: loop body
LE: loop exit
PB: predicated region body
PF: predicated region fallthrough
CT: control target
= control target key end

     0   :  { %s3569_s0 = inlined_call_operand.hbm [shape: f32[8,1024], index: 0, kind: input, shape index: {}]   ;;  %s3570_s1 = inlined_call_operand.hbm [shape: bf16[1024,512], index: 1, kind: input, shape index: {}]   ;;  %s3571_s2 = inlined_call_operand.vmem [shape: f32[1,512], index: 2, kind: input, shape index: {}]   ;;  %s3572_s3 = inlined_call_operand.hbm [shape: bf16[512,256], index: 3, kind: input, shape index: {}]   ;;  %s3573_s4 = inlined_call_operand.vmem [shape: f32[1,256], index: 4, kind: input, shape index: {}]   ;;  %s3574_s5 = inlined_call_operand.vmem [shape: f32[1,256], index: 5, kind: input, shape index: {}]   ;;  %s3575_s6 = inlined_call_operand.<no memory space> [shape: f32[1,1], index: 6, kind: input, shape index: {}]   ;;  %s3576_s7 = inlined_call_operand.vmem [shape: f32[8,1], index: 7, kind: output, shape index: {}]  }
   0x1   :  { %v12_v0 = vstv %s3575_s6 }
   0x2   :  { %13 = vst [vmem:[#allocation2] sm:$0x1] %v12_v0 }
   0x3   :  { %14 = vsyncpa [#allocation4], 0 }
   0x4   :  { %15 = vsyncpa [#allocation6], 0  ;;  %s3417_s26 = smov [#allocation5]   ;;  %s3347_s30 = scalar_lea.hbm %s3570_s1, 32768 }
   0x5   :  { %s31_s27 = sshll.u32 %s3417_s26, 4  ;;  %p3348_p0 = scmp.ne.s32.totalorder %s3570_s1, %s3347_s30  ;;  %s32_s27 = int_to_ptr.vmem [resolvable:$true] %s31_s27 }
   0x6   :  { %p3351_p1 = scmp.lt.u32.totalorder %s3347_s30, %s3570_s1 }
   0x8   :  { %p3353_p2 = pnand %p3351_p1, %p3348_p0 }
   0xa   :  { %3356 = shalt.err (!%p3353_p2)
}
   0xb   :  { %s3357_s6 = scalar_lea.vmem %s32_s27, 32768  ;;  %p3362_p4 = scmp.lt.s32.totalorder %s32_s27, %s32_s27 }
   0xc   :  { %p3358_p3 = scmp.ne.s32.totalorder %s32_s27, %s3357_s6  ;;  %p3363_p5 = scmp.lt.s32.totalorder %s3357_s6, %s3357_s6 }
   0xe   :  { %p3364_p6 = por %p3363_p5, %p3362_p4 }
  0x10   :  { %p3365_p7 = pnand %p3364_p6, %p3358_p3 }
  0x12   :  { %3368 = shalt.err (!%p3365_p7)
}
  0x13   :  { %s3418_s12 = smov 256   ;;  %s3419_s13 = smov 16  }
  0x14   :  { %37 = dma.hbm_to_vmem [thread:$0]  %s3570_s1, 32768, %s32_s27, [#allocation6], %s3418_s12, %s3418_s12, %s3419_s13  }
  0x15   :  { %s3420_s16 = smov [#allocation3]   ;;  %s3421_s18 = smov [#allocation7]  }
  0x16   :  { %s22_s17 = sshll.u32 %s3420_s16, 4  ;;  %s45_s19 = sshll.u32 %s3421_s18, 4  ;;  %s23_s17 = int_to_ptr.vmem [resolvable:$true] %s22_s17  ;;  %s46_s19 = int_to_ptr.vmem [resolvable:$true] %s45_s19 }
  0x17   :  { %s3369_s22 = scalar_lea.hbm %s3569_s0, 1024 }
  0x18   :  { %p3370_p8 = scmp.ne.s32.totalorder %s3569_s0, %s3369_s22  ;;  %p3373_p9 = scmp.lt.u32.totalorder %s3369_s22, %s3569_s0 }
  0x1a   :  { %p3375_p10 = pnand %p3373_p9, %p3370_p8 }
  0x1c   :  { %3378 = shalt.err (!%p3375_p10)
}
  0x1d   :  { %s3379_s1 = scalar_lea.vmem %s23_s17, 1024  ;;  %p3384_p12 = scmp.lt.s32.totalorder %s23_s17, %s23_s17 }
  0x1e   :  { %p3380_p11 = scmp.ne.s32.totalorder %s23_s17, %s3379_s1  ;;  %p3385_p13 = scmp.lt.s32.totalorder %s3379_s1, %s3379_s1 }
  0x20   :  { %p3386_p0 = por %p3385_p13, %p3384_p12 }
  0x22   :  { %p3387_p1 = pnand %p3386_p0, %p3380_p11 }
  0x24   :  { %3390 = shalt.err (!%p3387_p1)
}
  0x25   :  { %25 = dma.hbm_to_vmem [thread:$0]  %s3569_s0, 1024, %s23_s17, [#allocation4]  }
  0x26   :  { %s3391_s8 = scalar_lea.hbm %s3572_s3, 8192 }
  0x27   :  { %p3392_p2 = scmp.ne.s32.totalorder %s3572_s3, %s3391_s8  ;;  %p3395_p3 = scmp.lt.u32.totalorder %s3391_s8, %s3572_s3 }
  0x29   :  { %p3397_p4 = pnand %p3395_p3, %p3392_p2 }
  0x2b   :  { %3400 = shalt.err (!%p3397_p4)
}
  0x2c   :  { %s3401_s12 = scalar_lea.vmem %s46_s19, 8192  ;;  %p3406_p6 = scmp.lt.s32.totalorder %s46_s19, %s46_s19 }
  0x2d   :  { %p3402_p5 = scmp.ne.s32.totalorder %s46_s19, %s3401_s12  ;;  %p3407_p7 = scmp.lt.s32.totalorder %s3401_s12, %s3401_s12 }
  0x2f   :  { %p3408_p8 = por %p3407_p7, %p3406_p6 }
  0x31   :  { %p3409_p9 = pnand %p3408_p8, %p3402_p5 }
  0x33   :  { %3412 = shalt.err (!%p3409_p9)
}
  0x34   :  { %s3422_s0 = smov 128   ;;  %s3423_s13 = smov 8  }
  0x35   :  { %51 = dma.hbm_to_vmem [thread:$0]  %s3572_s3, 8192, %s46_s19, [#allocation6], %s3422_s0, %s3422_s0, %s3423_s13  }
  0x36   :  { %3413 = dma.done.wait [#allocation4], 1024  }
  0x37   :  { %3414 = vsyncadd [#allocation4], 4294966272 }
  0x38   :  { %3415 = dma.done.wait [#allocation6], 40960  }
  0x39   :  { %3416 = vsyncadd [#allocation6], 4294926336  ;;  %v2863_v1 = vld [vmem:[#allocation5 + $0x4] ss:$16 sps:$4 sm:$0xff]   ;;  %v2867_v3 = vld [vmem:[#allocation5] ss:$16 sps:$4 sm:$0xff]  }
  0x3a   :  { %v2865_v2 = vld [vmem:[#allocation5 + $0x204] ss:$16 sps:$4 sm:$0xff]   ;;  %1641 = vmatprep.subr.bf16.mxu1 %v2863_v1  ;;  %v2868_v4 = vld [vmem:[#allocation5 + $0x200] ss:$16 sps:$4 sm:$0xff]   ;;  %v68_v47 = vld [vmem:[#allocation3 + $0x8] sm:$0xff]  ;;  %vm2494_vm0 = vcmask 7168  }
  0x3b   :  { %1682 = vmatprep.subr.bf16.mxu0 %v2865_v2  ;;  %v2869_v5 = vld [vmem:[#allocation5 + $0x24] ss:$16 sps:$4 sm:$0xff]   ;;  %1642 = vmatpush1.bf16.msra.mxu1 %v2867_v3  ;;  %v2873_v7 = vld [vmem:[#allocation5 + $0x20] ss:$16 sps:$4 sm:$0xff]   ;;  %v3503_v49 = vpack.c.bf16 %v68_v47, %v68_v47  ;;  %v70_v50 = vld [vmem:[#allocation3 + $0x18] sm:$0xff] }
  0x3c   :  { %1683 = vmatpush1.bf16.msra.mxu0 %v2868_v4  ;;  %v2871_v6 = vld [vmem:[#allocation5 + $0x224] ss:$16 sps:$4 sm:$0xff]   ;;  %1643 = vmatprep.subr.bf16.mxu1 %v2869_v5  ;;  %v2874_v8 = vld [vmem:[#allocation5 + $0x220] ss:$16 sps:$4 sm:$0xff]   ;;  %v3505_v53 = vpack.c.bf16 %v70_v50, %v70_v50  ;;  %v3016_v50 = vld [vmem:[#allocation5 + $0x128] ss:$16 sps:$4 sm:$0xff]  }
  0x3d   :  { %1684 = vmatprep.subr.bf16.mxu0 %v2871_v6  ;;  %v2875_v9 = vld [vmem:[#allocation5 + $0x44] ss:$16 sps:$4 sm:$0xff]   ;;  %v2879_v11 = vld [vmem:[#allocation5 + $0x40] ss:$16 sps:$4 sm:$0xff]   ;;  %1673 = vmatprep.mubr.bf16.mxu1 %v3503_v49 }
  0x3e   :  { %v2877_v10 = vld [vmem:[#allocation5 + $0x244] ss:$16 sps:$4 sm:$0xff]   ;;  %v2880_v12 = vld [vmem:[#allocation5 + $0x240] ss:$16 sps:$4 sm:$0xff]   ;;  %1714 = vmatprep.mubr.bf16.mxu0 %v3505_v53 }
  0x3f   :  { %1644 = vmatpush1.bf16.msra.mxu1 %v2873_v7  ;;  %v2881_v13 = vld [vmem:[#allocation5 + $0x64] ss:$16 sps:$4 sm:$0xff]   ;;  %v2885_v15 = vld [vmem:[#allocation5 + $0x60] ss:$16 sps:$4 sm:$0xff]  }
  0x40   :  { %1685 = vmatpush1.bf16.msra.mxu0 %v2874_v8  ;;  %1645 = vmatprep.subr.bf16.mxu1 %v2875_v9  ;;  %v2883_v14 = vld [vmem:[#allocation5 + $0x264] ss:$16 sps:$4 sm:$0xff]   ;;  %v2886_v16 = vld [vmem:[#allocation5 + $0x260] ss:$16 sps:$4 sm:$0xff]   ;;  %v2964_v8 = vld [vmem:[#allocation5 + $0xc] ss:$16 sps:$4 sm:$0xff]  }
  0x41   :  { %1686 = vmatprep.subr.bf16.mxu0 %v2877_v10  ;;  %v2887_v17 = vld [vmem:[#allocation5 + $0x84] ss:$16 sps:$4 sm:$0xff]   ;;  %v2891_v19 = vld [vmem:[#allocation5 + $0x80] ss:$16 sps:$4 sm:$0xff]  }
  0x42   :  { %v2889_v18 = vld [vmem:[#allocation5 + $0x284] ss:$16 sps:$4 sm:$0xff]   ;;  %v2892_v20 = vld [vmem:[#allocation5 + $0x280] ss:$16 sps:$4 sm:$0xff]  }
  0x43   :  { %1646 = vmatpush1.bf16.msra.mxu1 %v2879_v11  ;;  %v2893_v21 = vld [vmem:[#allocation5 + $0xa4] ss:$16 sps:$4 sm:$0xff]   ;;  %v2897_v23 = vld [vmem:[#allocation5 + $0xa0] ss:$16 sps:$4 sm:$0xff]   ;;  %v2962_v11 = vld [vmem:[#allocation5 + $0x8] ss:$16 sps:$4 sm:$0xff]  }
  0x44   :  { %1687 = vmatpush1.bf16.msra.mxu0 %v2880_v12  ;;  %1647 = vmatprep.subr.bf16.mxu1 %v2881_v13  ;;  %v2895_v22 = vld [vmem:[#allocation5 + $0x2a4] ss:$16 sps:$4 sm:$0xff]   ;;  %v2898_v24 = vld [vmem:[#allocation5 + $0x2a0] ss:$16 sps:$4 sm:$0xff]  }
  0x45   :  { %1688 = vmatprep.subr.bf16.mxu0 %v2883_v14  ;;  %v2899_v25 = vld [vmem:[#allocation5 + $0xc4] ss:$16 sps:$4 sm:$0xff]   ;;  %v2903_v27 = vld [vmem:[#allocation5 + $0xc0] ss:$16 sps:$4 sm:$0xff]   ;;  %v2970_v14 = vld [vmem:[#allocation5 + $0x2c] ss:$16 sps:$4 sm:$0xff]  }
  0x46   :  { %v2901_v26 = vld [vmem:[#allocation5 + $0x2c4] ss:$16 sps:$4 sm:$0xff]   ;;  %v2904_v28 = vld [vmem:[#allocation5 + $0x2c0] ss:$16 sps:$4 sm:$0xff]  }
  0x47   :  { %1648 = vmatpush1.bf16.msra.mxu1 %v2885_v15  ;;  %v2905_v29 = vld [vmem:[#allocation5 + $0xe4] ss:$16 sps:$4 sm:$0xff]   ;;  %v2909_v31 = vld [vmem:[#allocation5 + $0xe0] ss:$16 sps:$4 sm:$0xff]  }
  0x48   :  { %1689 = vmatpush1.bf16.msra.mxu0 %v2886_v16  ;;  %1649 = vmatprep.subr.bf16.mxu1 %v2887_v17  ;;  %v2907_v30 = vld [vmem:[#allocation5 + $0x2e4] ss:$16 sps:$4 sm:$0xff]   ;;  %v2910_v32 = vld [vmem:[#allocation5 + $0x2e0] ss:$16 sps:$4 sm:$0xff]   ;;  %v2968_v16 = vld [vmem:[#allocation5 + $0x28] ss:$16 sps:$4 sm:$0xff]  }
  0x49   :  { %1690 = vmatprep.subr.bf16.mxu0 %v2889_v18  ;;  %v2911_v33 = vld [vmem:[#allocation5 + $0x104] ss:$16 sps:$4 sm:$0xff]   ;;  %v2915_v35 = vld [vmem:[#allocation5 + $0x100] ss:$16 sps:$4 sm:$0xff]   ;;  %v2976_v18 = vld [vmem:[#allocation5 + $0x4c] ss:$16 sps:$4 sm:$0xff]  }
  0x4a   :  { %v2913_v34 = vld [vmem:[#allocation5 + $0x304] ss:$16 sps:$4 sm:$0xff]   ;;  %v2916_v36 = vld [vmem:[#allocation5 + $0x300] ss:$16 sps:$4 sm:$0xff]  }
  0x4b   :  { %1650 = vmatpush1.bf16.msra.mxu1 %v2891_v19  ;;  %v2917_v37 = vld [vmem:[#allocation5 + $0x124] ss:$16 sps:$4 sm:$0xff]   ;;  %v2921_v39 = vld [vmem:[#allocation5 + $0x120] ss:$16 sps:$4 sm:$0xff]  }
  0x4c   :  { %1691 = vmatpush1.bf16.msra.mxu0 %v2892_v20  ;;  %1651 = vmatprep.subr.bf16.mxu1 %v2893_v21  ;;  %v2919_v38 = vld [vmem:[#allocation5 + $0x324] ss:$16 sps:$4 sm:$0xff]   ;;  %v2922_v40 = vld [vmem:[#allocation5 + $0x320] ss:$16 sps:$4 sm:$0xff]   ;;  %v2974_v20 = vld [vmem:[#allocation5 + $0x48] ss:$16 sps:$4 sm:$0xff]  }
  0x4d   :  { %1692 = vmatprep.subr.bf16.mxu0 %v2895_v22  ;;  %v2923_v41 = vld [vmem:[#allocation5 + $0x144] ss:$16 sps:$4 sm:$0xff]   ;;  %v2927_v43 = vld [vmem:[#allocation5 + $0x140] ss:$16 sps:$4 sm:$0xff]   ;;  %v2982_v22 = vld [vmem:[#allocation5 + $0x6c] ss:$16 sps:$4 sm:$0xff]  }
  0x4e   :  { %v2925_v42 = vld [vmem:[#allocation5 + $0x344] ss:$16 sps:$4 sm:$0xff]   ;;  %v2928_v44 = vld [vmem:[#allocation5 + $0x340] ss:$16 sps:$4 sm:$0xff]  }
  0x4f   :  { %1652 = vmatpush1.bf16.msra.mxu1 %v2897_v23  ;;  %v2929_v45 = vld [vmem:[#allocation5 + $0x164] ss:$16 sps:$4 sm:$0xff]   ;;  %v2933_v48 = vld [vmem:[#allocation5 + $0x160] ss:$16 sps:$4 sm:$0xff]  }
  0x50   :  { %1693 = vmatpush1.bf16.msra.mxu0 %v2898_v24  ;;  %1653 = vmatprep.subr.bf16.mxu1 %v2899_v25  ;;  %v2931_v46 = vld [vmem:[#allocation5 + $0x364] ss:$16 sps:$4 sm:$0xff]   ;;  %v2934_v51 = vld [vmem:[#allocation5 + $0x360] ss:$16 sps:$4 sm:$0xff]   ;;  %v2980_v24 = vld [vmem:[#allocation5 + $0x68] ss:$16 sps:$4 sm:$0xff]  }
  0x51   :  { %1694 = vmatprep.subr.bf16.mxu0 %v2901_v26  ;;  %v2935_v52 = vld [vmem:[#allocation5 + $0x184] ss:$16 sps:$4 sm:$0xff]   ;;  %v2939_v55 = vld [vmem:[#allocation5 + $0x180] ss:$16 sps:$4 sm:$0xff]   ;;  %v2988_v26 = vld [vmem:[#allocation5 + $0x8c] ss:$16 sps:$4 sm:$0xff]  }
  0x52   :  { %v2937_v54 = vld [vmem:[#allocation5 + $0x384] ss:$16 sps:$4 sm:$0xff]   ;;  %v2940_v56 = vld [vmem:[#allocation5 + $0x380] ss:$16 sps:$4 sm:$0xff]  }
  0x53   :  { %1654 = vmatpush1.bf16.msra.mxu1 %v2903_v27  ;;  %v2941_v57 = vld [vmem:[#allocation5 + $0x1a4] ss:$16 sps:$4 sm:$0xff]   ;;  %v2945_v59 = vld [vmem:[#allocation5 + $0x1a0] ss:$16 sps:$4 sm:$0xff]  }
  0x54   :  { %1695 = vmatpush1.bf16.msra.mxu0 %v2904_v28  ;;  %1655 = vmatprep.subr.bf16.mxu1 %v2905_v29  ;;  %v2943_v58 = vld [vmem:[#allocation5 + $0x3a4] ss:$16 sps:$4 sm:$0xff]   ;;  %v2946_v60 = vld [vmem:[#allocation5 + $0x3a0] ss:$16 sps:$4 sm:$0xff]   ;;  %v2986_v28 = vld [vmem:[#allocation5 + $0x88] ss:$16 sps:$4 sm:$0xff]  }
  0x55   :  { %1696 = vmatprep.subr.bf16.mxu0 %v2907_v30  ;;  %v2947_v61 = vld [vmem:[#allocation5 + $0x1c4] ss:$16 sps:$4 sm:$0xff]   ;;  %v2951_v63 = vld [vmem:[#allocation5 + $0x1c0] ss:$16 sps:$4 sm:$0xff]   ;;  %v2994_v30 = vld [vmem:[#allocation5 + $0xac] ss:$16 sps:$4 sm:$0xff]  }
  0x56   :  { %v2949_v62 = vld [vmem:[#allocation5 + $0x3c4] ss:$16 sps:$4 sm:$0xff]   ;;  %v2952_v0 = vld [vmem:[#allocation5 + $0x3c0] ss:$16 sps:$4 sm:$0xff]  }
  0x57   :  { %1656 = vmatpush1.bf16.msra.mxu1 %v2909_v31  ;;  %v2953_v1 = vld [vmem:[#allocation5 + $0x1e4] ss:$16 sps:$4 sm:$0xff]   ;;  %v2957_v3 = vld [vmem:[#allocation5 + $0x1e0] ss:$16 sps:$4 sm:$0xff]  }
  0x58   :  { %1697 = vmatpush1.bf16.msra.mxu0 %v2910_v32  ;;  %1657 = vmatprep.subr.bf16.mxu1 %v2911_v33  ;;  %v2955_v2 = vld [vmem:[#allocation5 + $0x3e4] ss:$16 sps:$4 sm:$0xff]   ;;  %v2958_v4 = vld [vmem:[#allocation5 + $0x3e0] ss:$16 sps:$4 sm:$0xff]   ;;  %v2992_v32 = vld [vmem:[#allocation5 + $0xa8] ss:$16 sps:$4 sm:$0xff]  }
  0x59   :  { %1698 = vmatprep.subr.bf16.mxu0 %v2913_v34  ;;  %v67_v5 = vld [vmem:[#allocation3] sm:$0xff]  ;;  %v69_v7 = vld [vmem:[#allocation3 + $0x10] sm:$0xff]  ;;  %v3000_v34 = vld [vmem:[#allocation5 + $0xcc] ss:$16 sps:$4 sm:$0xff]  }
  0x5a   :  { %v2961_v6 = vld [vmem:[#allocation5 + $0x404] ss:$16 sps:$4 sm:$0xff]   ;;  %v3509_v9 = vpack.c.bf16 %v67_v5, %v67_v5  ;;  %v2959_v10 = vld [vmem:[#allocation5 + $0x400] ss:$16 sps:$4 sm:$0xff]   ;;  %v3511_v12 = vpack.c.bf16 %v69_v7, %v69_v7  ;;  %v3048_v5 = vld [vmem:[#allocation5 + $0x1cc] ss:$16 sps:$4 sm:$0xff]  }
  0x5b   :  { %1658 = vmatpush1.bf16.msra.mxu1 %v2915_v35  ;;  %v2967_v13 = vld [vmem:[#allocation5 + $0x424] ss:$16 sps:$4 sm:$0xff]   ;;  %v2965_v15 = vld [vmem:[#allocation5 + $0x420] ss:$16 sps:$4 sm:$0xff]   ;;  %v72_v35 = vld [vmem:[#allocation3 + $0x28] sm:$0xff] }
  0x5c   :  { %1699 = vmatpush1.bf16.msra.mxu0 %v2916_v36  ;;  %1659 = vmatprep.subr.bf16.mxu1 %v2917_v37  ;;  %v2973_v17 = vld [vmem:[#allocation5 + $0x444] ss:$16 sps:$4 sm:$0xff]   ;;  %v2971_v19 = vld [vmem:[#allocation5 + $0x440] ss:$16 sps:$4 sm:$0xff]   ;;  %v3516_v37 = vpack.c.bf16 %v72_v35, %v72_v35  ;;  %v3046_v7 = vld [vmem:[#allocation5 + $0x1c8] ss:$16 sps:$4 sm:$0xff]  }
  0x5d   :  { %1700 = vmatprep.subr.bf16.mxu0 %v2919_v38  ;;  %v2979_v21 = vld [vmem:[#allocation5 + $0x464] ss:$16 sps:$4 sm:$0xff]   ;;  %v2977_v23 = vld [vmem:[#allocation5 + $0x460] ss:$16 sps:$4 sm:$0xff]   ;;  %v2998_v38 = vld [vmem:[#allocation5 + $0xc8] ss:$16 sps:$4 sm:$0xff]  }
  0x5e   :  { %v2985_v25 = vld [vmem:[#allocation5 + $0x484] ss:$16 sps:$4 sm:$0xff]   ;;  %v2983_v27 = vld [vmem:[#allocation5 + $0x480] ss:$16 sps:$4 sm:$0xff]  }
  0x5f   :  { %1660 = vmatpush1.bf16.msra.mxu1 %v2921_v39  ;;  %v2991_v29 = vld [vmem:[#allocation5 + $0x4a4] ss:$16 sps:$4 sm:$0xff]   ;;  %v2989_v31 = vld [vmem:[#allocation5 + $0x4a0] ss:$16 sps:$4 sm:$0xff]  }
  0x60   :  { %1701 = vmatpush1.bf16.msra.mxu0 %v2922_v40  ;;  %1661 = vmatprep.subr.bf16.mxu1 %v2923_v41  ;;  %v2997_v33 = vld [vmem:[#allocation5 + $0x4c4] ss:$16 sps:$4 sm:$0xff]   ;;  %v2995_v36 = vld [vmem:[#allocation5 + $0x4c0] ss:$16 sps:$4 sm:$0xff]   ;;  %v3006_v40 = vld [vmem:[#allocation5 + $0xec] ss:$16 sps:$4 sm:$0xff]  }
  0x61   :  { %1702 = vmatprep.subr.bf16.mxu0 %v2925_v42  ;;  %v3003_v39 = vld [vmem:[#allocation5 + $0x4e4] ss:$16 sps:$4 sm:$0xff]   ;;  %v3001_v41 = vld [vmem:[#allocation5 + $0x4e0] ss:$16 sps:$4 sm:$0xff]   ;;  %v3004_v42 = vld [vmem:[#allocation5 + $0xe8] ss:$16 sps:$4 sm:$0xff]  }
  0x62   :  { %v3015_v47 = vld [vmem:[#allocation5 + $0x524] ss:$16 sps:$4 sm:$0xff]   ;;  %v3079_v35 = vld [vmem:[#allocation5 + $0x680] ss:$16 sps:$4 sm:$0xff]  }
  0x63   :  { %1662 = vmatpush1.bf16.msra.mxu1 %v2927_v43  ;;  %v3009_v43 = vld [vmem:[#allocation5 + $0x504] ss:$16 sps:$4 sm:$0xff]  }
  0x64   :  { %1703 = vmatpush1.bf16.msra.mxu0 %v2928_v44  ;;  %1663 = vmatprep.subr.bf16.mxu1 %v2929_v45  ;;  %v3012_v44 = vld [vmem:[#allocation5 + $0x10c] ss:$16 sps:$4 sm:$0xff]   ;;  %v3007_v45 = vld [vmem:[#allocation5 + $0x500] ss:$16 sps:$4 sm:$0xff]  }
  0x65   :  { %1704 = vmatprep.subr.bf16.mxu0 %v2931_v46  ;;  %v3010_v46 = vld [vmem:[#allocation5 + $0x108] ss:$16 sps:$4 sm:$0xff]  }
  0x67   :  { %1664 = vmatpush1.bf16.msra.mxu1 %v2933_v48  ;;  %v3018_v48 = vld [vmem:[#allocation5 + $0x12c] ss:$16 sps:$4 sm:$0xff]  }
  0x68   :  { %1705 = vmatpush1.bf16.msra.mxu0 %v2934_v51  ;;  %1665 = vmatprep.subr.bf16.mxu1 %v2935_v52  ;;  %v3021_v51 = vld [vmem:[#allocation5 + $0x544] ss:$16 sps:$4 sm:$0xff]   ;;  %v3024_v52 = vld [vmem:[#allocation5 + $0x14c] ss:$16 sps:$4 sm:$0xff]  }
  0x69   :  { %1706 = vmatprep.subr.bf16.mxu0 %v2937_v54  ;;  %v3019_v54 = vld [vmem:[#allocation5 + $0x540] ss:$16 sps:$4 sm:$0xff]  }
  0x6b   :  { %1666 = vmatpush1.bf16.msra.mxu1 %v2939_v55  ;;  %v3022_v55 = vld [vmem:[#allocation5 + $0x148] ss:$16 sps:$4 sm:$0xff]  }
  0x6c   :  { %1707 = vmatpush1.bf16.msra.mxu0 %v2940_v56  ;;  %1667 = vmatprep.subr.bf16.mxu1 %v2941_v57  ;;  %v3027_v56 = vld [vmem:[#allocation5 + $0x564] ss:$16 sps:$4 sm:$0xff]   ;;  %v3030_v57 = vld [vmem:[#allocation5 + $0x16c] ss:$16 sps:$4 sm:$0xff]  }
  0x6d   :  { %1708 = vmatprep.subr.bf16.mxu0 %v2943_v58  ;;  %v3025_v58 = vld [vmem:[#allocation5 + $0x560] ss:$16 sps:$4 sm:$0xff]  }
  0x6f   :  { %1668 = vmatpush1.bf16.msra.mxu1 %v2945_v59  ;;  %v3028_v59 = vld [vmem:[#allocation5 + $0x168] ss:$16 sps:$4 sm:$0xff]  }
  0x70   :  { %1709 = vmatpush1.bf16.msra.mxu0 %v2946_v60  ;;  %1669 = vmatprep.subr.bf16.mxu1 %v2947_v61  ;;  %v3033_v60 = vld [vmem:[#allocation5 + $0x584] ss:$16 sps:$4 sm:$0xff]   ;;  %v3036_v61 = vld [vmem:[#allocation5 + $0x18c] ss:$16 sps:$4 sm:$0xff]  }
  0x71   :  { %1710 = vmatprep.subr.bf16.mxu0 %v2949_v62  ;;  %v3031_v62 = vld [vmem:[#allocation5 + $0x580] ss:$16 sps:$4 sm:$0xff]  }
  0x73   :  { %1670 = vmatpush1.bf16.msra.mxu1 %v2951_v63  ;;  %v3034_v63 = vld [vmem:[#allocation5 + $0x188] ss:$16 sps:$4 sm:$0xff]  }
  0x74   :  { %1711 = vmatpush1.bf16.msra.mxu0 %v2952_v0  ;;  %1671 = vmatprep.subr.bf16.mxu1 %v2953_v1  ;;  %v3039_v0 = vld [vmem:[#allocation5 + $0x5a4] ss:$16 sps:$4 sm:$0xff]   ;;  %v3042_v1 = vld [vmem:[#allocation5 + $0x1ac] ss:$16 sps:$4 sm:$0xff]  }
  0x75   :  { %1712 = vmatprep.subr.bf16.mxu0 %v2955_v2  ;;  %v3037_v2 = vld [vmem:[#allocation5 + $0x5a0] ss:$16 sps:$4 sm:$0xff]  }
  0x77   :  { %1672 = vmatpush1.bf16.msra.mxu1 %v2957_v3  ;;  %v3040_v3 = vld [vmem:[#allocation5 + $0x1a8] ss:$16 sps:$4 sm:$0xff]  }
  0x78   :  { %1713 = vmatpush1.bf16.msra.mxu0 %v2958_v4  ;;  %1805 = vmatprep.subr.bf16.mxu1 %v2964_v8  ;;  %v3045_v4 = vld [vmem:[#allocation5 + $0x5c4] ss:$16 sps:$4 sm:$0xff]  }
  0x79   :  { %1723 = vmatprep.subr.bf16.mxu0 %v2961_v6  ;;  %v3043_v6 = vld [vmem:[#allocation5 + $0x5c0] ss:$16 sps:$4 sm:$0xff]   ;;  %v3051_v8 = vld [vmem:[#allocation5 + $0x5e4] ss:$16 sps:$4 sm:$0xff]  }
  0x7a   :  { %1674 = vmatmul.mubr.bf16.vlgmr.msra.gmra.mrb[0].mxu1 %v3509_v9 }
  0x7b   :  { %1715 = vmatmul.mubr.bf16.vlgmr.msra.gmra.mrb[0].mxu0 %v3511_v12  ;;  %1806 = vmatpush1.bf16.msra.mxu1 %v2962_v11  ;;  %v3049_v11 = vld [vmem:[#allocation5 + $0x5e0] ss:$16 sps:$4 sm:$0xff]  }
  0x7c   :  { %1724 = vmatpush1.bf16.msra.mxu0 %v2959_v10  ;;  %1807 = vmatprep.subr.bf16.mxu1 %v2970_v14  ;;  %v3054_v10 = vld [vmem:[#allocation5 + $0x1ec] ss:$16 sps:$4 sm:$0xff]   ;;  %v71_v14 = vld [vmem:[#allocation3 + $0x20] sm:$0xff] }
  0x7d   :  { %1725 = vmatprep.subr.bf16.mxu0 %v2967_v13  ;;  %1837 = vmatprep.mubr.bf16.mxu1 %v3503_v49  ;;  %v3013_v49 = vld [vmem:[#allocation5 + $0x520] ss:$16 sps:$4 sm:$0xff]   ;;  %v3052_v13 = vld [vmem:[#allocation5 + $0x1e8] ss:$16 sps:$4 sm:$0xff]  }
  0x7e   :  { %1755 = vmatprep.mubr.bf16.mxu0 %v3516_v37 }
  0x7f   :  { %1808 = vmatpush1.bf16.msra.mxu1 %v2968_v16  ;;  %v3060_v16 = vld [vmem:[#allocation5 + $0x20c] ss:$16 sps:$4 sm:$0xff]  }
  0x80   :  { %1726 = vmatpush1.bf16.msra.mxu0 %v2965_v15  ;;  %1809 = vmatprep.subr.bf16.mxu1 %v2976_v18  ;;  %v3057_v15 = vld [vmem:[#allocation5 + $0x604] ss:$16 sps:$4 sm:$0xff]   ;;  %v3055_v18 = vld [vmem:[#allocation5 + $0x600] ss:$16 sps:$4 sm:$0xff]  }
  0x81   :  { %1727 = vmatprep.subr.bf16.mxu0 %v2973_v17  ;;  %v3519_v17 = vpack.c.bf16 %v71_v14, %v71_v14  ;;  %v3139_v14 = vld [vmem:[#allocation5 + $0x7c0] ss:$16 sps:$4 sm:$0xff]  }
  0x83   :  { %1810 = vmatpush1.bf16.msra.mxu1 %v2974_v20  ;;  %v3063_v20 = vld [vmem:[#allocation5 + $0x624] ss:$16 sps:$4 sm:$0xff]  }
  0x84   :  { %1728 = vmatpush1.bf16.msra.mxu0 %v2971_v19  ;;  %1811 = vmatprep.subr.bf16.mxu1 %v2982_v22  ;;  %v3058_v19 = vld [vmem:[#allocation5 + $0x208] ss:$16 sps:$4 sm:$0xff]  }
  0x85   :  { %1729 = vmatprep.subr.bf16.mxu0 %v2979_v21  ;;  %v3066_v21 = vld [vmem:[#allocation5 + $0x22c] ss:$16 sps:$4 sm:$0xff]  }
  0x86   :  { %v74_v22 = vld [vmem:[#allocation3 + $0x38] sm:$0xff] }
  0x87   :  { %1812 = vmatpush1.bf16.msra.mxu1 %v2980_v24  ;;  %v3064_v24 = vld [vmem:[#allocation5 + $0x228] ss:$16 sps:$4 sm:$0xff]  }
  0x88   :  { %1730 = vmatpush1.bf16.msra.mxu0 %v2977_v23  ;;  %1813 = vmatprep.subr.bf16.mxu1 %v2988_v26  ;;  %v3061_v23 = vld [vmem:[#allocation5 + $0x620] ss:$16 sps:$4 sm:$0xff]   ;;  %v3069_v26 = vld [vmem:[#allocation5 + $0x644] ss:$16 sps:$4 sm:$0xff]  }
  0x89   :  { %1731 = vmatprep.subr.bf16.mxu0 %v2985_v25  ;;  %v3523_v25 = vpack.c.bf16 %v74_v22, %v74_v22  ;;  %v3153_v22 = vld [vmem:[#allocation5 + $0x40c] ss:$16 sps:$4 sm:$0xff]  }
  0x8b   :  { %1814 = vmatpush1.bf16.msra.mxu1 %v2986_v28  ;;  %v3067_v28 = vld [vmem:[#allocation5 + $0x640] ss:$16 sps:$4 sm:$0xff]  }
  0x8c   :  { %1732 = vmatpush1.bf16.msra.mxu0 %v2983_v27  ;;  %1815 = vmatprep.subr.bf16.mxu1 %v2994_v30  ;;  %v3072_v27 = vld [vmem:[#allocation5 + $0x24c] ss:$16 sps:$4 sm:$0xff]   ;;  %v3075_v30 = vld [vmem:[#allocation5 + $0x664] ss:$16 sps:$4 sm:$0xff]  }
  0x8d   :  { %1733 = vmatprep.subr.bf16.mxu0 %v2991_v29  ;;  %v3070_v29 = vld [vmem:[#allocation5 + $0x248] ss:$16 sps:$4 sm:$0xff]  }
  0x8f   :  { %1816 = vmatpush1.bf16.msra.mxu1 %v2992_v32  ;;  %v3076_v32 = vld [vmem:[#allocation5 + $0x268] ss:$16 sps:$4 sm:$0xff]  }
  0x90   :  { %1734 = vmatpush1.bf16.msra.mxu0 %v2989_v31  ;;  %1817 = vmatprep.subr.bf16.mxu1 %v3000_v34  ;;  %v3073_v31 = vld [vmem:[#allocation5 + $0x660] ss:$16 sps:$4 sm:$0xff]   ;;  %v3084_v34 = vld [vmem:[#allocation5 + $0x28c] ss:$16 sps:$4 sm:$0xff]  }
  0x91   :  { %1735 = vmatprep.subr.bf16.mxu0 %v2997_v33  ;;  %v3081_v33 = vld [vmem:[#allocation5 + $0x684] ss:$16 sps:$4 sm:$0xff]  }
  0x93   :  { %1818 = vmatpush1.bf16.msra.mxu1 %v2998_v38  ;;  %v3090_v38 = vld [vmem:[#allocation5 + $0x2ac] ss:$16 sps:$4 sm:$0xff]  }
  0x94   :  { %1736 = vmatpush1.bf16.msra.mxu0 %v2995_v36  ;;  %1819 = vmatprep.subr.bf16.mxu1 %v3006_v40  ;;  %v3082_v36 = vld [vmem:[#allocation5 + $0x288] ss:$16 sps:$4 sm:$0xff]  }
  0x95   :  { %1737 = vmatprep.subr.bf16.mxu0 %v3003_v39  ;;  %v3085_v39 = vld [vmem:[#allocation5 + $0x6a0] ss:$16 sps:$4 sm:$0xff]   ;;  %v3088_v40 = vld [vmem:[#allocation5 + $0x2a8] ss:$16 sps:$4 sm:$0xff]  }
  0x97   :  { %1820 = vmatpush1.bf16.msra.mxu1 %v3004_v42  ;;  %v3096_v42 = vld [vmem:[#allocation5 + $0x2cc] ss:$16 sps:$4 sm:$0xff]  }
  0x98   :  { %1738 = vmatpush1.bf16.msra.mxu0 %v3001_v41  ;;  %1821 = vmatprep.subr.bf16.mxu1 %v3012_v44  ;;  %v3093_v41 = vld [vmem:[#allocation5 + $0x6c4] ss:$16 sps:$4 sm:$0xff]   ;;  %v3094_v44 = vld [vmem:[#allocation5 + $0x2c8] ss:$16 sps:$4 sm:$0xff]  }
  0x99   :  { %1739 = vmatprep.subr.bf16.mxu0 %v3009_v43  ;;  %v3091_v43 = vld [vmem:[#allocation5 + $0x6c0] ss:$16 sps:$4 sm:$0xff]  }
  0x9b   :  { %1822 = vmatpush1.bf16.msra.mxu1 %v3010_v46  ;;  %v3102_v46 = vld [vmem:[#allocation5 + $0x2ec] ss:$16 sps:$4 sm:$0xff]  }
  0x9c   :  { %1740 = vmatpush1.bf16.msra.mxu0 %v3007_v45  ;;  %1823 = vmatprep.subr.bf16.mxu1 %v3018_v48  ;;  %v3099_v45 = vld [vmem:[#allocation5 + $0x6e4] ss:$16 sps:$4 sm:$0xff]   ;;  %v3100_v48 = vld [vmem:[#allocation5 + $0x2e8] ss:$16 sps:$4 sm:$0xff]  }
  0x9d   :  { %1741 = vmatprep.subr.bf16.mxu0 %v3015_v47  ;;  %v3097_v47 = vld [vmem:[#allocation5 + $0x6e0] ss:$16 sps:$4 sm:$0xff]  }
  0x9f   :  { %1824 = vmatpush1.bf16.msra.mxu1 %v3016_v50  ;;  %v3108_v50 = vld [vmem:[#allocation5 + $0x30c] ss:$16 sps:$4 sm:$0xff]  }
  0xa0   :  { %1742 = vmatpush1.bf16.msra.mxu0 %v3013_v49  ;;  %1825 = vmatprep.subr.bf16.mxu1 %v3024_v52  ;;  %v3105_v49 = vld [vmem:[#allocation5 + $0x704] ss:$16 sps:$4 sm:$0xff]   ;;  %v3106_v52 = vld [vmem:[#allocation5 + $0x308] ss:$16 sps:$4 sm:$0xff]  }
  0xa1   :  { %1743 = vmatprep.subr.bf16.mxu0 %v3021_v51  ;;  %v3103_v51 = vld [vmem:[#allocation5 + $0x700] ss:$16 sps:$4 sm:$0xff]  }
  0xa3   :  { %1826 = vmatpush1.bf16.msra.mxu1 %v3022_v55  ;;  %v3114_v55 = vld [vmem:[#allocation5 + $0x32c] ss:$16 sps:$4 sm:$0xff]  }
  0xa4   :  { %1744 = vmatpush1.bf16.msra.mxu0 %v3019_v54  ;;  %1827 = vmatprep.subr.bf16.mxu1 %v3030_v57  ;;  %v3111_v54 = vld [vmem:[#allocation5 + $0x724] ss:$16 sps:$4 sm:$0xff]   ;;  %v3112_v57 = vld [vmem:[#allocation5 + $0x328] ss:$16 sps:$4 sm:$0xff]  }
  0xa5   :  { %1745 = vmatprep.subr.bf16.mxu0 %v3027_v56  ;;  %v3109_v56 = vld [vmem:[#allocation5 + $0x720] ss:$16 sps:$4 sm:$0xff]  }
  0xa7   :  { %1828 = vmatpush1.bf16.msra.mxu1 %v3028_v59  ;;  %v3120_v59 = vld [vmem:[#allocation5 + $0x34c] ss:$16 sps:$4 sm:$0xff]  }
  0xa8   :  { %1746 = vmatpush1.bf16.msra.mxu0 %v3025_v58  ;;  %1829 = vmatprep.subr.bf16.mxu1 %v3036_v61  ;;  %v3117_v58 = vld [vmem:[#allocation5 + $0x744] ss:$16 sps:$4 sm:$0xff]   ;;  %v3118_v61 = vld [vmem:[#allocation5 + $0x348] ss:$16 sps:$4 sm:$0xff]  }
  0xa9   :  { %1747 = vmatprep.subr.bf16.mxu0 %v3033_v60  ;;  %v3115_v60 = vld [vmem:[#allocation5 + $0x740] ss:$16 sps:$4 sm:$0xff]  }
  0xab   :  { %1830 = vmatpush1.bf16.msra.mxu1 %v3034_v63  ;;  %v3126_v63 = vld [vmem:[#allocation5 + $0x36c] ss:$16 sps:$4 sm:$0xff]  }
  0xac   :  { %1748 = vmatpush1.bf16.msra.mxu0 %v3031_v62  ;;  %1831 = vmatprep.subr.bf16.mxu1 %v3042_v1  ;;  %v3123_v62 = vld [vmem:[#allocation5 + $0x764] ss:$16 sps:$4 sm:$0xff]   ;;  %v3124_v1 = vld [vmem:[#allocation5 + $0x368] ss:$16 sps:$4 sm:$0xff]  }
  0xad   :  { %1749 = vmatprep.subr.bf16.mxu0 %v3039_v0  ;;  %v3121_v0 = vld [vmem:[#allocation5 + $0x760] ss:$16 sps:$4 sm:$0xff]  }
  0xaf   :  { %1832 = vmatpush1.bf16.msra.mxu1 %v3040_v3  ;;  %v3132_v3 = vld [vmem:[#allocation5 + $0x38c] ss:$16 sps:$4 sm:$0xff]  }
  0xb0   :  { %1750 = vmatpush1.bf16.msra.mxu0 %v3037_v2  ;;  %1833 = vmatprep.subr.bf16.mxu1 %v3048_v5  ;;  %v3129_v2 = vld [vmem:[#allocation5 + $0x784] ss:$16 sps:$4 sm:$0xff]   ;;  %v3130_v5 = vld [vmem:[#allocation5 + $0x388] ss:$16 sps:$4 sm:$0xff]  }
  0xb1   :  { %1751 = vmatprep.subr.bf16.mxu0 %v3045_v4  ;;  %v3127_v4 = vld [vmem:[#allocation5 + $0x780] ss:$16 sps:$4 sm:$0xff]  }
  0xb3   :  { %1834 = vmatpush1.bf16.msra.mxu1 %v3046_v7  ;;  %v3138_v7 = vld [vmem:[#allocation5 + $0x3ac] ss:$16 sps:$4 sm:$0xff]  }
  0xb4   :  { %1752 = vmatpush1.bf16.msra.mxu0 %v3043_v6  ;;  %1835 = vmatprep.subr.bf16.mxu1 %v3054_v10  ;;  %v3135_v6 = vld [vmem:[#allocation5 + $0x7a4] ss:$16 sps:$4 sm:$0xff]   ;;  %v3136_v10 = vld [vmem:[#allocation5 + $0x3a8] ss:$16 sps:$4 sm:$0xff]  }
  0xb5   :  { %1753 = vmatprep.subr.bf16.mxu0 %v3051_v8  ;;  %v3133_v8 = vld [vmem:[#allocation5 + $0x7a0] ss:$16 sps:$4 sm:$0xff]  }
  0xb7   :  { %1836 = vmatpush1.bf16.msra.mxu1 %v3052_v13  ;;  %v3144_v13 = vld [vmem:[#allocation5 + $0x3cc] ss:$16 sps:$4 sm:$0xff]  }
  0xb8   :  { %1754 = vmatpush1.bf16.msra.mxu0 %v3049_v11  ;;  %1846 = vmatprep.subr.bf16.mxu1 %v3060_v16  ;;  %v3141_v11 = vld [vmem:[#allocation5 + $0x7c4] ss:$16 sps:$4 sm:$0xff]  }
  0xb9   :  { %1764 = vmatprep.subr.bf16.mxu0 %v3057_v15  ;;  %v3142_v15 = vld [vmem:[#allocation5 + $0x3c8] ss:$16 sps:$4 sm:$0xff]   ;;  %v3147_v16 = vld [vmem:[#allocation5 + $0x7e4] ss:$16 sps:$4 sm:$0xff]  }
  0xba   :  { %1838 = vmatmul.mubr.bf16.vlgmr.msra.gmra.mrb[4].mxu1 %v3509_v9  ;;  %v3078_v9 = vld [vmem:[#allocation5 + $0x26c] ss:$16 sps:$4 sm:$0xff]  }
  0xbb   :  { %1756 = vmatmul.mubr.bf16.vlgmr.msra.gmra.mrb[0].mxu0 %v3519_v17  ;;  %1847 = vmatpush1.bf16.msra.mxu1 %v3058_v19  ;;  %v3145_v19 = vld [vmem:[#allocation5 + $0x7e0] ss:$16 sps:$4 sm:$0xff]  }
  0xbc   :  { %1765 = vmatpush1.bf16.msra.mxu0 %v3055_v18  ;;  %1848 = vmatprep.subr.bf16.mxu1 %v3066_v21  ;;  %v3150_v18 = vld [vmem:[#allocation5 + $0x3ec] ss:$16 sps:$4 sm:$0xff]   ;;  %v73_v21 = vld [vmem:[#allocation3 + $0x30] sm:$0xff] }
  0xbd   :  { %1766 = vmatprep.subr.bf16.mxu0 %v3063_v20  ;;  %1796 = vmatprep.mubr.bf16.mxu0 %v3523_v25  ;;  %v3148_v20 = vld [vmem:[#allocation5 + $0x3e8] ss:$16 sps:$4 sm:$0xff]  }
  0xbe   :  { %1878 = vmatprep.mubr.bf16.mxu1 %v3505_v53  ;;  %v3087_v53 = vld [vmem:[#allocation5 + $0x6a4] ss:$16 sps:$4 sm:$0xff]  }
  0xbf   :  { %1849 = vmatpush1.bf16.msra.mxu1 %v3064_v24  ;;  %v3527_v24 = vpack.c.bf16 %v73_v21, %v73_v21  ;;  %v3201_v21 = vld [vmem:[#allocation5 + $0x60c] ss:$16 sps:$4 sm:$0xff]  }
  0xc0   :  { %1767 = vmatpush1.bf16.msra.mxu0 %v3061_v23  ;;  %1850 = vmatprep.subr.bf16.mxu1 %v3072_v27  ;;  %v3151_v23 = vld [vmem:[#allocation5 + $0x408] ss:$16 sps:$4 sm:$0xff]  }
  0xc1   :  { %1768 = vmatprep.subr.bf16.mxu0 %v3069_v26  ;;  %v3156_v26 = vld [vmem:[#allocation5 + $0x42c] ss:$16 sps:$4 sm:$0xff]   ;;  %v3247_v27 = vld [vmem:[#allocation7] ss:$8 sps:$4 sm:$0xff]  }
  0xc3   :  { %1851 = vmatpush1.bf16.msra.mxu1 %v3070_v29  ;;  %v3154_v29 = vld [vmem:[#allocation5 + $0x428] ss:$16 sps:$4 sm:$0xff]  }
  0xc4   :  { %1769 = vmatpush1.bf16.msra.mxu0 %v3067_v28  ;;  %1852 = vmatprep.subr.bf16.mxu1 %v3078_v9  ;;  %v3249_v28 = vld [vmem:[#allocation7 + $0x4] ss:$8 sps:$4 sm:$0xff]  }
  0xc5   :  { %1770 = vmatprep.subr.bf16.mxu0 %v3075_v30  ;;  %v3252_v30 = vld [vmem:[#allocation7 + $0x14] ss:$8 sps:$4 sm:$0xff]  }
  0xc6   :  { %v3159_v9 = vld [vmem:[#allocation5 + $0x44c] ss:$16 sps:$4 sm:$0xff]  }
  0xc7   :  { %1853 = vmatpush1.bf16.msra.mxu1 %v3076_v32  ;;  %v3255_v32 = vld [vmem:[#allocation7 + $0x24] ss:$8 sps:$4 sm:$0xff]  }
  0xc8   :  { %1771 = vmatpush1.bf16.msra.mxu0 %v3073_v31  ;;  %1854 = vmatprep.subr.bf16.mxu1 %v3084_v34  ;;  %v3250_v31 = vld [vmem:[#allocation7 + $0x10] ss:$8 sps:$4 sm:$0xff]   ;;  %v3162_v34 = vld [vmem:[#allocation5 + $0x46c] ss:$16 sps:$4 sm:$0xff]  }
  0xc9   :  { %1772 = vmatprep.subr.bf16.mxu0 %v3081_v33  ;;  %v3157_v33 = vld [vmem:[#allocation5 + $0x448] ss:$16 sps:$4 sm:$0xff]  }
  0xcb   :  { %1855 = vmatpush1.bf16.msra.mxu1 %v3082_v36  ;;  %v3160_v36 = vld [vmem:[#allocation5 + $0x468] ss:$16 sps:$4 sm:$0xff]  }
  0xcc   :  { %1773 = vmatpush1.bf16.msra.mxu0 %v3079_v35  ;;  %1856 = vmatprep.subr.bf16.mxu1 %v3090_v38  ;;  %v3258_v35 = vld [vmem:[#allocation7 + $0x34] ss:$8 sps:$4 sm:$0xff]   ;;  %v3261_v38 = vld [vmem:[#allocation7 + $0x44] ss:$8 sps:$4 sm:$0xff]  }
  0xcd   :  { %1774 = vmatprep.subr.bf16.mxu0 %v3087_v53  ;;  %v3256_v53 = vld [vmem:[#allocation7 + $0x30] ss:$8 sps:$4 sm:$0xff]  }
  0xcf   :  { %1857 = vmatpush1.bf16.msra.mxu1 %v3088_v40  ;;  %v3168_v40 = vld [vmem:[#allocation5 + $0x4ac] ss:$16 sps:$4 sm:$0xff]  }
  0xd0   :  { %1775 = vmatpush1.bf16.msra.mxu0 %v3085_v39  ;;  %1858 = vmatprep.subr.bf16.mxu1 %v3096_v42  ;;  %v3163_v39 = vld [vmem:[#allocation5 + $0x488] ss:$16 sps:$4 sm:$0xff]   ;;  %v3264_v42 = vld [vmem:[#allocation7 + $0x54] ss:$8 sps:$4 sm:$0xff]  }
  0xd1   :  { %1776 = vmatprep.subr.bf16.mxu0 %v3093_v41  ;;  %v3259_v41 = vld [vmem:[#allocation7 + $0x40] ss:$8 sps:$4 sm:$0xff]  }
  0xd3   :  { %1859 = vmatpush1.bf16.msra.mxu1 %v3094_v44  ;;  %v3171_v44 = vld [vmem:[#allocation5 + $0x4cc] ss:$16 sps:$4 sm:$0xff]  }
  0xd4   :  { %1777 = vmatpush1.bf16.msra.mxu0 %v3091_v43  ;;  %1860 = vmatprep.subr.bf16.mxu1 %v3102_v46  ;;  %v3166_v43 = vld [vmem:[#allocation5 + $0x4a8] ss:$16 sps:$4 sm:$0xff]   ;;  %v3267_v46 = vld [vmem:[#allocation7 + $0x64] ss:$8 sps:$4 sm:$0xff]  }
  0xd5   :  { %1778 = vmatprep.subr.bf16.mxu0 %v3099_v45  ;;  %v3262_v45 = vld [vmem:[#allocation7 + $0x50] ss:$8 sps:$4 sm:$0xff]  }
  0xd7   :  { %1861 = vmatpush1.bf16.msra.mxu1 %v3100_v48  ;;  %v3174_v48 = vld [vmem:[#allocation5 + $0x4ec] ss:$16 sps:$4 sm:$0xff]  }
  0xd8   :  { %1779 = vmatpush1.bf16.msra.mxu0 %v3097_v47  ;;  %1862 = vmatprep.subr.bf16.mxu1 %v3108_v50  ;;  %v3169_v47 = vld [vmem:[#allocation5 + $0x4c8] ss:$16 sps:$4 sm:$0xff]   ;;  %v3270_v50 = vld [vmem:[#allocation7 + $0x74] ss:$8 sps:$4 sm:$0xff]  }
  0xd9   :  { %1780 = vmatprep.subr.bf16.mxu0 %v3105_v49  ;;  %v3265_v49 = vld [vmem:[#allocation7 + $0x60] ss:$8 sps:$4 sm:$0xff]  }
  0xdb   :  { %1863 = vmatpush1.bf16.msra.mxu1 %v3106_v52  ;;  %v3177_v52 = vld [vmem:[#allocation5 + $0x50c] ss:$16 sps:$4 sm:$0xff]  }
  0xdc   :  { %1781 = vmatpush1.bf16.msra.mxu0 %v3103_v51  ;;  %1864 = vmatprep.subr.bf16.mxu1 %v3114_v55  ;;  %v3172_v51 = vld [vmem:[#allocation5 + $0x4e8] ss:$16 sps:$4 sm:$0xff]   ;;  %v3273_v55 = vld [vmem:[#allocation7 + $0x84] ss:$8 sps:$4 sm:$0xff]  }
  0xdd   :  { %1782 = vmatprep.subr.bf16.mxu0 %v3111_v54  ;;  %v3268_v54 = vld [vmem:[#allocation7 + $0x70] ss:$8 sps:$4 sm:$0xff]  }
  0xdf   :  { %1865 = vmatpush1.bf16.msra.mxu1 %v3112_v57  ;;  %v3180_v57 = vld [vmem:[#allocation5 + $0x52c] ss:$16 sps:$4 sm:$0xff]  }
  0xe0   :  { %1783 = vmatpush1.bf16.msra.mxu0 %v3109_v56  ;;  %1866 = vmatprep.subr.bf16.mxu1 %v3120_v59  ;;  %v3175_v56 = vld [vmem:[#allocation5 + $0x508] ss:$16 sps:$4 sm:$0xff]   ;;  %v3276_v59 = vld [vmem:[#allocation7 + $0x94] ss:$8 sps:$4 sm:$0xff]  }
  0xe1   :  { %1784 = vmatprep.subr.bf16.mxu0 %v3117_v58  ;;  %v3271_v58 = vld [vmem:[#allocation7 + $0x80] ss:$8 sps:$4 sm:$0xff]  }
  0xe3   :  { %1867 = vmatpush1.bf16.msra.mxu1 %v3118_v61  ;;  %v3183_v61 = vld [vmem:[#allocation5 + $0x54c] ss:$16 sps:$4 sm:$0xff]  }
  0xe4   :  { %1785 = vmatpush1.bf16.msra.mxu0 %v3115_v60  ;;  %1868 = vmatprep.subr.bf16.mxu1 %v3126_v63  ;;  %v3178_v60 = vld [vmem:[#allocation5 + $0x528] ss:$16 sps:$4 sm:$0xff]   ;;  %v3279_v63 = vld [vmem:[#allocation7 + $0xa4] ss:$8 sps:$4 sm:$0xff]  }
  0xe5   :  { %1786 = vmatprep.subr.bf16.mxu0 %v3123_v62  ;;  %v3274_v62 = vld [vmem:[#allocation7 + $0x90] ss:$8 sps:$4 sm:$0xff]  }
  0xe7   :  { %1869 = vmatpush1.bf16.msra.mxu1 %v3124_v1  ;;  %v3186_v1 = vld [vmem:[#allocation5 + $0x56c] ss:$16 sps:$4 sm:$0xff]  }
  0xe8   :  { %1787 = vmatpush1.bf16.msra.mxu0 %v3121_v0  ;;  %1870 = vmatprep.subr.bf16.mxu1 %v3132_v3  ;;  %v3181_v0 = vld [vmem:[#allocation5 + $0x548] ss:$16 sps:$4 sm:$0xff]   ;;  %v3282_v3 = vld [vmem:[#allocation7 + $0xb4] ss:$8 sps:$4 sm:$0xff]  }
  0xe9   :  { %1788 = vmatprep.subr.bf16.mxu0 %v3129_v2  ;;  %v3277_v2 = vld [vmem:[#allocation7 + $0xa0] ss:$8 sps:$4 sm:$0xff]  }
  0xeb   :  { %1871 = vmatpush1.bf16.msra.mxu1 %v3130_v5  ;;  %v3189_v5 = vld [vmem:[#allocation5 + $0x58c] ss:$16 sps:$4 sm:$0xff]  }
  0xec   :  { %1789 = vmatpush1.bf16.msra.mxu0 %v3127_v4  ;;  %1872 = vmatprep.subr.bf16.mxu1 %v3138_v7  ;;  %v3184_v4 = vld [vmem:[#allocation5 + $0x568] ss:$16 sps:$4 sm:$0xff]   ;;  %v3285_v7 = vld [vmem:[#allocation7 + $0xc4] ss:$8 sps:$4 sm:$0xff]  }
  0xed   :  { %1790 = vmatprep.subr.bf16.mxu0 %v3135_v6  ;;  %v3280_v6 = vld [vmem:[#allocation7 + $0xb0] ss:$8 sps:$4 sm:$0xff]  }
  0xef   :  { %1873 = vmatpush1.bf16.msra.mxu1 %v3136_v10  ;;  %v3192_v10 = vld [vmem:[#allocation5 + $0x5ac] ss:$16 sps:$4 sm:$0xff]  }
  0xf0   :  { %1791 = vmatpush1.bf16.msra.mxu0 %v3133_v8  ;;  %1874 = vmatprep.subr.bf16.mxu1 %v3144_v13  ;;  %v3187_v8 = vld [vmem:[#allocation5 + $0x588] ss:$16 sps:$4 sm:$0xff]   ;;  %v3288_v13 = vld [vmem:[#allocation7 + $0xd4] ss:$8 sps:$4 sm:$0xff]  }
  0xf1   :  { %1792 = vmatprep.subr.bf16.mxu0 %v3141_v11  ;;  %v3283_v11 = vld [vmem:[#allocation7 + $0xc0] ss:$8 sps:$4 sm:$0xff]  }
  0xf3   :  { %1875 = vmatpush1.bf16.msra.mxu1 %v3142_v15  ;;  %v3195_v15 = vld [vmem:[#allocation5 + $0x5cc] ss:$16 sps:$4 sm:$0xff]  }
  0xf4   :  { %1793 = vmatpush1.bf16.msra.mxu0 %v3139_v14  ;;  %1876 = vmatprep.subr.bf16.mxu1 %v3150_v18  ;;  %v3190_v14 = vld [vmem:[#allocation5 + $0x5a8] ss:$16 sps:$4 sm:$0xff]  }
  0xf5   :  { %1794 = vmatprep.subr.bf16.mxu0 %v3147_v16  ;;  %v3286_v16 = vld [vmem:[#allocation7 + $0xd0] ss:$8 sps:$4 sm:$0xff]  }
  0xf6   :  { %v3193_v18 = vld [vmem:[#allocation5 + $0x5c8] ss:$16 sps:$4 sm:$0xff]  }
  0xf7   :  { %1877 = vmatpush1.bf16.msra.mxu1 %v3148_v20  ;;  %v3196_v20 = vld [vmem:[#allocation5 + $0x5e8] ss:$16 sps:$4 sm:$0xff]  }
  0xf8   :  { %1795 = vmatpush1.bf16.msra.mxu0 %v3145_v19  ;;  %1887 = vmatprep.subr.bf16.mxu1 %v3153_v22  ;;  %v3198_v19 = vld [vmem:[#allocation5 + $0x5ec] ss:$16 sps:$4 sm:$0xff]   ;;  %v3199_v22 = vld [vmem:[#allocation5 + $0x608] ss:$16 sps:$4 sm:$0xff]  }
  0xf9   :  { %2377 = vmatprep.subr.bf16.mxu0 %v3249_v28  ;;  %v3205_v28 = vld [vmem:[#allocation5 + $0x648] ss:$16 sps:$4 sm:$0xff]  }
  0xfa   :  { %1879 = vmatmul.mubr.bf16.vlgmr.msra.gmra.mrb[4].mxu1 %v3511_v12  ;;  %v3253_v12 = vld [vmem:[#allocation7 + $0x20] ss:$8 sps:$4 sm:$0xff]  }
  0xfb   :  { %1797 = vmatmul.mubr.bf16.vlgmr.msra.gmra.mrb[0].mxu0 %v3527_v24  ;;  %1888 = vmatpush1.bf16.msra.mxu1 %v3151_v23  ;;  %v3204_v23 = vld [vmem:[#allocation5 + $0x62c] ss:$16 sps:$4 sm:$0xff]  }
  0xfc   :  { %1919 = vmatprep.mubr.bf16.mxu1 %v3516_v37  ;;  %1889 = vmatprep.subr.bf16.mxu1 %v3156_v26  ;;  %v3165_v37 = vld [vmem:[#allocation5 + $0x48c] ss:$16 sps:$4 sm:$0xff]   ;;  %v3202_v26 = vld [vmem:[#allocation5 + $0x628] ss:$16 sps:$4 sm:$0xff]  }
  0xfd   :  { %2378 = vmatpush1.bf16.msra.mxu0 %v3247_v27  ;;  %v3207_v27 = vld [vmem:[#allocation5 + $0x64c] ss:$16 sps:$4 sm:$0xff]  }
  0xfe   :  { %2379 = vmatprep.subr.bf16.mxu0 %v3252_v30  ;;  %v3208_v30 = vld [vmem:[#allocation5 + $0x668] ss:$16 sps:$4 sm:$0xff]  }
  0xff   :  { %1890 = vmatpush1.bf16.msra.mxu1 %v3154_v29  ;;  %v3210_v29 = vld [vmem:[#allocation5 + $0x66c] ss:$16 sps:$4 sm:$0xff]  }
 0x100   :  { %1891 = vmatprep.subr.bf16.mxu1 %v3159_v9  ;;  %v3213_v9 = vld [vmem:[#allocation5 + $0x68c] ss:$16 sps:$4 sm:$0xff]  }
 0x101   :  { %2380 = vmatpush1.bf16.msra.mxu0 %v3250_v31  ;;  %v3211_v31 = vld [vmem:[#allocation5 + $0x688] ss:$16 sps:$4 sm:$0xff]  }
 0x102   :  { %2381 = vmatprep.subr.bf16.mxu0 %v3255_v32  ;;  %v3216_v32 = vld [vmem:[#allocation5 + $0x6ac] ss:$16 sps:$4 sm:$0xff]  }
 0x103   :  { %1892 = vmatpush1.bf16.msra.mxu1 %v3157_v33  ;;  %v3219_v33 = vld [vmem:[#allocation5 + $0x6cc] ss:$16 sps:$4 sm:$0xff]  }
 0x104   :  { %1893 = vmatprep.subr.bf16.mxu1 %v3162_v34 }
 0x105   :  { %2382 = vmatpush1.bf16.msra.mxu0 %v3253_v12  ;;  %v3291_v12 = vld [vmem:[#allocation7 + $0xe4] ss:$8 sps:$4 sm:$0xff]  }
 0x106   :  { %2383 = vmatprep.subr.bf16.mxu0 %v3258_v35 }
 0x107   :  { %1894 = vmatpush1.bf16.msra.mxu1 %v3160_v36  ;;  %v3217_v36 = vld [vmem:[#allocation5 + $0x6c8] ss:$16 sps:$4 sm:$0xff]  }
 0x108   :  { %1895 = vmatprep.subr.bf16.mxu1 %v3165_v37  ;;  %v3289_v37 = vld [vmem:[#allocation7 + $0xe0] ss:$8 sps:$4 sm:$0xff]  }
 0x109   :  { %2384 = vmatpush1.bf16.msra.mxu0 %v3256_v53 }
 0x10a   :  { %2385 = vmatprep.subr.bf16.mxu0 %v3261_v38  ;;  %v3222_v38 = vld [vmem:[#allocation5 + $0x6ec] ss:$16 sps:$4 sm:$0xff]  }
 0x10b   :  { %1896 = vmatpush1.bf16.msra.mxu1 %v3163_v39  ;;  %v3294_v39 = vld [vmem:[#allocation7 + $0xf4] ss:$8 sps:$4 sm:$0xff]  }
 0x10c   :  { %1897 = vmatprep.subr.bf16.mxu1 %v3168_v40  ;;  %v3220_v40 = vld [vmem:[#allocation5 + $0x6e8] ss:$16 sps:$4 sm:$0xff]  }
 0x10d   :  { %2386 = vmatpush1.bf16.msra.mxu0 %v3259_v41  ;;  %v3292_v41 = vld [vmem:[#allocation7 + $0xf0] ss:$8 sps:$4 sm:$0xff]  }
 0x10e   :  { %2387 = vmatprep.subr.bf16.mxu0 %v3264_v42  ;;  %v3225_v42 = vld [vmem:[#allocation5 + $0x70c] ss:$16 sps:$4 sm:$0xff]  }
 0x10f   :  { %1898 = vmatpush1.bf16.msra.mxu1 %v3166_v43  ;;  %v3223_v43 = vld [vmem:[#allocation5 + $0x708] ss:$16 sps:$4 sm:$0xff]  }
 0x110   :  { %1899 = vmatprep.subr.bf16.mxu1 %v3171_v44  ;;  %v3228_v44 = vld [vmem:[#allocation5 + $0x72c] ss:$16 sps:$4 sm:$0xff]  }
 0x111   :  { %2388 = vmatpush1.bf16.msra.mxu0 %v3262_v45  ;;  %v3297_v45 = vld [vmem:[#allocation7 + $0x104] ss:$8 sps:$4 sm:$0xff]  }
 0x112   :  { %2389 = vmatprep.subr.bf16.mxu0 %v3267_v46  ;;  %v3226_v46 = vld [vmem:[#allocation5 + $0x728] ss:$16 sps:$4 sm:$0xff]  }
 0x113   :  { %1900 = vmatpush1.bf16.msra.mxu1 %v3169_v47  ;;  %v3231_v47 = vld [vmem:[#allocation5 + $0x74c] ss:$16 sps:$4 sm:$0xff]  }
 0x114   :  { %1901 = vmatprep.subr.bf16.mxu1 %v3174_v48  ;;  %v3229_v48 = vld [vmem:[#allocation5 + $0x748] ss:$16 sps:$4 sm:$0xff]  }
 0x115   :  { %2390 = vmatpush1.bf16.msra.mxu0 %v3265_v49  ;;  %v3234_v49 = vld [vmem:[#allocation5 + $0x76c] ss:$16 sps:$4 sm:$0xff]  }
 0x116   :  { %2391 = vmatprep.subr.bf16.mxu0 %v3270_v50  ;;  %v3232_v50 = vld [vmem:[#allocation5 + $0x768] ss:$16 sps:$4 sm:$0xff]  }
 0x117   :  { %1902 = vmatpush1.bf16.msra.mxu1 %v3172_v51  ;;  %v3237_v51 = vld [vmem:[#allocation5 + $0x78c] ss:$16 sps:$4 sm:$0xff]  }
 0x118   :  { %1903 = vmatprep.subr.bf16.mxu1 %v3177_v52  ;;  %v3235_v52 = vld [vmem:[#allocation5 + $0x788] ss:$16 sps:$4 sm:$0xff]  }
 0x119   :  { %2392 = vmatpush1.bf16.msra.mxu0 %v3268_v54  ;;  %v3240_v54 = vld [vmem:[#allocation5 + $0x7ac] ss:$16 sps:$4 sm:$0xff]  }
 0x11a   :  { %2393 = vmatprep.subr.bf16.mxu0 %v3273_v55  ;;  %v3238_v55 = vld [vmem:[#allocation5 + $0x7a8] ss:$16 sps:$4 sm:$0xff]  }
 0x11b   :  { %1904 = vmatpush1.bf16.msra.mxu1 %v3175_v56  ;;  %v3243_v56 = vld [vmem:[#allocation5 + $0x7cc] ss:$16 sps:$4 sm:$0xff]  }
 0x11c   :  { %1905 = vmatprep.subr.bf16.mxu1 %v3180_v57  ;;  %v3241_v57 = vld [vmem:[#allocation5 + $0x7c8] ss:$16 sps:$4 sm:$0xff]  }
 0x11d   :  { %2394 = vmatpush1.bf16.msra.mxu0 %v3271_v58  ;;  %v3246_v58 = vld [vmem:[#allocation5 + $0x7ec] ss:$16 sps:$4 sm:$0xff]  }
 0x11e   :  { %2395 = vmatprep.subr.bf16.mxu0 %v3276_v59  ;;  %v3244_v59 = vld [vmem:[#allocation5 + $0x7e8] ss:$16 sps:$4 sm:$0xff]  }
 0x11f   :  { %1906 = vmatpush1.bf16.msra.mxu1 %v3178_v60  ;;  %v341_v60 = vlaneseq }
 0x120   :  { %1907 = vmatprep.subr.bf16.mxu1 %v3183_v61 }
 0x121   :  { %2396 = vmatpush1.bf16.msra.mxu0 %v3274_v62  ;;  %v3535_v61 = vshrl.u32 %v341_v60, 7 }
 0x122   :  { %2397 = vmatprep.subr.bf16.mxu0 %v3279_v63  ;;  %v3543_v63 = vld [vmem:[%s3571_s2] sm:$0xf] }
 0x123   :  { %1908 = vmatpush1.bf16.msra.mxu1 %v3181_v0  ;;  %v3538_v62 = vsub.s32 0, %v3535_v61  ;;  %v3546_v0 = vsub.s32 1, %v3535_v61 }
 0x124   :  { %1909 = vmatprep.subr.bf16.mxu1 %v3186_v1 }
 0x125   :  { %2398 = vmatpush1.bf16.msra.mxu0 %v3277_v2  ;;  %v344_v1 = vrot.slane %v3543_v63, %v3538_v62 }
 0x126   :  { %2399 = vmatprep.subr.bf16.mxu0 %v3282_v3 }
 0x127   :  { %1910 = vmatpush1.bf16.msra.mxu1 %v3184_v4 }
 0x128   :  { %1911 = vmatprep.subr.bf16.mxu1 %v3189_v5 }
 0x129   :  { %2400 = vmatpush1.bf16.msra.mxu0 %v3280_v6 }
 0x12a   :  { %2401 = vmatprep.subr.bf16.mxu0 %v3285_v7 }
 0x12b   :  { %1912 = vmatpush1.bf16.msra.mxu1 %v3187_v8 }
 0x12c   :  { %1913 = vmatprep.subr.bf16.mxu1 %v3192_v10 }
 0x12d   :  { %2402 = vmatpush1.bf16.msra.mxu0 %v3283_v11 }
 0x12e   :  { %2403 = vmatprep.subr.bf16.mxu0 %v3288_v13 }
 0x12f   :  { %1914 = vmatpush1.bf16.msra.mxu1 %v3190_v14 }
 0x130   :  { %1915 = vmatprep.subr.bf16.mxu1 %v3195_v15 }
 0x131   :  { %2404 = vmatpush1.bf16.msra.mxu0 %v3286_v16 }
 0x132   :  { %2405 = vmatprep.subr.bf16.mxu0 %v3291_v12  ;;  %v3324_v12 = vld [vmem:[#allocation7 + $0x194] ss:$8 sps:$4 sm:$0xff]  }
 0x133   :  { %1916 = vmatpush1.bf16.msra.mxu1 %v3193_v18  ;;  %v3295_v18 = vld [vmem:[#allocation7 + $0x100] ss:$8 sps:$4 sm:$0xff]  }
 0x134   :  { %1917 = vmatprep.subr.bf16.mxu1 %v3198_v19 }
 0x135   :  { %2406 = vmatpush1.bf16.msra.mxu0 %v3289_v37  ;;  %v3325_v37 = vld [vmem:[#allocation7 + $0x1a0] ss:$8 sps:$4 sm:$0xff]  }
 0x136   :  { %2407 = vmatprep.subr.bf16.mxu0 %v3294_v39  ;;  %v3333_v39 = vld [vmem:[#allocation7 + $0x1c4] ss:$8 sps:$4 sm:$0xff]  }
 0x137   :  { %1918 = vmatpush1.bf16.msra.mxu1 %v3196_v20  ;;  %v3300_v20 = vld [vmem:[#allocation7 + $0x114] ss:$8 sps:$4 sm:$0xff]  }
 0x138   :  { %1928 = vmatprep.subr.bf16.mxu1 %v3201_v21  ;;  %v3298_v21 = vld [vmem:[#allocation7 + $0x110] ss:$8 sps:$4 sm:$0xff]  }
 0x139   :  { %2408 = vmatpush1.bf16.msra.mxu0 %v3292_v41  ;;  %v3336_v41 = vld [vmem:[#allocation7 + $0x1d4] ss:$8 sps:$4 sm:$0xff]  }
 0x13a   :  { %1920 = vmatmul.mubr.bf16.vlgmr.msra.gmra.mrb[4].mxu1 %v3519_v17  ;;  %v3214_v17 = vld [vmem:[#allocation5 + $0x6a8] ss:$16 sps:$4 sm:$0xff]   ;;  %2418 = vmatprep.subr.bf16.mxu0 %v3297_v45  ;;  %v3342_v45 = vld [vmem:[#allocation7 + $0x1f4] ss:$8 sps:$4 sm:$0xff]  }
 0x13b   :  { %1929 = vmatpush1.bf16.msra.mxu1 %v3199_v22  ;;  %1960 = vmatprep.mubr.bf16.mxu1 %v3523_v25  ;;  %v3303_v22 = vld [vmem:[#allocation7 + $0x124] ss:$8 sps:$4 sm:$0xff]  }
 0x13c   :  { %1930 = vmatprep.subr.bf16.mxu1 %v3204_v23  ;;  %v3301_v23 = vld [vmem:[#allocation7 + $0x120] ss:$8 sps:$4 sm:$0xff]  }
 0x13f   :  { %1931 = vmatpush1.bf16.msra.mxu1 %v3202_v26  ;;  %v3306_v26 = vld [vmem:[#allocation7 + $0x134] ss:$8 sps:$4 sm:$0xff]  }
 0x140   :  { %1932 = vmatprep.subr.bf16.mxu1 %v3207_v27  ;;  %v3304_v27 = vld [vmem:[#allocation7 + $0x130] ss:$8 sps:$4 sm:$0xff]  }
 0x143   :  { %1933 = vmatpush1.bf16.msra.mxu1 %v3205_v28  ;;  %v3309_v28 = vld [vmem:[#allocation7 + $0x144] ss:$8 sps:$4 sm:$0xff]  }
 0x144   :  { %1934 = vmatprep.subr.bf16.mxu1 %v3210_v29  ;;  %v3307_v29 = vld [vmem:[#allocation7 + $0x140] ss:$8 sps:$4 sm:$0xff]  }
 0x147   :  { %1935 = vmatpush1.bf16.msra.mxu1 %v3208_v30  ;;  %v3312_v30 = vld [vmem:[#allocation7 + $0x154] ss:$8 sps:$4 sm:$0xff]  }
 0x148   :  { %1936 = vmatprep.subr.bf16.mxu1 %v3213_v9  ;;  %v3310_v9 = vld [vmem:[#allocation7 + $0x150] ss:$8 sps:$4 sm:$0xff]  }
 0x14b   :  { %1937 = vmatpush1.bf16.msra.mxu1 %v3211_v31  ;;  %v3315_v31 = vld [vmem:[#allocation7 + $0x164] ss:$8 sps:$4 sm:$0xff]  }
 0x14c   :  { %1938 = vmatprep.subr.bf16.mxu1 %v3216_v32  ;;  %v3313_v32 = vld [vmem:[#allocation7 + $0x160] ss:$8 sps:$4 sm:$0xff]  }
 0x14d   :  { %v1675_v34 = vpop.f32.mrb[0].mxu1 }
 0x14e   :  { %v1677_v25 = vpop.f32.mrb[1].mxu1  ;;  %v1676_v2 = vadd.f32 %v1675_v34, %v344_v1  ;;  %v3321_v34 = vld [vmem:[#allocation7 + $0x184] ss:$8 sps:$4 sm:$0xff]  }
 0x14f   :  { %v1679_v35 = vpop.f32.mrb[2].mxu1  ;;  %1939 = vmatpush1.bf16.msra.mxu1 %v3214_v17  ;;  %v3318_v17 = vld [vmem:[#allocation7 + $0x174] ss:$8 sps:$4 sm:$0xff]  }
 0x150   :  { %v1680_v53 = vpop.f32.mrb[3].mxu1  ;;  %1940 = vmatprep.subr.bf16.mxu1 %v3219_v33  ;;  %v3316_v33 = vld [vmem:[#allocation7 + $0x170] ss:$8 sps:$4 sm:$0xff]  }
 0x151   :  { %v3322_v35 = vld [vmem:[#allocation7 + $0x190] ss:$8 sps:$4 sm:$0xff]   ;;  %v3330_v53 = vld [vmem:[#allocation7 + $0x1b4] ss:$8 sps:$4 sm:$0xff]  }
 0x153   :  { %1941 = vmatpush1.bf16.msra.mxu1 %v3217_v36  ;;  %v3327_v36 = vld [vmem:[#allocation7 + $0x1a4] ss:$8 sps:$4 sm:$0xff]  }
 0x154   :  { %1942 = vmatprep.subr.bf16.mxu1 %v3222_v38  ;;  %v3328_v38 = vld [vmem:[#allocation7 + $0x1b0] ss:$8 sps:$4 sm:$0xff]  }
 0x157   :  { %1943 = vmatpush1.bf16.msra.mxu1 %v3220_v40  ;;  %v3331_v40 = vld [vmem:[#allocation7 + $0x1c0] ss:$8 sps:$4 sm:$0xff]  }
 0x158   :  { %1944 = vmatprep.subr.bf16.mxu1 %v3225_v42  ;;  %v3334_v42 = vld [vmem:[#allocation7 + $0x1d0] ss:$8 sps:$4 sm:$0xff]  }
 0x15b   :  { %1945 = vmatpush1.bf16.msra.mxu1 %v3223_v43  ;;  %v3339_v43 = vld [vmem:[#allocation7 + $0x1e4] ss:$8 sps:$4 sm:$0xff]  }
 0x15c   :  { %1946 = vmatprep.subr.bf16.mxu1 %v3228_v44  ;;  %v3337_v44 = vld [vmem:[#allocation7 + $0x1e0] ss:$8 sps:$4 sm:$0xff]  }
 0x15f   :  { %1947 = vmatpush1.bf16.msra.mxu1 %v3226_v46  ;;  %v3340_v46 = vld [vmem:[#allocation7 + $0x1f0] ss:$8 sps:$4 sm:$0xff]  }
 0x160   :  { %1948 = vmatprep.subr.bf16.mxu1 %v3231_v47  ;;  %v351_v47 = vsub.s32 2, %v3535_v61 }
 0x163   :  { %1949 = vmatpush1.bf16.msra.mxu1 %v3229_v48  ;;  %v355_v48 = vsub.s32 3, %v3535_v61  ;;  %v2045_v61 = vld [vmem:[%s3573_s4] sm:$0x3] }
 0x164   :  { %1950 = vmatprep.subr.bf16.mxu1 %v3234_v49  ;;  %v352_v49 = vrot.slane %v3543_v63, %v351_v47 }
 0x167   :  { %1951 = vmatpush1.bf16.msra.mxu1 %v3232_v50  ;;  %v356_v50 = vrot.slane %v3543_v63, %v355_v48 }
 0x168   :  { %1952 = vmatprep.subr.bf16.mxu1 %v3237_v51 }
 0x16b   :  { %1953 = vmatpush1.bf16.msra.mxu1 %v3235_v52 }
 0x16c   :  { %1954 = vmatprep.subr.bf16.mxu1 %v3240_v54 }
 0x16f   :  { %1955 = vmatpush1.bf16.msra.mxu1 %v3238_v55 }
 0x170   :  { %1956 = vmatprep.subr.bf16.mxu1 %v3243_v56 }
 0x173   :  { %1957 = vmatpush1.bf16.msra.mxu1 %v3241_v57 }
 0x174   :  { %1958 = vmatprep.subr.bf16.mxu1 %v3246_v58 }
 0x177   :  { %1959 = vmatpush1.bf16.msra.mxu1 %v3244_v59 }
 0x17a   :  { %1961 = vmatmul.mubr.bf16.vlgmr.msra.gmra.mrb[4].mxu1 %v3527_v24  ;;  %v348_v24 = vrot.slane %v3543_v63, %v3546_v0  ;;  %v2050_v63 = vrot.slane %v2045_v61, %v3538_v62 }
 0x17c   :  { %v1678_v3 = vadd.f32 %v1677_v25, %v348_v24  ;;  %v3319_v25 = vld [vmem:[#allocation7 + $0x180] ss:$8 sps:$4 sm:$0xff]  }
 0x1ce   :  { %v1798_v4 = vpop.f32.mrb[0].mxu0 }
 0x1cf   :  { %v2825_v5 = vadd.f32 %v1798_v4, %v1676_v2  ;;  %v1800_v6 = vpop.f32.mrb[1].mxu0 }
 0x1d0   :  { %v2827_v7 = vadd.f32 %v1800_v6, %v1678_v3  ;;  %v1802_v8 = vpop.f32.mrb[2].mxu0  ;;  %v2054_v3 = vrot.slane %v2045_v61, %v3546_v0 }
 0x1d1   :  { %v1969_v10 = vmul.f32 0.2, %v2825_v5  ;;  %v1803_v11 = vpop.f32.mrb[3].mxu0 }
 0x1d2   :  { %v1970_v13 = vmul.f32 0.2, %v2827_v7 }
 0x1d3   :  { %v1973_v14 = vmax.f32 %v2825_v5, %v1969_v10  ;;  %v2463_v5 = vld [vmem:[%s3574_s5] sm:$0x3] }
 0x1d4   :  { %v1974_v15 = vmax.f32 %v2827_v7, %v1970_v13 }
 0x1d5   :  { %v1977_v19 = vpack.c.bf16 %v1973_v14, %v1973_v14  ;;  %v2468_v14 = vrot.slane %v2463_v5, %v3538_v62 }
 0x1d6   :  { %v1978_v16 = vpack.c.bf16 %v1974_v15, %v1974_v15 }
 0x1d8   :  { %2409 = vmatprep.mubr.bf16.mxu0 %v1978_v16  ;;  %v2472_v16 = vrot.slane %v2463_v5, %v3546_v0 }
 0x1d9   :  { %2410 = vmatmul.mubr.bf16.vlgmr.msra.gmra.mrb[4].mxu0 %v1977_v19 }
 0x1da   :  { %2419 = vmatpush1.bf16.msra.mxu0 %v3295_v18 }
 0x1db   :  { %2420 = vmatprep.subr.bf16.mxu0 %v3300_v20 }
 0x1de   :  { %2421 = vmatpush1.bf16.msra.mxu0 %v3298_v21 }
 0x1df   :  { %2422 = vmatprep.subr.bf16.mxu0 %v3303_v22 }
 0x1e2   :  { %2423 = vmatpush1.bf16.msra.mxu0 %v3301_v23  ;;  %v2822_v23 = vld [vmem:[#allocation2] ss:$0 sm:$0xff] }
 0x1e3   :  { %2424 = vmatprep.subr.bf16.mxu0 %v3306_v26 }
 0x1e6   :  { %2425 = vmatpush1.bf16.msra.mxu0 %v3304_v27 }
 0x1e7   :  { %2426 = vmatprep.subr.bf16.mxu0 %v3309_v28 }
 0x1ea   :  { %2427 = vmatpush1.bf16.msra.mxu0 %v3307_v29 }
 0x1eb   :  { %2428 = vmatprep.subr.bf16.mxu0 %v3312_v30 }
 0x1ee   :  { %2429 = vmatpush1.bf16.msra.mxu0 %v3310_v9 }
 0x1ef   :  { %2430 = vmatprep.subr.bf16.mxu0 %v3315_v31 }
 0x1f2   :  { %2431 = vmatpush1.bf16.msra.mxu0 %v3313_v32 }
 0x1f3   :  { %2432 = vmatprep.subr.bf16.mxu0 %v3318_v17 }
 0x1f6   :  { %2433 = vmatpush1.bf16.msra.mxu0 %v3316_v33 }
 0x1f7   :  { %2434 = vmatprep.subr.bf16.mxu0 %v3321_v34 }
 0x1fa   :  { %2435 = vmatpush1.bf16.msra.mxu0 %v3319_v25 }
 0x1fb   :  { %2436 = vmatprep.subr.bf16.mxu0 %v3324_v12 }
 0x1fe   :  { %2437 = vmatpush1.bf16.msra.mxu0 %v3322_v35 }
 0x1ff   :  { %2438 = vmatprep.subr.bf16.mxu0 %v3327_v36 }
 0x202   :  { %2439 = vmatpush1.bf16.msra.mxu0 %v3325_v37 }
 0x203   :  { %2440 = vmatprep.subr.bf16.mxu0 %v3330_v53 }
 0x206   :  { %2441 = vmatpush1.bf16.msra.mxu0 %v3328_v38 }
 0x207   :  { %2442 = vmatprep.subr.bf16.mxu0 %v3333_v39 }
 0x20a   :  { %2443 = vmatpush1.bf16.msra.mxu0 %v3331_v40 }
 0x20b   :  { %2444 = vmatprep.subr.bf16.mxu0 %v3336_v41 }
 0x20e   :  { %2445 = vmatpush1.bf16.msra.mxu0 %v3334_v42 }
 0x20f   :  { %2446 = vmatprep.subr.bf16.mxu0 %v3339_v43 }
 0x212   :  { %2447 = vmatpush1.bf16.msra.mxu0 %v3337_v44 }
 0x213   :  { %2448 = vmatprep.subr.bf16.mxu0 %v3342_v45 }
 0x216   :  { %2449 = vmatpush1.bf16.msra.mxu0 %v3340_v46 }
 0x24d   :  { %v1962_v51 = vpop.f32.mrb[4].mxu1 }
 0x24e   :  { %v2828_v52 = vadd.f32 %v1962_v51, %v352_v49  ;;  %v1964_v54 = vpop.f32.mrb[5].mxu1 }
 0x24f   :  { %v2829_v55 = vadd.f32 %v1964_v54, %v356_v50  ;;  %v1966_v56 = vpop.f32.mrb[6].mxu1 }
 0x250   :  { %v1971_v57 = vmul.f32 0.2, %v2828_v52  ;;  %v1967_v58 = vpop.f32.mrb[7].mxu1 }
 0x251   :  { %v1972_v59 = vmul.f32 0.2, %v2829_v55 }
 0x252   :  { %v1975_v60 = vmax.f32 %v2828_v52, %v1971_v57 }
 0x253   :  { %v1976_v1 = vmax.f32 %v2829_v55, %v1972_v59 }
 0x254   :  { %v1979_v2 = vpack.c.bf16 %v1975_v60, %v1975_v60 }
 0x255   :  { %v1980_v24 = vpack.c.bf16 %v1976_v1, %v1976_v1 }
 0x257   :  { %2450 = vmatprep.mubr.bf16.mxu0 %v1980_v24 }
 0x258   :  { %2451 = vmatmul.mubr.bf16.vlgmr.msra.gmra.mrb[4].mxu0 %v1979_v2 }
 0x32b   :  { %v2452_v4 = vpop.f32.mrb[4].mxu0 }
 0x32c   :  { %v2830_v6 = vadd.f32 %v2452_v4, %v2050_v63  ;;  %v2454_v7 = vpop.f32.mrb[5].mxu0 }
 0x32d   :  { %v2831_v8 = vadd.f32 %v2454_v7, %v2054_v3  ;;  %v2456_v10 = vpop.f32.mrb[6].mxu0 }
 0x32e   :  { %v2459_v11 = vmul.f32 0.2, %v2830_v6  ;;  %v2457_v13 = vpop.f32.mrb[7].mxu0 }
 0x32f   :  { %v2460_v15 = vmul.f32 0.2, %v2831_v8 }
 0x330   :  { %v2461_v18 = vmax.f32 %v2830_v6, %v2459_v11 }
 0x331   :  { %v2462_v19 = vmax.f32 %v2831_v8, %v2460_v15 }
 0x332   :  { %v2475_v20 = vmul.f32 %v2468_v14, %v2461_v18 }
 0x333   :  { %v2476_v21 = vmul.f32 %v2472_v16, %v2462_v19 }
 0x335   :  { %v2477_v22 = vadd.f32 %v2476_v21, %v2475_v20 }
 0x337   :  { %2478 = vadd.xlane.f32.xlu0 %v2477_v22 }
 0x3c4   :  { %v2479_v26 = vpop.xlane.xlu0 %2478 }
 0x3c5   :  { %v2487_v27 = vadd.f32 %v2822_v23, %v2479_v26 }
 0x3c7   :  { %v2823_v28 = vmul.f32 -1.442695, %v2487_v27 }
 0x3c9   :  { %3343 = vpow2.f32 %v2823_v28 }
 0x3d3   :  { %v3344_v29 = vpop.eup %3343 }
 0x3d4   :  { %v2491_v30 = vadd.f32 1.0, %v3344_v29 }
 0x3d6   :  { %3345 = vrcp.f32 %v2491_v30 }
 0x3e0   :  { %v3346_v9 = vpop.eup %3345 }
 0x3e1   :  { %2495 = vst.msk [vmem:[%s3576_s7] sm:$0xff] %vm2494_vm0, %v3346_v9 }
 0x3e2   :  { %2500 = vsyncpa [#allocation4], 1 }
 0x3e3   :  { %2501 = vsyncpa [#allocation6], 1 }

// kernel: tpu_custom_call.1
= control target key start
LH: loop header
LB: loop body
LE: loop exit
PB: predicated region body
PF: predicated region fallthrough
CT: control target
= control target key end

     0   :  { %s3569_s0 = inlined_call_operand.hbm [shape: f32[8,1024], index: 0, kind: input, shape index: {}]   ;;  %s3570_s1 = inlined_call_operand.hbm [shape: bf16[1024,512], index: 1, kind: input, shape index: {}]   ;;  %s3571_s2 = inlined_call_operand.vmem [shape: f32[1,512], index: 2, kind: input, shape index: {}]   ;;  %s3572_s3 = inlined_call_operand.hbm [shape: bf16[512,256], index: 3, kind: input, shape index: {}]   ;;  %s3573_s4 = inlined_call_operand.vmem [shape: f32[1,256], index: 4, kind: input, shape index: {}]   ;;  %s3574_s5 = inlined_call_operand.vmem [shape: f32[1,256], index: 5, kind: input, shape index: {}]   ;;  %s3575_s6 = inlined_call_operand.<no memory space> [shape: f32[1,1], index: 6, kind: input, shape index: {}]   ;;  %s3576_s7 = inlined_call_operand.vmem [shape: f32[8,1], index: 7, kind: output, shape index: {}]  }
   0x1   :  { %v12_v0 = vstv %s3575_s6 }
   0x2   :  { %13 = vst [vmem:[#allocation2] sm:$0x1] %v12_v0 }
   0x3   :  { %14 = vsyncpa [#allocation4], 0 }
   0x4   :  { %15 = vsyncpa [#allocation6], 0  ;;  %s3417_s26 = smov [#allocation5]   ;;  %s3347_s30 = scalar_lea.hbm %s3570_s1, 32768 }
   0x5   :  { %s31_s27 = sshll.u32 %s3417_s26, 4  ;;  %p3348_p0 = scmp.ne.s32.totalorder %s3570_s1, %s3347_s30  ;;  %s32_s27 = int_to_ptr.vmem [resolvable:$true] %s31_s27 }
   0x6   :  { %p3351_p1 = scmp.lt.u32.totalorder %s3347_s30, %s3570_s1 }
   0x8   :  { %p3353_p2 = pnand %p3351_p1, %p3348_p0 }
   0xa   :  { %3356 = shalt.err (!%p3353_p2)
}
   0xb   :  { %s3357_s6 = scalar_lea.vmem %s32_s27, 32768  ;;  %p3362_p4 = scmp.lt.s32.totalorder %s32_s27, %s32_s27 }
   0xc   :  { %p3358_p3 = scmp.ne.s32.totalorder %s32_s27, %s3357_s6  ;;  %p3363_p5 = scmp.lt.s32.totalorder %s3357_s6, %s3357_s6 }
   0xe   :  { %p3364_p6 = por %p3363_p5, %p3362_p4 }
  0x10   :  { %p3365_p7 = pnand %p3364_p6, %p3358_p3 }
  0x12   :  { %3368 = shalt.err (!%p3365_p7)
}
  0x13   :  { %s3418_s12 = smov 256   ;;  %s3419_s13 = smov 16  }
  0x14   :  { %37 = dma.hbm_to_vmem [thread:$0]  %s3570_s1, 32768, %s32_s27, [#allocation6], %s3418_s12, %s3418_s12, %s3419_s13  }
  0x15   :  { %s3420_s16 = smov [#allocation3]   ;;  %s3421_s18 = smov [#allocation7]  }
  0x16   :  { %s22_s17 = sshll.u32 %s3420_s16, 4  ;;  %s45_s19 = sshll.u32 %s3421_s18, 4  ;;  %s23_s17 = int_to_ptr.vmem [resolvable:$true] %s22_s17  ;;  %s46_s19 = int_to_ptr.vmem [resolvable:$true] %s45_s19 }
  0x17   :  { %s3369_s22 = scalar_lea.hbm %s3569_s0, 1024 }
  0x18   :  { %p3370_p8 = scmp.ne.s32.totalorder %s3569_s0, %s3369_s22  ;;  %p3373_p9 = scmp.lt.u32.totalorder %s3369_s22, %s3569_s0 }
  0x1a   :  { %p3375_p10 = pnand %p3373_p9, %p3370_p8 }
  0x1c   :  { %3378 = shalt.err (!%p3375_p10)
}
  0x1d   :  { %s3379_s1 = scalar_lea.vmem %s23_s17, 1024  ;;  %p3384_p12 = scmp.lt.s32.totalorder %s23_s17, %s23_s17 }
  0x1e   :  { %p3380_p11 = scmp.ne.s32.totalorder %s23_s17, %s3379_s1  ;;  %p3385_p13 = scmp.lt.s32.totalorder %s3379_s1, %s3379_s1 }
  0x20   :  { %p3386_p0 = por %p3385_p13, %p3384_p12 }
  0x22   :  { %p3387_p1 = pnand %p3386_p0, %p3380_p11 }
  0x24   :  { %3390 = shalt.err (!%p3387_p1)
}
  0x25   :  { %25 = dma.hbm_to_vmem [thread:$0]  %s3569_s0, 1024, %s23_s17, [#allocation4]  }
  0x26   :  { %s3391_s8 = scalar_lea.hbm %s3572_s3, 8192 }
  0x27   :  { %p3392_p2 = scmp.ne.s32.totalorder %s3572_s3, %s3391_s8  ;;  %p3395_p3 = scmp.lt.u32.totalorder %s3391_s8, %s3572_s3 }
  0x29   :  { %p3397_p4 = pnand %p3395_p3, %p3392_p2 }
  0x2b   :  { %3400 = shalt.err (!%p3397_p4)
}
  0x2c   :  { %s3401_s12 = scalar_lea.vmem %s46_s19, 8192  ;;  %p3406_p6 = scmp.lt.s32.totalorder %s46_s19, %s46_s19 }
  0x2d   :  { %p3402_p5 = scmp.ne.s32.totalorder %s46_s19, %s3401_s12  ;;  %p3407_p7 = scmp.lt.s32.totalorder %s3401_s12, %s3401_s12 }
  0x2f   :  { %p3408_p8 = por %p3407_p7, %p3406_p6 }
  0x31   :  { %p3409_p9 = pnand %p3408_p8, %p3402_p5 }
  0x33   :  { %3412 = shalt.err (!%p3409_p9)
}
  0x34   :  { %s3422_s0 = smov 128   ;;  %s3423_s13 = smov 8  }
  0x35   :  { %51 = dma.hbm_to_vmem [thread:$0]  %s3572_s3, 8192, %s46_s19, [#allocation6], %s3422_s0, %s3422_s0, %s3423_s13  }
  0x36   :  { %3413 = dma.done.wait [#allocation4], 1024  }
  0x37   :  { %3414 = vsyncadd [#allocation4], 4294966272 }
  0x38   :  { %3415 = dma.done.wait [#allocation6], 40960  }
  0x39   :  { %3416 = vsyncadd [#allocation6], 4294926336  ;;  %v2863_v1 = vld [vmem:[#allocation5 + $0x4] ss:$16 sps:$4 sm:$0xff]   ;;  %v2867_v3 = vld [vmem:[#allocation5] ss:$16 sps:$4 sm:$0xff]  }
  0x3a   :  { %v2865_v2 = vld [vmem:[#allocation5 + $0x204] ss:$16 sps:$4 sm:$0xff]   ;;  %1641 = vmatprep.subr.bf16.mxu1 %v2863_v1  ;;  %v2868_v4 = vld [vmem:[#allocation5 + $0x200] ss:$16 sps:$4 sm:$0xff]   ;;  %v68_v47 = vld [vmem:[#allocation3 + $0x8] sm:$0xff]  ;;  %vm2494_vm0 = vcmask 7168  }
  0x3b   :  { %1682 = vmatprep.subr.bf16.mxu0 %v2865_v2  ;;  %v2869_v5 = vld [vmem:[#allocation5 + $0x24] ss:$16 sps:$4 sm:$0xff]   ;;  %1642 = vmatpush1.bf16.msra.mxu1 %v2867_v3  ;;  %v2873_v7 = vld [vmem:[#allocation5 + $0x20] ss:$16 sps:$4 sm:$0xff]   ;;  %v3503_v49 = vpack.c.bf16 %v68_v47, %v68_v47  ;;  %v70_v50 = vld [vmem:[#allocation3 + $0x18] sm:$0xff] }
  0x3c   :  { %1683 = vmatpush1.bf16.msra.mxu0 %v2868_v4  ;;  %v2871_v6 = vld [vmem:[#allocation5 + $0x224] ss:$16 sps:$4 sm:$0xff]   ;;  %1643 = vmatprep.subr.bf16.mxu1 %v2869_v5  ;;  %v2874_v8 = vld [vmem:[#allocation5 + $0x220] ss:$16 sps:$4 sm:$0xff]   ;;  %v3505_v53 = vpack.c.bf16 %v70_v50, %v70_v50  ;;  %v3016_v50 = vld [vmem:[#allocation5 + $0x128] ss:$16 sps:$4 sm:$0xff]  }
  0x3d   :  { %1684 = vmatprep.subr.bf16.mxu0 %v2871_v6  ;;  %v2875_v9 = vld [vmem:[#allocation5 + $0x44] ss:$16 sps:$4 sm:$0xff]   ;;  %v2879_v11 = vld [vmem:[#allocation5 + $0x40] ss:$16 sps:$4 sm:$0xff]   ;;  %1673 = vmatprep.mubr.bf16.mxu1 %v3503_v49 }
  0x3e   :  { %v2877_v10 = vld [vmem:[#allocation5 + $0x244] ss:$16 sps:$4 sm:$0xff]   ;;  %v2880_v12 = vld [vmem:[#allocation5 + $0x240] ss:$16 sps:$4 sm:$0xff]   ;;  %1714 = vmatprep.mubr.bf16.mxu0 %v3505_v53 }
  0x3f   :  { %1644 = vmatpush1.bf16.msra.mxu1 %v2873_v7  ;;  %v2881_v13 = vld [vmem:[#allocation5 + $0x64] ss:$16 sps:$4 sm:$0xff]   ;;  %v2885_v15 = vld [vmem:[#allocation5 + $0x60] ss:$16 sps:$4 sm:$0xff]  }
  0x40   :  { %1685 = vmatpush1.bf16.msra.mxu0 %v2874_v8  ;;  %1645 = vmatprep.subr.bf16.mxu1 %v2875_v9  ;;  %v2883_v14 = vld [vmem:[#allocation5 + $0x264] ss:$16 sps:$4 sm:$0xff]   ;;  %v2886_v16 = vld [vmem:[#allocation5 + $0x260] ss:$16 sps:$4 sm:$0xff]   ;;  %v2964_v8 = vld [vmem:[#allocation5 + $0xc] ss:$16 sps:$4 sm:$0xff]  }
  0x41   :  { %1686 = vmatprep.subr.bf16.mxu0 %v2877_v10  ;;  %v2887_v17 = vld [vmem:[#allocation5 + $0x84] ss:$16 sps:$4 sm:$0xff]   ;;  %v2891_v19 = vld [vmem:[#allocation5 + $0x80] ss:$16 sps:$4 sm:$0xff]  }
  0x42   :  { %v2889_v18 = vld [vmem:[#allocation5 + $0x284] ss:$16 sps:$4 sm:$0xff]   ;;  %v2892_v20 = vld [vmem:[#allocation5 + $0x280] ss:$16 sps:$4 sm:$0xff]  }
  0x43   :  { %1646 = vmatpush1.bf16.msra.mxu1 %v2879_v11  ;;  %v2893_v21 = vld [vmem:[#allocation5 + $0xa4] ss:$16 sps:$4 sm:$0xff]   ;;  %v2897_v23 = vld [vmem:[#allocation5 + $0xa0] ss:$16 sps:$4 sm:$0xff]   ;;  %v2962_v11 = vld [vmem:[#allocation5 + $0x8] ss:$16 sps:$4 sm:$0xff]  }
  0x44   :  { %1687 = vmatpush1.bf16.msra.mxu0 %v2880_v12  ;;  %1647 = vmatprep.subr.bf16.mxu1 %v2881_v13  ;;  %v2895_v22 = vld [vmem:[#allocation5 + $0x2a4] ss:$16 sps:$4 sm:$0xff]   ;;  %v2898_v24 = vld [vmem:[#allocation5 + $0x2a0] ss:$16 sps:$4 sm:$0xff]  }
  0x45   :  { %1688 = vmatprep.subr.bf16.mxu0 %v2883_v14  ;;  %v2899_v25 = vld [vmem:[#allocation5 + $0xc4] ss:$16 sps:$4 sm:$0xff]   ;;  %v2903_v27 = vld [vmem:[#allocation5 + $0xc0] ss:$16 sps:$4 sm:$0xff]   ;;  %v2970_v14 = vld [vmem:[#allocation5 + $0x2c] ss:$16 sps:$4 sm:$0xff]  }
  0x46   :  { %v2901_v26 = vld [vmem:[#allocation5 + $0x2c4] ss:$16 sps:$4 sm:$0xff]   ;;  %v2904_v28 = vld [vmem:[#allocation5 + $0x2c0] ss:$16 sps:$4 sm:$0xff]  }
  0x47   :  { %1648 = vmatpush1.bf16.msra.mxu1 %v2885_v15  ;;  %v2905_v29 = vld [vmem:[#allocation5 + $0xe4] ss:$16 sps:$4 sm:$0xff]   ;;  %v2909_v31 = vld [vmem:[#allocation5 + $0xe0] ss:$16 sps:$4 sm:$0xff]  }
  0x48   :  { %1689 = vmatpush1.bf16.msra.mxu0 %v2886_v16  ;;  %1649 = vmatprep.subr.bf16.mxu1 %v2887_v17  ;;  %v2907_v30 = vld [vmem:[#allocation5 + $0x2e4] ss:$16 sps:$4 sm:$0xff]   ;;  %v2910_v32 = vld [vmem:[#allocation5 + $0x2e0] ss:$16 sps:$4 sm:$0xff]   ;;  %v2968_v16 = vld [vmem:[#allocation5 + $0x28] ss:$16 sps:$4 sm:$0xff]  }
  0x49   :  { %1690 = vmatprep.subr.bf16.mxu0 %v2889_v18  ;;  %v2911_v33 = vld [vmem:[#allocation5 + $0x104] ss:$16 sps:$4 sm:$0xff]   ;;  %v2915_v35 = vld [vmem:[#allocation5 + $0x100] ss:$16 sps:$4 sm:$0xff]   ;;  %v2976_v18 = vld [vmem:[#allocation5 + $0x4c] ss:$16 sps:$4 sm:$0xff]  }
  0x4a   :  { %v2913_v34 = vld [vmem:[#allocation5 + $0x304] ss:$16 sps:$4 sm:$0xff]   ;;  %v2916_v36 = vld [vmem:[#allocation5 + $0x300] ss:$16 sps:$4 sm:$0xff]  }
  0x4b   :  { %1650 = vmatpush1.bf16.msra.mxu1 %v2891_v19  ;;  %v2917_v37 = vld [vmem:[#allocation5 + $0x124] ss:$16 sps:$4 sm:$0xff]   ;;  %v2921_v39 = vld [vmem:[#allocation5 + $0x120] ss:$16 sps:$4 sm:$0xff]  }
  0x4c   :  { %1691 = vmatpush1.bf16.msra.mxu0 %v2892_v20  ;;  %1651 = vmatprep.subr.bf16.mxu1 %v2893_v21  ;;  %v2919_v38 = vld [vmem:[#allocation5 + $0x324] ss:$16 sps:$4 sm:$0xff]   ;;  %v2922_v40 = vld [vmem:[#allocation5 + $0x320] ss:$16 sps:$4 sm:$0xff]   ;;  %v2974_v20 = vld [vmem:[#allocation5 + $0x48] ss:$16 sps:$4 sm:$0xff]  }
  0x4d   :  { %1692 = vmatprep.subr.bf16.mxu0 %v2895_v22  ;;  %v2923_v41 = vld [vmem:[#allocation5 + $0x144] ss:$16 sps:$4 sm:$0xff]   ;;  %v2927_v43 = vld [vmem:[#allocation5 + $0x140] ss:$16 sps:$4 sm:$0xff]   ;;  %v2982_v22 = vld [vmem:[#allocation5 + $0x6c] ss:$16 sps:$4 sm:$0xff]  }
  0x4e   :  { %v2925_v42 = vld [vmem:[#allocation5 + $0x344] ss:$16 sps:$4 sm:$0xff]   ;;  %v2928_v44 = vld [vmem:[#allocation5 + $0x340] ss:$16 sps:$4 sm:$0xff]  }
  0x4f   :  { %1652 = vmatpush1.bf16.msra.mxu1 %v2897_v23  ;;  %v2929_v45 = vld [vmem:[#allocation5 + $0x164] ss:$16 sps:$4 sm:$0xff]   ;;  %v2933_v48 = vld [vmem:[#allocation5 + $0x160] ss:$16 sps:$4 sm:$0xff]  }
  0x50   :  { %1693 = vmatpush1.bf16.msra.mxu0 %v2898_v24  ;;  %1653 = vmatprep.subr.bf16.mxu1 %v2899_v25  ;;  %v2931_v46 = vld [vmem:[#allocation5 + $0x364] ss:$16 sps:$4 sm:$0xff]   ;;  %v2934_v51 = vld [vmem:[#allocation5 + $0x360] ss:$16 sps:$4 sm:$0xff]   ;;  %v2980_v24 = vld [vmem:[#allocation5 + $0x68] ss:$16 sps:$4 sm:$0xff]  }
  0x51   :  { %1694 = vmatprep.subr.bf16.mxu0 %v2901_v26  ;;  %v2935_v52 = vld [vmem:[#allocation5 + $0x184] ss:$16 sps:$4 sm:$0xff]   ;;  %v2939_v55 = vld [vmem:[#allocation5 + $0x180] ss:$16 sps:$4 sm:$0xff]   ;;  %v2988_v26 = vld [vmem:[#allocation5 + $0x8c] ss:$16 sps:$4 sm:$0xff]  }
  0x52   :  { %v2937_v54 = vld [vmem:[#allocation5 + $0x384] ss:$16 sps:$4 sm:$0xff]   ;;  %v2940_v56 = vld [vmem:[#allocation5 + $0x380] ss:$16 sps:$4 sm:$0xff]  }
  0x53   :  { %1654 = vmatpush1.bf16.msra.mxu1 %v2903_v27  ;;  %v2941_v57 = vld [vmem:[#allocation5 + $0x1a4] ss:$16 sps:$4 sm:$0xff]   ;;  %v2945_v59 = vld [vmem:[#allocation5 + $0x1a0] ss:$16 sps:$4 sm:$0xff]  }
  0x54   :  { %1695 = vmatpush1.bf16.msra.mxu0 %v2904_v28  ;;  %1655 = vmatprep.subr.bf16.mxu1 %v2905_v29  ;;  %v2943_v58 = vld [vmem:[#allocation5 + $0x3a4] ss:$16 sps:$4 sm:$0xff]   ;;  %v2946_v60 = vld [vmem:[#allocation5 + $0x3a0] ss:$16 sps:$4 sm:$0xff]   ;;  %v2986_v28 = vld [vmem:[#allocation5 + $0x88] ss:$16 sps:$4 sm:$0xff]  }
  0x55   :  { %1696 = vmatprep.subr.bf16.mxu0 %v2907_v30  ;;  %v2947_v61 = vld [vmem:[#allocation5 + $0x1c4] ss:$16 sps:$4 sm:$0xff]   ;;  %v2951_v63 = vld [vmem:[#allocation5 + $0x1c0] ss:$16 sps:$4 sm:$0xff]   ;;  %v2994_v30 = vld [vmem:[#allocation5 + $0xac] ss:$16 sps:$4 sm:$0xff]  }
  0x56   :  { %v2949_v62 = vld [vmem:[#allocation5 + $0x3c4] ss:$16 sps:$4 sm:$0xff]   ;;  %v2952_v0 = vld [vmem:[#allocation5 + $0x3c0] ss:$16 sps:$4 sm:$0xff]  }
  0x57   :  { %1656 = vmatpush1.bf16.msra.mxu1 %v2909_v31  ;;  %v2953_v1 = vld [vmem:[#allocation5 + $0x1e4] ss:$16 sps:$4 sm:$0xff]   ;;  %v2957_v3 = vld [vmem:[#allocation5 + $0x1e0] ss:$16 sps:$4 sm:$0xff]  }
  0x58   :  { %1697 = vmatpush1.bf16.msra.mxu0 %v2910_v32  ;;  %1657 = vmatprep.subr.bf16.mxu1 %v2911_v33  ;;  %v2955_v2 = vld [vmem:[#allocation5 + $0x3e4] ss:$16 sps:$4 sm:$0xff]   ;;  %v2958_v4 = vld [vmem:[#allocation5 + $0x3e0] ss:$16 sps:$4 sm:$0xff]   ;;  %v2992_v32 = vld [vmem:[#allocation5 + $0xa8] ss:$16 sps:$4 sm:$0xff]  }
  0x59   :  { %1698 = vmatprep.subr.bf16.mxu0 %v2913_v34  ;;  %v67_v5 = vld [vmem:[#allocation3] sm:$0xff]  ;;  %v69_v7 = vld [vmem:[#allocation3 + $0x10] sm:$0xff]  ;;  %v3000_v34 = vld [vmem:[#allocation5 + $0xcc] ss:$16 sps:$4 sm:$0xff]  }
  0x5a   :  { %v2961_v6 = vld [vmem:[#allocation5 + $0x404] ss:$16 sps:$4 sm:$0xff]   ;;  %v3509_v9 = vpack.c.bf16 %v67_v5, %v67_v5  ;;  %v2959_v10 = vld [vmem:[#allocation5 + $0x400] ss:$16 sps:$4 sm:$0xff]   ;;  %v3511_v12 = vpack.c.bf16 %v69_v7, %v69_v7  ;;  %v3048_v5 = vld [vmem:[#allocation5 + $0x1cc] ss:$16 sps:$4 sm:$0xff]  }
  0x5b   :  { %1658 = vmatpush1.bf16.msra.mxu1 %v2915_v35  ;;  %v2967_v13 = vld [vmem:[#allocation5 + $0x424] ss:$16 sps:$4 sm:$0xff]   ;;  %v2965_v15 = vld [vmem:[#allocation5 + $0x420] ss:$16 sps:$4 sm:$0xff]   ;;  %v72_v35 = vld [vmem:[#allocation3 + $0x28] sm:$0xff] }
  0x5c   :  { %1699 = vmatpush1.bf16.msra.mxu0 %v2916_v36  ;;  %1659 = vmatprep.subr.bf16.mxu1 %v2917_v37  ;;  %v2973_v17 = vld [vmem:[#allocation5 + $0x444] ss:$16 sps:$4 sm:$0xff]   ;;  %v2971_v19 = vld [vmem:[#allocation5 + $0x440] ss:$16 sps:$4 sm:$0xff]   ;;  %v3516_v37 = vpack.c.bf16 %v72_v35, %v72_v35  ;;  %v3046_v7 = vld [vmem:[#allocation5 + $0x1c8] ss:$16 sps:$4 sm:$0xff]  }
  0x5d   :  { %1700 = vmatprep.subr.bf16.mxu0 %v2919_v38  ;;  %v2979_v21 = vld [vmem:[#allocation5 + $0x464] ss:$16 sps:$4 sm:$0xff]   ;;  %v2977_v23 = vld [vmem:[#allocation5 + $0x460] ss:$16 sps:$4 sm:$0xff]   ;;  %v2998_v38 = vld [vmem:[#allocation5 + $0xc8] ss:$16 sps:$4 sm:$0xff]  }
  0x5e   :  { %v2985_v25 = vld [vmem:[#allocation5 + $0x484] ss:$16 sps:$4 sm:$0xff]   ;;  %v2983_v27 = vld [vmem:[#allocation5 + $0x480] ss:$16 sps:$4 sm:$0xff]  }
  0x5f   :  { %1660 = vmatpush1.bf16.msra.mxu1 %v2921_v39  ;;  %v2991_v29 = vld [vmem:[#allocation5 + $0x4a4] ss:$16 sps:$4 sm:$0xff]   ;;  %v2989_v31 = vld [vmem:[#allocation5 + $0x4a0] ss:$16 sps:$4 sm:$0xff]  }
  0x60   :  { %1701 = vmatpush1.bf16.msra.mxu0 %v2922_v40  ;;  %1661 = vmatprep.subr.bf16.mxu1 %v2923_v41  ;;  %v2997_v33 = vld [vmem:[#allocation5 + $0x4c4] ss:$16 sps:$4 sm:$0xff]   ;;  %v2995_v36 = vld [vmem:[#allocation5 + $0x4c0] ss:$16 sps:$4 sm:$0xff]   ;;  %v3006_v40 = vld [vmem:[#allocation5 + $0xec] ss:$16 sps:$4 sm:$0xff]  }
  0x61   :  { %1702 = vmatprep.subr.bf16.mxu0 %v2925_v42  ;;  %v3003_v39 = vld [vmem:[#allocation5 + $0x4e4] ss:$16 sps:$4 sm:$0xff]   ;;  %v3001_v41 = vld [vmem:[#allocation5 + $0x4e0] ss:$16 sps:$4 sm:$0xff]   ;;  %v3004_v42 = vld [vmem:[#allocation5 + $0xe8] ss:$16 sps:$4 sm:$0xff]  }
  0x62   :  { %v3015_v47 = vld [vmem:[#allocation5 + $0x524] ss:$16 sps:$4 sm:$0xff]   ;;  %v3079_v35 = vld [vmem:[#allocation5 + $0x680] ss:$16 sps:$4 sm:$0xff]  }
  0x63   :  { %1662 = vmatpush1.bf16.msra.mxu1 %v2927_v43  ;;  %v3009_v43 = vld [vmem:[#allocation5 + $0x504] ss:$16 sps:$4 sm:$0xff]  }
  0x64   :  { %1703 = vmatpush1.bf16.msra.mxu0 %v2928_v44  ;;  %1663 = vmatprep.subr.bf16.mxu1 %v2929_v45  ;;  %v3012_v44 = vld [vmem:[#allocation5 + $0x10c] ss:$16 sps:$4 sm:$0xff]   ;;  %v3007_v45 = vld [vmem:[#allocation5 + $0x500] ss:$16 sps:$4 sm:$0xff]  }
  0x65   :  { %1704 = vmatprep.subr.bf16.mxu0 %v2931_v46  ;;  %v3010_v46 = vld [vmem:[#allocation5 + $0x108] ss:$16 sps:$4 sm:$0xff]  }
  0x67   :  { %1664 = vmatpush1.bf16.msra.mxu1 %v2933_v48  ;;  %v3018_v48 = vld [vmem:[#allocation5 + $0x12c] ss:$16 sps:$4 sm:$0xff]  }
  0x68   :  { %1705 = vmatpush1.bf16.msra.mxu0 %v2934_v51  ;;  %1665 = vmatprep.subr.bf16.mxu1 %v2935_v52  ;;  %v3021_v51 = vld [vmem:[#allocation5 + $0x544] ss:$16 sps:$4 sm:$0xff]   ;;  %v3024_v52 = vld [vmem:[#allocation5 + $0x14c] ss:$16 sps:$4 sm:$0xff]  }
  0x69   :  { %1706 = vmatprep.subr.bf16.mxu0 %v2937_v54  ;;  %v3019_v54 = vld [vmem:[#allocation5 + $0x540] ss:$16 sps:$4 sm:$0xff]  }
  0x6b   :  { %1666 = vmatpush1.bf16.msra.mxu1 %v2939_v55  ;;  %v3022_v55 = vld [vmem:[#allocation5 + $0x148] ss:$16 sps:$4 sm:$0xff]  }
  0x6c   :  { %1707 = vmatpush1.bf16.msra.mxu0 %v2940_v56  ;;  %1667 = vmatprep.subr.bf16.mxu1 %v2941_v57  ;;  %v3027_v56 = vld [vmem:[#allocation5 + $0x564] ss:$16 sps:$4 sm:$0xff]   ;;  %v3030_v57 = vld [vmem:[#allocation5 + $0x16c] ss:$16 sps:$4 sm:$0xff]  }
  0x6d   :  { %1708 = vmatprep.subr.bf16.mxu0 %v2943_v58  ;;  %v3025_v58 = vld [vmem:[#allocation5 + $0x560] ss:$16 sps:$4 sm:$0xff]  }
  0x6f   :  { %1668 = vmatpush1.bf16.msra.mxu1 %v2945_v59  ;;  %v3028_v59 = vld [vmem:[#allocation5 + $0x168] ss:$16 sps:$4 sm:$0xff]  }
  0x70   :  { %1709 = vmatpush1.bf16.msra.mxu0 %v2946_v60  ;;  %1669 = vmatprep.subr.bf16.mxu1 %v2947_v61  ;;  %v3033_v60 = vld [vmem:[#allocation5 + $0x584] ss:$16 sps:$4 sm:$0xff]   ;;  %v3036_v61 = vld [vmem:[#allocation5 + $0x18c] ss:$16 sps:$4 sm:$0xff]  }
  0x71   :  { %1710 = vmatprep.subr.bf16.mxu0 %v2949_v62  ;;  %v3031_v62 = vld [vmem:[#allocation5 + $0x580] ss:$16 sps:$4 sm:$0xff]  }
  0x73   :  { %1670 = vmatpush1.bf16.msra.mxu1 %v2951_v63  ;;  %v3034_v63 = vld [vmem:[#allocation5 + $0x188] ss:$16 sps:$4 sm:$0xff]  }
  0x74   :  { %1711 = vmatpush1.bf16.msra.mxu0 %v2952_v0  ;;  %1671 = vmatprep.subr.bf16.mxu1 %v2953_v1  ;;  %v3039_v0 = vld [vmem:[#allocation5 + $0x5a4] ss:$16 sps:$4 sm:$0xff]   ;;  %v3042_v1 = vld [vmem:[#allocation5 + $0x1ac] ss:$16 sps:$4 sm:$0xff]  }
  0x75   :  { %1712 = vmatprep.subr.bf16.mxu0 %v2955_v2  ;;  %v3037_v2 = vld [vmem:[#allocation5 + $0x5a0] ss:$16 sps:$4 sm:$0xff]  }
  0x77   :  { %1672 = vmatpush1.bf16.msra.mxu1 %v2957_v3  ;;  %v3040_v3 = vld [vmem:[#allocation5 + $0x1a8] ss:$16 sps:$4 sm:$0xff]  }
  0x78   :  { %1713 = vmatpush1.bf16.msra.mxu0 %v2958_v4  ;;  %1805 = vmatprep.subr.bf16.mxu1 %v2964_v8  ;;  %v3045_v4 = vld [vmem:[#allocation5 + $0x5c4] ss:$16 sps:$4 sm:$0xff]  }
  0x79   :  { %1723 = vmatprep.subr.bf16.mxu0 %v2961_v6  ;;  %v3043_v6 = vld [vmem:[#allocation5 + $0x5c0] ss:$16 sps:$4 sm:$0xff]   ;;  %v3051_v8 = vld [vmem:[#allocation5 + $0x5e4] ss:$16 sps:$4 sm:$0xff]  }
  0x7a   :  { %1674 = vmatmul.mubr.bf16.vlgmr.msra.gmra.mrb[0].mxu1 %v3509_v9 }
  0x7b   :  { %1715 = vmatmul.mubr.bf16.vlgmr.msra.gmra.mrb[0].mxu0 %v3511_v12  ;;  %1806 = vmatpush1.bf16.msra.mxu1 %v2962_v11  ;;  %v3049_v11 = vld [vmem:[#allocation5 + $0x5e0] ss:$16 sps:$4 sm:$0xff]  }
  0x7c   :  { %1724 = vmatpush1.bf16.msra.mxu0 %v2959_v10  ;;  %1807 = vmatprep.subr.bf16.mxu1 %v2970_v14  ;;  %v3054_v10 = vld [vmem:[#allocation5 + $0x1ec] ss:$16 sps:$4 sm:$0xff]   ;;  %v71_v14 = vld [vmem:[#allocation3 + $0x20] sm:$0xff] }
  0x7d   :  { %1725 = vmatprep.subr.bf16.mxu0 %v2967_v13  ;;  %1837 = vmatprep.mubr.bf16.mxu1 %v3503_v49  ;;  %v3013_v49 = vld [vmem:[#allocation5 + $0x520] ss:$16 sps:$4 sm:$0xff]   ;;  %v3052_v13 = vld [vmem:[#allocation5 + $0x1e8] ss:$16 sps:$4 sm:$0xff]  }
  0x7e   :  { %1755 = vmatprep.mubr.bf16.mxu0 %v3516_v37 }
  0x7f   :  { %1808 = vmatpush1.bf16.msra.mxu1 %v2968_v16  ;;  %v3060_v16 = vld [vmem:[#allocation5 + $0x20c] ss:$16 sps:$4 sm:$0xff]  }
  0x80   :  { %1726 = vmatpush1.bf16.msra.mxu0 %v2965_v15  ;;  %1809 = vmatprep.subr.bf16.mxu1 %v2976_v18  ;;  %v3057_v15 = vld [vmem:[#allocation5 + $0x604] ss:$16 sps:$4 sm:$0xff]   ;;  %v3055_v18 = vld [vmem:[#allocation5 + $0x600] ss:$16 sps:$4 sm:$0xff]  }
  0x81   :  { %1727 = vmatprep.subr.bf16.mxu0 %v2973_v17  ;;  %v3519_v17 = vpack.c.bf16 %v71_v14, %v71_v14  ;;  %v3139_v14 = vld [vmem:[#allocation5 + $0x7c0] ss:$16 sps:$4 sm:$0xff]  }
  0x83   :  { %1810 = vmatpush1.bf16.msra.mxu1 %v2974_v20  ;;  %v3063_v20 = vld [vmem:[#allocation5 + $0x624] ss:$16 sps:$4 sm:$0xff]  }
  0x84   :  { %1728 = vmatpush1.bf16.msra.mxu0 %v2971_v19  ;;  %1811 = vmatprep.subr.bf16.mxu1 %v2982_v22  ;;  %v3058_v19 = vld [vmem:[#allocation5 + $0x208] ss:$16 sps:$4 sm:$0xff]  }
  0x85   :  { %1729 = vmatprep.subr.bf16.mxu0 %v2979_v21  ;;  %v3066_v21 = vld [vmem:[#allocation5 + $0x22c] ss:$16 sps:$4 sm:$0xff]  }
  0x86   :  { %v74_v22 = vld [vmem:[#allocation3 + $0x38] sm:$0xff] }
  0x87   :  { %1812 = vmatpush1.bf16.msra.mxu1 %v2980_v24  ;;  %v3064_v24 = vld [vmem:[#allocation5 + $0x228] ss:$16 sps:$4 sm:$0xff]  }
  0x88   :  { %1730 = vmatpush1.bf16.msra.mxu0 %v2977_v23  ;;  %1813 = vmatprep.subr.bf16.mxu1 %v2988_v26  ;;  %v3061_v23 = vld [vmem:[#allocation5 + $0x620] ss:$16 sps:$4 sm:$0xff]   ;;  %v3069_v26 = vld [vmem:[#allocation5 + $0x644] ss:$16 sps:$4 sm:$0xff]  }
  0x89   :  { %1731 = vmatprep.subr.bf16.mxu0 %v2985_v25  ;;  %v3523_v25 = vpack.c.bf16 %v74_v22, %v74_v22  ;;  %v3153_v22 = vld [vmem:[#allocation5 + $0x40c] ss:$16 sps:$4 sm:$0xff]  }
  0x8b   :  { %1814 = vmatpush1.bf16.msra.mxu1 %v2986_v28  ;;  %v3067_v28 = vld [vmem:[#allocation5 + $0x640] ss:$16 sps:$4 sm:$0xff]  }
  0x8c   :  { %1732 = vmatpush1.bf16.msra.mxu0 %v2983_v27  ;;  %1815 = vmatprep.subr.bf16.mxu1 %v2994_v30  ;;  %v3072_v27 = vld [vmem:[#allocation5 + $0x24c] ss:$16 sps:$4 sm:$0xff]   ;;  %v3075_v30 = vld [vmem:[#allocation5 + $0x664] ss:$16 sps:$4 sm:$0xff]  }
  0x8d   :  { %1733 = vmatprep.subr.bf16.mxu0 %v2991_v29  ;;  %v3070_v29 = vld [vmem:[#allocation5 + $0x248] ss:$16 sps:$4 sm:$0xff]  }
  0x8f   :  { %1816 = vmatpush1.bf16.msra.mxu1 %v2992_v32  ;;  %v3076_v32 = vld [vmem:[#allocation5 + $0x268] ss:$16 sps:$4 sm:$0xff]  }
  0x90   :  { %1734 = vmatpush1.bf16.msra.mxu0 %v2989_v31  ;;  %1817 = vmatprep.subr.bf16.mxu1 %v3000_v34  ;;  %v3073_v31 = vld [vmem:[#allocation5 + $0x660] ss:$16 sps:$4 sm:$0xff]   ;;  %v3084_v34 = vld [vmem:[#allocation5 + $0x28c] ss:$16 sps:$4 sm:$0xff]  }
  0x91   :  { %1735 = vmatprep.subr.bf16.mxu0 %v2997_v33  ;;  %v3081_v33 = vld [vmem:[#allocation5 + $0x684] ss:$16 sps:$4 sm:$0xff]  }
  0x93   :  { %1818 = vmatpush1.bf16.msra.mxu1 %v2998_v38  ;;  %v3090_v38 = vld [vmem:[#allocation5 + $0x2ac] ss:$16 sps:$4 sm:$0xff]  }
  0x94   :  { %1736 = vmatpush1.bf16.msra.mxu0 %v2995_v36  ;;  %1819 = vmatprep.subr.bf16.mxu1 %v3006_v40  ;;  %v3082_v36 = vld [vmem:[#allocation5 + $0x288] ss:$16 sps:$4 sm:$0xff]  }
  0x95   :  { %1737 = vmatprep.subr.bf16.mxu0 %v3003_v39  ;;  %v3085_v39 = vld [vmem:[#allocation5 + $0x6a0] ss:$16 sps:$4 sm:$0xff]   ;;  %v3088_v40 = vld [vmem:[#allocation5 + $0x2a8] ss:$16 sps:$4 sm:$0xff]  }
  0x97   :  { %1820 = vmatpush1.bf16.msra.mxu1 %v3004_v42  ;;  %v3096_v42 = vld [vmem:[#allocation5 + $0x2cc] ss:$16 sps:$4 sm:$0xff]  }
  0x98   :  { %1738 = vmatpush1.bf16.msra.mxu0 %v3001_v41  ;;  %1821 = vmatprep.subr.bf16.mxu1 %v3012_v44  ;;  %v3093_v41 = vld [vmem:[#allocation5 + $0x6c4] ss:$16 sps:$4 sm:$0xff]   ;;  %v3094_v44 = vld [vmem:[#allocation5 + $0x2c8] ss:$16 sps:$4 sm:$0xff]  }
  0x99   :  { %1739 = vmatprep.subr.bf16.mxu0 %v3009_v43  ;;  %v3091_v43 = vld [vmem:[#allocation5 + $0x6c0] ss:$16 sps:$4 sm:$0xff]  }
  0x9b   :  { %1822 = vmatpush1.bf16.msra.mxu1 %v3010_v46  ;;  %v3102_v46 = vld [vmem:[#allocation5 + $0x2ec] ss:$16 sps:$4 sm:$0xff]  }
  0x9c   :  { %1740 = vmatpush1.bf16.msra.mxu0 %v3007_v45  ;;  %1823 = vmatprep.subr.bf16.mxu1 %v3018_v48  ;;  %v3099_v45 = vld [vmem:[#allocation5 + $0x6e4] ss:$16 sps:$4 sm:$0xff]   ;;  %v3100_v48 = vld [vmem:[#allocation5 + $0x2e8] ss:$16 sps:$4 sm:$0xff]  }
  0x9d   :  { %1741 = vmatprep.subr.bf16.mxu0 %v3015_v47  ;;  %v3097_v47 = vld [vmem:[#allocation5 + $0x6e0] ss:$16 sps:$4 sm:$0xff]  }
  0x9f   :  { %1824 = vmatpush1.bf16.msra.mxu1 %v3016_v50  ;;  %v3108_v50 = vld [vmem:[#allocation5 + $0x30c] ss:$16 sps:$4 sm:$0xff]  }
  0xa0   :  { %1742 = vmatpush1.bf16.msra.mxu0 %v3013_v49  ;;  %1825 = vmatprep.subr.bf16.mxu1 %v3024_v52  ;;  %v3105_v49 = vld [vmem:[#allocation5 + $0x704] ss:$16 sps:$4 sm:$0xff]   ;;  %v3106_v52 = vld [vmem:[#allocation5 + $0x308] ss:$16 sps:$4 sm:$0xff]  }
  0xa1   :  { %1743 = vmatprep.subr.bf16.mxu0 %v3021_v51  ;;  %v3103_v51 = vld [vmem:[#allocation5 + $0x700] ss:$16 sps:$4 sm:$0xff]  }
  0xa3   :  { %1826 = vmatpush1.bf16.msra.mxu1 %v3022_v55  ;;  %v3114_v55 = vld [vmem:[#allocation5 + $0x32c] ss:$16 sps:$4 sm:$0xff]  }
  0xa4   :  { %1744 = vmatpush1.bf16.msra.mxu0 %v3019_v54  ;;  %1827 = vmatprep.subr.bf16.mxu1 %v3030_v57  ;;  %v3111_v54 = vld [vmem:[#allocation5 + $0x724] ss:$16 sps:$4 sm:$0xff]   ;;  %v3112_v57 = vld [vmem:[#allocation5 + $0x328] ss:$16 sps:$4 sm:$0xff]  }
  0xa5   :  { %1745 = vmatprep.subr.bf16.mxu0 %v3027_v56  ;;  %v3109_v56 = vld [vmem:[#allocation5 + $0x720] ss:$16 sps:$4 sm:$0xff]  }
  0xa7   :  { %1828 = vmatpush1.bf16.msra.mxu1 %v3028_v59  ;;  %v3120_v59 = vld [vmem:[#allocation5 + $0x34c] ss:$16 sps:$4 sm:$0xff]  }
  0xa8   :  { %1746 = vmatpush1.bf16.msra.mxu0 %v3025_v58  ;;  %1829 = vmatprep.subr.bf16.mxu1 %v3036_v61  ;;  %v3117_v58 = vld [vmem:[#allocation5 + $0x744] ss:$16 sps:$4 sm:$0xff]   ;;  %v3118_v61 = vld [vmem:[#allocation5 + $0x348] ss:$16 sps:$4 sm:$0xff]  }
  0xa9   :  { %1747 = vmatprep.subr.bf16.mxu0 %v3033_v60  ;;  %v3115_v60 = vld [vmem:[#allocation5 + $0x740] ss:$16 sps:$4 sm:$0xff]  }
  0xab   :  { %1830 = vmatpush1.bf16.msra.mxu1 %v3034_v63  ;;  %v3126_v63 = vld [vmem:[#allocation5 + $0x36c] ss:$16 sps:$4 sm:$0xff]  }
  0xac   :  { %1748 = vmatpush1.bf16.msra.mxu0 %v3031_v62  ;;  %1831 = vmatprep.subr.bf16.mxu1 %v3042_v1  ;;  %v3123_v62 = vld [vmem:[#allocation5 + $0x764] ss:$16 sps:$4 sm:$0xff]   ;;  %v3124_v1 = vld [vmem:[#allocation5 + $0x368] ss:$16 sps:$4 sm:$0xff]  }
  0xad   :  { %1749 = vmatprep.subr.bf16.mxu0 %v3039_v0  ;;  %v3121_v0 = vld [vmem:[#allocation5 + $0x760] ss:$16 sps:$4 sm:$0xff]  }
  0xaf   :  { %1832 = vmatpush1.bf16.msra.mxu1 %v3040_v3  ;;  %v3132_v3 = vld [vmem:[#allocation5 + $0x38c] ss:$16 sps:$4 sm:$0xff]  }
  0xb0   :  { %1750 = vmatpush1.bf16.msra.mxu0 %v3037_v2  ;;  %1833 = vmatprep.subr.bf16.mxu1 %v3048_v5  ;;  %v3129_v2 = vld [vmem:[#allocation5 + $0x784] ss:$16 sps:$4 sm:$0xff]   ;;  %v3130_v5 = vld [vmem:[#allocation5 + $0x388] ss:$16 sps:$4 sm:$0xff]  }
  0xb1   :  { %1751 = vmatprep.subr.bf16.mxu0 %v3045_v4  ;;  %v3127_v4 = vld [vmem:[#allocation5 + $0x780] ss:$16 sps:$4 sm:$0xff]  }
  0xb3   :  { %1834 = vmatpush1.bf16.msra.mxu1 %v3046_v7  ;;  %v3138_v7 = vld [vmem:[#allocation5 + $0x3ac] ss:$16 sps:$4 sm:$0xff]  }
  0xb4   :  { %1752 = vmatpush1.bf16.msra.mxu0 %v3043_v6  ;;  %1835 = vmatprep.subr.bf16.mxu1 %v3054_v10  ;;  %v3135_v6 = vld [vmem:[#allocation5 + $0x7a4] ss:$16 sps:$4 sm:$0xff]   ;;  %v3136_v10 = vld [vmem:[#allocation5 + $0x3a8] ss:$16 sps:$4 sm:$0xff]  }
  0xb5   :  { %1753 = vmatprep.subr.bf16.mxu0 %v3051_v8  ;;  %v3133_v8 = vld [vmem:[#allocation5 + $0x7a0] ss:$16 sps:$4 sm:$0xff]  }
  0xb7   :  { %1836 = vmatpush1.bf16.msra.mxu1 %v3052_v13  ;;  %v3144_v13 = vld [vmem:[#allocation5 + $0x3cc] ss:$16 sps:$4 sm:$0xff]  }
  0xb8   :  { %1754 = vmatpush1.bf16.msra.mxu0 %v3049_v11  ;;  %1846 = vmatprep.subr.bf16.mxu1 %v3060_v16  ;;  %v3141_v11 = vld [vmem:[#allocation5 + $0x7c4] ss:$16 sps:$4 sm:$0xff]  }
  0xb9   :  { %1764 = vmatprep.subr.bf16.mxu0 %v3057_v15  ;;  %v3142_v15 = vld [vmem:[#allocation5 + $0x3c8] ss:$16 sps:$4 sm:$0xff]   ;;  %v3147_v16 = vld [vmem:[#allocation5 + $0x7e4] ss:$16 sps:$4 sm:$0xff]  }
  0xba   :  { %1838 = vmatmul.mubr.bf16.vlgmr.msra.gmra.mrb[4].mxu1 %v3509_v9  ;;  %v3078_v9 = vld [vmem:[#allocation5 + $0x26c] ss:$16 sps:$4 sm:$0xff]  }
  0xbb   :  { %1756 = vmatmul.mubr.bf16.vlgmr.msra.gmra.mrb[0].mxu0 %v3519_v17  ;;  %1847 = vmatpush1.bf16.msra.mxu1 %v3058_v19  ;;  %v3145_v19 = vld [vmem:[#allocation5 + $0x7e0] ss:$16 sps:$4 sm:$0xff]  }
  0xbc   :  { %1765 = vmatpush1.bf16.msra.mxu0 %v3055_v18  ;;  %1848 = vmatprep.subr.bf16.mxu1 %v3066_v21  ;;  %v3150_v18 = vld [vmem:[#allocation5 + $0x3ec] ss:$16 sps:$4 sm:$0xff]   ;;  %v73_v21 = vld [vmem:[#allocation3 + $0x30] sm:$0xff] }
  0xbd   :  { %1766 = vmatprep.subr.bf16.mxu0 %v3063_v20  ;;  %1796 = vmatprep.mubr.bf16.mxu0 %v3523_v25  ;;  %v3148_v20 = vld [vmem:[#allocation5 + $0x3e8] ss:$16 sps:$4 sm:$0xff]  }
  0xbe   :  { %1878 = vmatprep.mubr.bf16.mxu1 %v3505_v53  ;;  %v3087_v53 = vld [vmem:[#allocation5 + $0x6a4] ss:$16 sps:$4 sm:$0xff]  }
  0xbf   :  { %1849 = vmatpush1.bf16.msra.mxu1 %v3064_v24  ;;  %v3527_v24 = vpack.c.bf16 %v73_v21, %v73_v21  ;;  %v3201_v21 = vld [vmem:[#allocation5 + $0x60c] ss:$16 sps:$4 sm:$0xff]  }
  0xc0   :  { %1767 = vmatpush1.bf16.msra.mxu0 %v3061_v23  ;;  %1850 = vmatprep.subr.bf16.mxu1 %v3072_v27  ;;  %v3151_v23 = vld [vmem:[#allocation5 + $0x408] ss:$16 sps:$4 sm:$0xff]  }
  0xc1   :  { %1768 = vmatprep.subr.bf16.mxu0 %v3069_v26  ;;  %v3156_v26 = vld [vmem:[#allocation5 + $0x42c] ss:$16 sps:$4 sm:$0xff]   ;;  %v3247_v27 = vld [vmem:[#allocation7] ss:$8 sps:$4 sm:$0xff]  }
  0xc3   :  { %1851 = vmatpush1.bf16.msra.mxu1 %v3070_v29  ;;  %v3154_v29 = vld [vmem:[#allocation5 + $0x428] ss:$16 sps:$4 sm:$0xff]  }
  0xc4   :  { %1769 = vmatpush1.bf16.msra.mxu0 %v3067_v28  ;;  %1852 = vmatprep.subr.bf16.mxu1 %v3078_v9  ;;  %v3249_v28 = vld [vmem:[#allocation7 + $0x4] ss:$8 sps:$4 sm:$0xff]  }
  0xc5   :  { %1770 = vmatprep.subr.bf16.mxu0 %v3075_v30  ;;  %v3252_v30 = vld [vmem:[#allocation7 + $0x14] ss:$8 sps:$4 sm:$0xff]  }
  0xc6   :  { %v3159_v9 = vld [vmem:[#allocation5 + $0x44c] ss:$16 sps:$4 sm:$0xff]  }
  0xc7   :  { %1853 = vmatpush1.bf16.msra.mxu1 %v3076_v32  ;;  %v3255_v32 = vld [vmem:[#allocation7 + $0x24] ss:$8 sps:$4 sm:$0xff]  }
  0xc8   :  { %1771 = vmatpush1.bf16.msra.mxu0 %v3073_v31  ;;  %1854 = vmatprep.subr.bf16.mxu1 %v3084_v34  ;;  %v3250_v31 = vld [vmem:[#allocation7 + $0x10] ss:$8 sps:$4 sm:$0xff]   ;;  %v3162_v34 = vld [vmem:[#allocation5 + $0x46c] ss:$16 sps:$4 sm:$0xff]  }
  0xc9   :  { %1772 = vmatprep.subr.bf16.mxu0 %v3081_v33  ;;  %v3157_v33 = vld [vmem:[#allocation5 + $0x448] ss:$16 sps:$4 sm:$0xff]  }
  0xcb   :  { %1855 = vmatpush1.bf16.msra.mxu1 %v3082_v36  ;;  %v3160_v36 = vld [vmem:[#allocation5 + $0x468] ss:$16 sps:$4 sm:$0xff]  }
  0xcc   :  { %1773 = vmatpush1.bf16.msra.mxu0 %v3079_v35  ;;  %1856 = vmatprep.subr.bf16.mxu1 %v3090_v38  ;;  %v3258_v35 = vld [vmem:[#allocation7 + $0x34] ss:$8 sps:$4 sm:$0xff]   ;;  %v3261_v38 = vld [vmem:[#allocation7 + $0x44] ss:$8 sps:$4 sm:$0xff]  }
  0xcd   :  { %1774 = vmatprep.subr.bf16.mxu0 %v3087_v53  ;;  %v3256_v53 = vld [vmem:[#allocation7 + $0x30] ss:$8 sps:$4 sm:$0xff]  }
  0xcf   :  { %1857 = vmatpush1.bf16.msra.mxu1 %v3088_v40  ;;  %v3168_v40 = vld [vmem:[#allocation5 + $0x4ac] ss:$16 sps:$4 sm:$0xff]  }
  0xd0   :  { %1775 = vmatpush1.bf16.msra.mxu0 %v3085_v39  ;;  %1858 = vmatprep.subr.bf16.mxu1 %v3096_v42  ;;  %v3163_v39 = vld [vmem:[#allocation5 + $0x488] ss:$16 sps:$4 sm:$0xff]   ;;  %v3264_v42 = vld [vmem:[#allocation7 + $0x54] ss:$8 sps:$4 sm:$0xff]  }
  0xd1   :  { %1776 = vmatprep.subr.bf16.mxu0 %v3093_v41  ;;  %v3259_v41 = vld [vmem:[#allocation7 + $0x40] ss:$8 sps:$4 sm:$0xff]  }
  0xd3   :  { %1859 = vmatpush1.bf16.msra.mxu1 %v3094_v44  ;;  %v3171_v44 = vld [vmem:[#allocation5 + $0x4cc] ss:$16 sps:$4 sm:$0xff]  }
  0xd4   :  { %1777 = vmatpush1.bf16.msra.mxu0 %v3091_v43  ;;  %1860 = vmatprep.subr.bf16.mxu1 %v3102_v46  ;;  %v3166_v43 = vld [vmem:[#allocation5 + $0x4a8] ss:$16 sps:$4 sm:$0xff]   ;;  %v3267_v46 = vld [vmem:[#allocation7 + $0x64] ss:$8 sps:$4 sm:$0xff]  }
  0xd5   :  { %1778 = vmatprep.subr.bf16.mxu0 %v3099_v45  ;;  %v3262_v45 = vld [vmem:[#allocation7 + $0x50] ss:$8 sps:$4 sm:$0xff]  }
  0xd7   :  { %1861 = vmatpush1.bf16.msra.mxu1 %v3100_v48  ;;  %v3174_v48 = vld [vmem:[#allocation5 + $0x4ec] ss:$16 sps:$4 sm:$0xff]  }
  0xd8   :  { %1779 = vmatpush1.bf16.msra.mxu0 %v3097_v47  ;;  %1862 = vmatprep.subr.bf16.mxu1 %v3108_v50  ;;  %v3169_v47 = vld [vmem:[#allocation5 + $0x4c8] ss:$16 sps:$4 sm:$0xff]   ;;  %v3270_v50 = vld [vmem:[#allocation7 + $0x74] ss:$8 sps:$4 sm:$0xff]  }
  0xd9   :  { %1780 = vmatprep.subr.bf16.mxu0 %v3105_v49  ;;  %v3265_v49 = vld [vmem:[#allocation7 + $0x60] ss:$8 sps:$4 sm:$0xff]  }
  0xdb   :  { %1863 = vmatpush1.bf16.msra.mxu1 %v3106_v52  ;;  %v3177_v52 = vld [vmem:[#allocation5 + $0x50c] ss:$16 sps:$4 sm:$0xff]  }
  0xdc   :  { %1781 = vmatpush1.bf16.msra.mxu0 %v3103_v51  ;;  %1864 = vmatprep.subr.bf16.mxu1 %v3114_v55  ;;  %v3172_v51 = vld [vmem:[#allocation5 + $0x4e8] ss:$16 sps:$4 sm:$0xff]   ;;  %v3273_v55 = vld [vmem:[#allocation7 + $0x84] ss:$8 sps:$4 sm:$0xff]  }
  0xdd   :  { %1782 = vmatprep.subr.bf16.mxu0 %v3111_v54  ;;  %v3268_v54 = vld [vmem:[#allocation7 + $0x70] ss:$8 sps:$4 sm:$0xff]  }
  0xdf   :  { %1865 = vmatpush1.bf16.msra.mxu1 %v3112_v57  ;;  %v3180_v57 = vld [vmem:[#allocation5 + $0x52c] ss:$16 sps:$4 sm:$0xff]  }
  0xe0   :  { %1783 = vmatpush1.bf16.msra.mxu0 %v3109_v56  ;;  %1866 = vmatprep.subr.bf16.mxu1 %v3120_v59  ;;  %v3175_v56 = vld [vmem:[#allocation5 + $0x508] ss:$16 sps:$4 sm:$0xff]   ;;  %v3276_v59 = vld [vmem:[#allocation7 + $0x94] ss:$8 sps:$4 sm:$0xff]  }
  0xe1   :  { %1784 = vmatprep.subr.bf16.mxu0 %v3117_v58  ;;  %v3271_v58 = vld [vmem:[#allocation7 + $0x80] ss:$8 sps:$4 sm:$0xff]  }
  0xe3   :  { %1867 = vmatpush1.bf16.msra.mxu1 %v3118_v61  ;;  %v3183_v61 = vld [vmem:[#allocation5 + $0x54c] ss:$16 sps:$4 sm:$0xff]  }
  0xe4   :  { %1785 = vmatpush1.bf16.msra.mxu0 %v3115_v60  ;;  %1868 = vmatprep.subr.bf16.mxu1 %v3126_v63  ;;  %v3178_v60 = vld [vmem:[#allocation5 + $0x528] ss:$16 sps:$4 sm:$0xff]   ;;  %v3279_v63 = vld [vmem:[#allocation7 + $0xa4] ss:$8 sps:$4 sm:$0xff]  }
  0xe5   :  { %1786 = vmatprep.subr.bf16.mxu0 %v3123_v62  ;;  %v3274_v62 = vld [vmem:[#allocation7 + $0x90] ss:$8 sps:$4 sm:$0xff]  }
  0xe7   :  { %1869 = vmatpush1.bf16.msra.mxu1 %v3124_v1  ;;  %v3186_v1 = vld [vmem:[#allocation5 + $0x56c] ss:$16 sps:$4 sm:$0xff]  }
  0xe8   :  { %1787 = vmatpush1.bf16.msra.mxu0 %v3121_v0  ;;  %1870 = vmatprep.subr.bf16.mxu1 %v3132_v3  ;;  %v3181_v0 = vld [vmem:[#allocation5 + $0x548] ss:$16 sps:$4 sm:$0xff]   ;;  %v3282_v3 = vld [vmem:[#allocation7 + $0xb4] ss:$8 sps:$4 sm:$0xff]  }
  0xe9   :  { %1788 = vmatprep.subr.bf16.mxu0 %v3129_v2  ;;  %v3277_v2 = vld [vmem:[#allocation7 + $0xa0] ss:$8 sps:$4 sm:$0xff]  }
  0xeb   :  { %1871 = vmatpush1.bf16.msra.mxu1 %v3130_v5  ;;  %v3189_v5 = vld [vmem:[#allocation5 + $0x58c] ss:$16 sps:$4 sm:$0xff]  }
  0xec   :  { %1789 = vmatpush1.bf16.msra.mxu0 %v3127_v4  ;;  %1872 = vmatprep.subr.bf16.mxu1 %v3138_v7  ;;  %v3184_v4 = vld [vmem:[#allocation5 + $0x568] ss:$16 sps:$4 sm:$0xff]   ;;  %v3285_v7 = vld [vmem:[#allocation7 + $0xc4] ss:$8 sps:$4 sm:$0xff]  }
  0xed   :  { %1790 = vmatprep.subr.bf16.mxu0 %v3135_v6  ;;  %v3280_v6 = vld [vmem:[#allocation7 + $0xb0] ss:$8 sps:$4 sm:$0xff]  }
  0xef   :  { %1873 = vmatpush1.bf16.msra.mxu1 %v3136_v10  ;;  %v3192_v10 = vld [vmem:[#allocation5 + $0x5ac] ss:$16 sps:$4 sm:$0xff]  }
  0xf0   :  { %1791 = vmatpush1.bf16.msra.mxu0 %v3133_v8  ;;  %1874 = vmatprep.subr.bf16.mxu1 %v3144_v13  ;;  %v3187_v8 = vld [vmem:[#allocation5 + $0x588] ss:$16 sps:$4 sm:$0xff]   ;;  %v3288_v13 = vld [vmem:[#allocation7 + $0xd4] ss:$8 sps:$4 sm:$0xff]  }
  0xf1   :  { %1792 = vmatprep.subr.bf16.mxu0 %v3141_v11  ;;  %v3283_v11 = vld [vmem:[#allocation7 + $0xc0] ss:$8 sps:$4 sm:$0xff]  }
  0xf3   :  { %1875 = vmatpush1.bf16.msra.mxu1 %v3142_v15  ;;  %v3195_v15 = vld [vmem:[#allocation5 + $0x5cc] ss:$16 sps:$4 sm:$0xff]  }
  0xf4   :  { %1793 = vmatpush1.bf16.msra.mxu0 %v3139_v14  ;;  %1876 = vmatprep.subr.bf16.mxu1 %v3150_v18  ;;  %v3190_v14 = vld [vmem:[#allocation5 + $0x5a8] ss:$16 sps:$4 sm:$0xff]  }
  0xf5   :  { %1794 = vmatprep.subr.bf16.mxu0 %v3147_v16  ;;  %v3286_v16 = vld [vmem:[#allocation7 + $0xd0] ss:$8 sps:$4 sm:$0xff]  }
  0xf6   :  { %v3193_v18 = vld [vmem:[#allocation5 + $0x5c8] ss:$16 sps:$4 sm:$0xff]  }
  0xf7   :  { %1877 = vmatpush1.bf16.msra.mxu1 %v3148_v20  ;;  %v3196_v20 = vld [vmem:[#allocation5 + $0x5e8] ss:$16 sps:$4 sm:$0xff]  }
  0xf8   :  { %1795 = vmatpush1.bf16.msra.mxu0 %v3145_v19  ;;  %1887 = vmatprep.subr.bf16.mxu1 %v3153_v22  ;;  %v3198_v19 = vld [vmem:[#allocation5 + $0x5ec] ss:$16 sps:$4 sm:$0xff]   ;;  %v3199_v22 = vld [vmem:[#allocation5 + $0x608] ss:$16 sps:$4 sm:$0xff]  }
  0xf9   :  { %2377 = vmatprep.subr.bf16.mxu0 %v3249_v28  ;;  %v3205_v28 = vld [vmem:[#allocation5 + $0x648] ss:$16 sps:$4 sm:$0xff]  }
  0xfa   :  { %1879 = vmatmul.mubr.bf16.vlgmr.msra.gmra.mrb[4].mxu1 %v3511_v12  ;;  %v3253_v12 = vld [vmem:[#allocation7 + $0x20] ss:$8 sps:$4 sm:$0xff]  }
  0xfb   :  { %1797 = vmatmul.mubr.bf16.vlgmr.msra.gmra.mrb[0].mxu0 %v3527_v24  ;;  %1888 = vmatpush1.bf16.msra.mxu1 %v3151_v23  ;;  %v3204_v23 = vld [vmem:[#allocation5 + $0x62c] ss:$16 sps:$4 sm:$0xff]  }
  0xfc   :  { %1919 = vmatprep.mubr.bf16.mxu1 %v3516_v37  ;;  %1889 = vmatprep.subr.bf16.mxu1 %v3156_v26  ;;  %v3165_v37 = vld [vmem:[#allocation5 + $0x48c] ss:$16 sps:$4 sm:$0xff]   ;;  %v3202_v26 = vld [vmem:[#allocation5 + $0x628] ss:$16 sps:$4 sm:$0xff]  }
  0xfd   :  { %2378 = vmatpush1.bf16.msra.mxu0 %v3247_v27  ;;  %v3207_v27 = vld [vmem:[#allocation5 + $0x64c] ss:$16 sps:$4 sm:$0xff]  }
  0xfe   :  { %2379 = vmatprep.subr.bf16.mxu0 %v3252_v30  ;;  %v3208_v30 = vld [vmem:[#allocation5 + $0x668] ss:$16 sps:$4 sm:$0xff]  }
  0xff   :  { %1890 = vmatpush1.bf16.msra.mxu1 %v3154_v29  ;;  %v3210_v29 = vld [vmem:[#allocation5 + $0x66c] ss:$16 sps:$4 sm:$0xff]  }
 0x100   :  { %1891 = vmatprep.subr.bf16.mxu1 %v3159_v9  ;;  %v3213_v9 = vld [vmem:[#allocation5 + $0x68c] ss:$16 sps:$4 sm:$0xff]  }
 0x101   :  { %2380 = vmatpush1.bf16.msra.mxu0 %v3250_v31  ;;  %v3211_v31 = vld [vmem:[#allocation5 + $0x688] ss:$16 sps:$4 sm:$0xff]  }
 0x102   :  { %2381 = vmatprep.subr.bf16.mxu0 %v3255_v32  ;;  %v3216_v32 = vld [vmem:[#allocation5 + $0x6ac] ss:$16 sps:$4 sm:$0xff]  }
 0x103   :  { %1892 = vmatpush1.bf16.msra.mxu1 %v3157_v33  ;;  %v3219_v33 = vld [vmem:[#allocation5 + $0x6cc] ss:$16 sps:$4 sm:$0xff]  }
 0x104   :  { %1893 = vmatprep.subr.bf16.mxu1 %v3162_v34 }
 0x105   :  { %2382 = vmatpush1.bf16.msra.mxu0 %v3253_v12  ;;  %v3291_v12 = vld [vmem:[#allocation7 + $0xe4] ss:$8 sps:$4 sm:$0xff]  }
 0x106   :  { %2383 = vmatprep.subr.bf16.mxu0 %v3258_v35 }
 0x107   :  { %1894 = vmatpush1.bf16.msra.mxu1 %v3160_v36  ;;  %v3217_v36 = vld [vmem:[#allocation5 + $0x6c8] ss:$16 sps:$4 sm:$0xff]  }
 0x108   :  { %1895 = vmatprep.subr.bf16.mxu1 %v3165_v37  ;;  %v3289_v37 = vld [vmem:[#allocation7 + $0xe0] ss:$8 sps:$4 sm:$0xff]  }
 0x109   :  { %2384 = vmatpush1.bf16.msra.mxu0 %v3256_v53 }
 0x10a   :  { %2385 = vmatprep.subr.bf16.mxu0 %v3261_v38  ;;  %v3222_v38 = vld [vmem:[#allocation5 + $0x6ec] ss:$16 sps:$4 sm:$0xff]  }
 0x10b   :  { %1896 = vmatpush1.bf16.msra.mxu1 %v3163_v39  ;;  %v3294_v39 = vld [vmem:[#allocation7 + $0xf4] ss:$8 sps:$4 sm:$0xff]  }
 0x10c   :  { %1897 = vmatprep.subr.bf16.mxu1 %v3168_v40  ;;  %v3220_v40 = vld [vmem:[#allocation5 + $0x6e8] ss:$16 sps:$4 sm:$0xff]  }
 0x10d   :  { %2386 = vmatpush1.bf16.msra.mxu0 %v3259_v41  ;;  %v3292_v41 = vld [vmem:[#allocation7 + $0xf0] ss:$8 sps:$4 sm:$0xff]  }
 0x10e   :  { %2387 = vmatprep.subr.bf16.mxu0 %v3264_v42  ;;  %v3225_v42 = vld [vmem:[#allocation5 + $0x70c] ss:$16 sps:$4 sm:$0xff]  }
 0x10f   :  { %1898 = vmatpush1.bf16.msra.mxu1 %v3166_v43  ;;  %v3223_v43 = vld [vmem:[#allocation5 + $0x708] ss:$16 sps:$4 sm:$0xff]  }
 0x110   :  { %1899 = vmatprep.subr.bf16.mxu1 %v3171_v44  ;;  %v3228_v44 = vld [vmem:[#allocation5 + $0x72c] ss:$16 sps:$4 sm:$0xff]  }
 0x111   :  { %2388 = vmatpush1.bf16.msra.mxu0 %v3262_v45  ;;  %v3297_v45 = vld [vmem:[#allocation7 + $0x104] ss:$8 sps:$4 sm:$0xff]  }
 0x112   :  { %2389 = vmatprep.subr.bf16.mxu0 %v3267_v46  ;;  %v3226_v46 = vld [vmem:[#allocation5 + $0x728] ss:$16 sps:$4 sm:$0xff]  }
 0x113   :  { %1900 = vmatpush1.bf16.msra.mxu1 %v3169_v47  ;;  %v3231_v47 = vld [vmem:[#allocation5 + $0x74c] ss:$16 sps:$4 sm:$0xff]  }
 0x114   :  { %1901 = vmatprep.subr.bf16.mxu1 %v3174_v48  ;;  %v3229_v48 = vld [vmem:[#allocation5 + $0x748] ss:$16 sps:$4 sm:$0xff]  }
 0x115   :  { %2390 = vmatpush1.bf16.msra.mxu0 %v3265_v49  ;;  %v3234_v49 = vld [vmem:[#allocation5 + $0x76c] ss:$16 sps:$4 sm:$0xff]  }
 0x116   :  { %2391 = vmatprep.subr.bf16.mxu0 %v3270_v50  ;;  %v3232_v50 = vld [vmem:[#allocation5 + $0x768] ss:$16 sps:$4 sm:$0xff]  }
 0x117   :  { %1902 = vmatpush1.bf16.msra.mxu1 %v3172_v51  ;;  %v3237_v51 = vld [vmem:[#allocation5 + $0x78c] ss:$16 sps:$4 sm:$0xff]  }
 0x118   :  { %1903 = vmatprep.subr.bf16.mxu1 %v3177_v52  ;;  %v3235_v52 = vld [vmem:[#allocation5 + $0x788] ss:$16 sps:$4 sm:$0xff]  }
 0x119   :  { %2392 = vmatpush1.bf16.msra.mxu0 %v3268_v54  ;;  %v3240_v54 = vld [vmem:[#allocation5 + $0x7ac] ss:$16 sps:$4 sm:$0xff]  }
 0x11a   :  { %2393 = vmatprep.subr.bf16.mxu0 %v3273_v55  ;;  %v3238_v55 = vld [vmem:[#allocation5 + $0x7a8] ss:$16 sps:$4 sm:$0xff]  }
 0x11b   :  { %1904 = vmatpush1.bf16.msra.mxu1 %v3175_v56  ;;  %v3243_v56 = vld [vmem:[#allocation5 + $0x7cc] ss:$16 sps:$4 sm:$0xff]  }
 0x11c   :  { %1905 = vmatprep.subr.bf16.mxu1 %v3180_v57  ;;  %v3241_v57 = vld [vmem:[#allocation5 + $0x7c8] ss:$16 sps:$4 sm:$0xff]  }
 0x11d   :  { %2394 = vmatpush1.bf16.msra.mxu0 %v3271_v58  ;;  %v3246_v58 = vld [vmem:[#allocation5 + $0x7ec] ss:$16 sps:$4 sm:$0xff]  }
 0x11e   :  { %2395 = vmatprep.subr.bf16.mxu0 %v3276_v59  ;;  %v3244_v59 = vld [vmem:[#allocation5 + $0x7e8] ss:$16 sps:$4 sm:$0xff]  }
 0x11f   :  { %1906 = vmatpush1.bf16.msra.mxu1 %v3178_v60  ;;  %v341_v60 = vlaneseq }
 0x120   :  { %1907 = vmatprep.subr.bf16.mxu1 %v3183_v61 }
 0x121   :  { %2396 = vmatpush1.bf16.msra.mxu0 %v3274_v62  ;;  %v3535_v61 = vshrl.u32 %v341_v60, 7 }
 0x122   :  { %2397 = vmatprep.subr.bf16.mxu0 %v3279_v63  ;;  %v3543_v63 = vld [vmem:[%s3571_s2] sm:$0xf] }
 0x123   :  { %1908 = vmatpush1.bf16.msra.mxu1 %v3181_v0  ;;  %v3538_v62 = vsub.s32 0, %v3535_v61  ;;  %v3546_v0 = vsub.s32 1, %v3535_v61 }
 0x124   :  { %1909 = vmatprep.subr.bf16.mxu1 %v3186_v1 }
 0x125   :  { %2398 = vmatpush1.bf16.msra.mxu0 %v3277_v2  ;;  %v344_v1 = vrot.slane %v3543_v63, %v3538_v62 }
 0x126   :  { %2399 = vmatprep.subr.bf16.mxu0 %v3282_v3 }
 0x127   :  { %1910 = vmatpush1.bf16.msra.mxu1 %v3184_v4 }
 0x128   :  { %1911 = vmatprep.subr.bf16.mxu1 %v3189_v5 }
 0x129   :  { %2400 = vmatpush1.bf16.msra.mxu0 %v3280_v6 }
 0x12a   :  { %2401 = vmatprep.subr.bf16.mxu0 %v3285_v7 }
 0x12b   :  { %1912 = vmatpush1.bf16.msra.mxu1 %v3187_v8 }
 0x12c   :  { %1913 = vmatprep.subr.bf16.mxu1 %v3192_v10 }
 0x12d   :  { %2402 = vmatpush1.bf16.msra.mxu0 %v3283_v11 }
 0x12e   :  { %2403 = vmatprep.subr.bf16.mxu0 %v3288_v13 }
 0x12f   :  { %1914 = vmatpush1.bf16.msra.mxu1 %v3190_v14 }
 0x130   :  { %1915 = vmatprep.subr.bf16.mxu1 %v3195_v15 }
 0x131   :  { %2404 = vmatpush1.bf16.msra.mxu0 %v3286_v16 }
 0x132   :  { %2405 = vmatprep.subr.bf16.mxu0 %v3291_v12  ;;  %v3324_v12 = vld [vmem:[#allocation7 + $0x194] ss:$8 sps:$4 sm:$0xff]  }
 0x133   :  { %1916 = vmatpush1.bf16.msra.mxu1 %v3193_v18  ;;  %v3295_v18 = vld [vmem:[#allocation7 + $0x100] ss:$8 sps:$4 sm:$0xff]  }
 0x134   :  { %1917 = vmatprep.subr.bf16.mxu1 %v3198_v19 }
 0x135   :  { %2406 = vmatpush1.bf16.msra.mxu0 %v3289_v37  ;;  %v3325_v37 = vld [vmem:[#allocation7 + $0x1a0] ss:$8 sps:$4 sm:$0xff]  }
 0x136   :  { %2407 = vmatprep.subr.bf16.mxu0 %v3294_v39  ;;  %v3333_v39 = vld [vmem:[#allocation7 + $0x1c4] ss:$8 sps:$4 sm:$0xff]  }
 0x137   :  { %1918 = vmatpush1.bf16.msra.mxu1 %v3196_v20  ;;  %v3300_v20 = vld [vmem:[#allocation7 + $0x114] ss:$8 sps:$4 sm:$0xff]  }
 0x138   :  { %1928 = vmatprep.subr.bf16.mxu1 %v3201_v21  ;;  %v3298_v21 = vld [vmem:[#allocation7 + $0x110] ss:$8 sps:$4 sm:$0xff]  }
 0x139   :  { %2408 = vmatpush1.bf16.msra.mxu0 %v3292_v41  ;;  %v3336_v41 = vld [vmem:[#allocation7 + $0x1d4] ss:$8 sps:$4 sm:$0xff]  }
 0x13a   :  { %1920 = vmatmul.mubr.bf16.vlgmr.msra.gmra.mrb[4].mxu1 %v3519_v17  ;;  %v3214_v17 = vld [vmem:[#allocation5 + $0x6a8] ss:$16 sps:$4 sm:$0xff]   ;;  %2418 = vmatprep.subr.bf16.mxu0 %v3297_v45  ;;  %v3342_v45 = vld [vmem:[#allocation7 + $0x1f4] ss:$8 sps:$4 sm:$0xff]  }
 0x13b   :  { %1929 = vmatpush1.bf16.msra.mxu1 %v3199_v22  ;;  %1960 = vmatprep.mubr.bf16.mxu1 %v3523_v25  ;;  %v3303_v22 = vld [vmem:[#allocation7 + $0x124] ss:$8 sps:$4 sm:$0xff]  }
 0x13c   :  { %1930 = vmatprep.subr.bf16.mxu1 %v3204_v23  ;;  %v3301_v23 = vld [vmem:[#allocation7 + $0x120] ss:$8 sps:$4 sm:$0xff]  }
 0x13f   :  { %1931 = vmatpush1.bf16.msra.mxu1 %v3202_v26  ;;  %v3306_v26 = vld [vmem:[#allocation7 + $0x134] ss:$8 sps:$4 sm:$0xff]  }
 0x140   :  { %1932 = vmatprep.subr.bf16.mxu1 %v3207_v27  ;;  %v3304_v27 = vld [vmem:[#allocation7 + $0x130] ss:$8 sps:$4 sm:$0xff]  }
 0x143   :  { %1933 = vmatpush1.bf16.msra.mxu1 %v3205_v28  ;;  %v3309_v28 = vld [vmem:[#allocation7 + $0x144] ss:$8 sps:$4 sm:$0xff]  }
 0x144   :  { %1934 = vmatprep.subr.bf16.mxu1 %v3210_v29  ;;  %v3307_v29 = vld [vmem:[#allocation7 + $0x140] ss:$8 sps:$4 sm:$0xff]  }
 0x147   :  { %1935 = vmatpush1.bf16.msra.mxu1 %v3208_v30  ;;  %v3312_v30 = vld [vmem:[#allocation7 + $0x154] ss:$8 sps:$4 sm:$0xff]  }
 0x148   :  { %1936 = vmatprep.subr.bf16.mxu1 %v3213_v9  ;;  %v3310_v9 = vld [vmem:[#allocation7 + $0x150] ss:$8 sps:$4 sm:$0xff]  }
 0x14b   :  { %1937 = vmatpush1.bf16.msra.mxu1 %v3211_v31  ;;  %v3315_v31 = vld [vmem:[#allocation7 + $0x164] ss:$8 sps:$4 sm:$0xff]  }
 0x14c   :  { %1938 = vmatprep.subr.bf16.mxu1 %v3216_v32  ;;  %v3313_v32 = vld [vmem:[#allocation7 + $0x160] ss:$8 sps:$4 sm:$0xff]  }
 0x14d   :  { %v1675_v34 = vpop.f32.mrb[0].mxu1 }
 0x14e   :  { %v1677_v25 = vpop.f32.mrb[1].mxu1  ;;  %v1676_v2 = vadd.f32 %v1675_v34, %v344_v1  ;;  %v3321_v34 = vld [vmem:[#allocation7 + $0x184] ss:$8 sps:$4 sm:$0xff]  }
 0x14f   :  { %v1679_v35 = vpop.f32.mrb[2].mxu1  ;;  %1939 = vmatpush1.bf16.msra.mxu1 %v3214_v17  ;;  %v3318_v17 = vld [vmem:[#allocation7 + $0x174] ss:$8 sps:$4 sm:$0xff]  }
 0x150   :  { %v1680_v53 = vpop.f32.mrb[3].mxu1  ;;  %1940 = vmatprep.subr.bf16.mxu1 %v3219_v33  ;;  %v3316_v33 = vld [vmem:[#allocation7 + $0x170] ss:$8 sps:$4 sm:$0xff]  }
 0x151   :  { %v3322_v35 = vld [vmem:[#allocation7 + $0x190] ss:$8 sps:$4 sm:$0xff]   ;;  %v3330_v53 = vld [vmem:[#allocation7 + $0x1b4] ss:$8 sps:$4 sm:$0xff]  }
 0x153   :  { %1941 = vmatpush1.bf16.msra.mxu1 %v3217_v36  ;;  %v3327_v36 = vld [vmem:[#allocation7 + $0x1a4] ss:$8 sps:$4 sm:$0xff]  }
 0x154   :  { %1942 = vmatprep.subr.bf16.mxu1 %v3222_v38  ;;  %v3328_v38 = vld [vmem:[#allocation7 + $0x1b0] ss:$8 sps:$4 sm:$0xff]  }
 0x157   :  { %1943 = vmatpush1.bf16.msra.mxu1 %v3220_v40  ;;  %v3331_v40 = vld [vmem:[#allocation7 + $0x1c0] ss:$8 sps:$4 sm:$0xff]  }
 0x158   :  { %1944 = vmatprep.subr.bf16.mxu1 %v3225_v42  ;;  %v3334_v42 = vld [vmem:[#allocation7 + $0x1d0] ss:$8 sps:$4 sm:$0xff]  }
 0x15b   :  { %1945 = vmatpush1.bf16.msra.mxu1 %v3223_v43  ;;  %v3339_v43 = vld [vmem:[#allocation7 + $0x1e4] ss:$8 sps:$4 sm:$0xff]  }
 0x15c   :  { %1946 = vmatprep.subr.bf16.mxu1 %v3228_v44  ;;  %v3337_v44 = vld [vmem:[#allocation7 + $0x1e0] ss:$8 sps:$4 sm:$0xff]  }
 0x15f   :  { %1947 = vmatpush1.bf16.msra.mxu1 %v3226_v46  ;;  %v3340_v46 = vld [vmem:[#allocation7 + $0x1f0] ss:$8 sps:$4 sm:$0xff]  }
 0x160   :  { %1948 = vmatprep.subr.bf16.mxu1 %v3231_v47  ;;  %v351_v47 = vsub.s32 2, %v3535_v61 }
 0x163   :  { %1949 = vmatpush1.bf16.msra.mxu1 %v3229_v48  ;;  %v355_v48 = vsub.s32 3, %v3535_v61  ;;  %v2045_v61 = vld [vmem:[%s3573_s4] sm:$0x3] }
 0x164   :  { %1950 = vmatprep.subr.bf16.mxu1 %v3234_v49  ;;  %v352_v49 = vrot.slane %v3543_v63, %v351_v47 }
 0x167   :  { %1951 = vmatpush1.bf16.msra.mxu1 %v3232_v50  ;;  %v356_v50 = vrot.slane %v3543_v63, %v355_v48 }
 0x168   :  { %1952 = vmatprep.subr.bf16.mxu1 %v3237_v51 }
 0x16b   :  { %1953 = vmatpush1.bf16.msra.mxu1 %v3235_v52 }
 0x16c   :  { %1954 = vmatprep.subr.bf16.mxu1 %v3240_v54 }
 0x16f   :  { %1955 = vmatpush1.bf16.msra.mxu1 %v3238_v55 }
 0x170   :  { %1956 = vmatprep.subr.bf16.mxu1 %v3243_v56 }
 0x173   :  { %1957 = vmatpush1.bf16.msra.mxu1 %v3241_v57 }
 0x174   :  { %1958 = vmatprep.subr.bf16.mxu1 %v3246_v58 }
 0x177   :  { %1959 = vmatpush1.bf16.msra.mxu1 %v3244_v59 }
 0x17a   :  { %1961 = vmatmul.mubr.bf16.vlgmr.msra.gmra.mrb[4].mxu1 %v3527_v24  ;;  %v348_v24 = vrot.slane %v3543_v63, %v3546_v0  ;;  %v2050_v63 = vrot.slane %v2045_v61, %v3538_v62 }
 0x17c   :  { %v1678_v3 = vadd.f32 %v1677_v25, %v348_v24  ;;  %v3319_v25 = vld [vmem:[#allocation7 + $0x180] ss:$8 sps:$4 sm:$0xff]  }
 0x1ce   :  { %v1798_v4 = vpop.f32.mrb[0].mxu0 }
 0x1cf   :  { %v2825_v5 = vadd.f32 %v1798_v4, %v1676_v2  ;;  %v1800_v6 = vpop.f32.mrb[1].mxu0 }
 0x1d0   :  { %v2827_v7 = vadd.f32 %v1800_v6, %v1678_v3  ;;  %v1802_v8 = vpop.f32.mrb[2].mxu0  ;;  %v2054_v3 = vrot.slane %v2045_v61, %v3546_v0 }
 0x1d1   :  { %v1969_v10 = vmul.f32 0.2, %v2825_v5  ;;  %v1803_v11 = vpop.f32.mrb[3].mxu0 }
 0x1d2   :  { %v1970_v13 = vmul.f32 0.2, %v2827_v7 }
 0x1d3   :  { %v1973_v14 = vmax.f32 %v2825_v5, %v1969_v10  ;;  %v2463_v5 = vld [vmem:[%s3574_s5] sm:$0x3] }
 0x1d4   :  { %v1974_v15 = vmax.f32 %v2827_v7, %v1970_v13 }
 0x1d5   :  { %v1977_v19 = vpack.c.bf16 %v1973_v14, %v1973_v14  ;;  %v2468_v14 = vrot.slane %v2463_v5, %v3538_v62 }
 0x1d6   :  { %v1978_v16 = vpack.c.bf16 %v1974_v15, %v1974_v15 }
 0x1d8   :  { %2409 = vmatprep.mubr.bf16.mxu0 %v1978_v16  ;;  %v2472_v16 = vrot.slane %v2463_v5, %v3546_v0 }
 0x1d9   :  { %2410 = vmatmul.mubr.bf16.vlgmr.msra.gmra.mrb[4].mxu0 %v1977_v19 }
 0x1da   :  { %2419 = vmatpush1.bf16.msra.mxu0 %v3295_v18 }
 0x1db   :  { %2420 = vmatprep.subr.bf16.mxu0 %v3300_v20 }
 0x1de   :  { %2421 = vmatpush1.bf16.msra.mxu0 %v3298_v21 }
 0x1df   :  { %2422 = vmatprep.subr.bf16.mxu0 %v3303_v22 }
 0x1e2   :  { %2423 = vmatpush1.bf16.msra.mxu0 %v3301_v23  ;;  %v2822_v23 = vld [vmem:[#allocation2] ss:$0 sm:$0xff] }
 0x1e3   :  { %2424 = vmatprep.subr.bf16.mxu0 %v3306_v26 }
 0x1e6   :  { %2425 = vmatpush1.bf16.msra.mxu0 %v3304_v27 }
 0x1e7   :  { %2426 = vmatprep.subr.bf16.mxu0 %v3309_v28 }
 0x1ea   :  { %2427 = vmatpush1.bf16.msra.mxu0 %v3307_v29 }
 0x1eb   :  { %2428 = vmatprep.subr.bf16.mxu0 %v3312_v30 }
 0x1ee   :  { %2429 = vmatpush1.bf16.msra.mxu0 %v3310_v9 }
 0x1ef   :  { %2430 = vmatprep.subr.bf16.mxu0 %v3315_v31 }
 0x1f2   :  { %2431 = vmatpush1.bf16.msra.mxu0 %v3313_v32 }
 0x1f3   :  { %2432 = vmatprep.subr.bf16.mxu0 %v3318_v17 }
 0x1f6   :  { %2433 = vmatpush1.bf16.msra.mxu0 %v3316_v33 }
 0x1f7   :  { %2434 = vmatprep.subr.bf16.mxu0 %v3321_v34 }
 0x1fa   :  { %2435 = vmatpush1.bf16.msra.mxu0 %v3319_v25 }
 0x1fb   :  { %2436 = vmatprep.subr.bf16.mxu0 %v3324_v12 }
 0x1fe   :  { %2437 = vmatpush1.bf16.msra.mxu0 %v3322_v35 }
 0x1ff   :  { %2438 = vmatprep.subr.bf16.mxu0 %v3327_v36 }
 0x202   :  { %2439 = vmatpush1.bf16.msra.mxu0 %v3325_v37 }
 0x203   :  { %2440 = vmatprep.subr.bf16.mxu0 %v3330_v53 }
 0x206   :  { %2441 = vmatpush1.bf16.msra.mxu0 %v3328_v38 }
 0x207   :  { %2442 = vmatprep.subr.bf16.mxu0 %v3333_v39 }
 0x20a   :  { %2443 = vmatpush1.bf16.msra.mxu0 %v3331_v40 }
 0x20b   :  { %2444 = vmatprep.subr.bf16.mxu0 %v3336_v41 }
 0x20e   :  { %2445 = vmatpush1.bf16.msra.mxu0 %v3334_v42 }
 0x20f   :  { %2446 = vmatprep.subr.bf16.mxu0 %v3339_v43 }
 0x212   :  { %2447 = vmatpush1.bf16.msra.mxu0 %v3337_v44 }
 0x213   :  { %2448 = vmatprep.subr.bf16.mxu0 %v3342_v45 }
 0x216   :  { %2449 = vmatpush1.bf16.msra.mxu0 %v3340_v46 }
 0x24d   :  { %v1962_v51 = vpop.f32.mrb[4].mxu1 }
 0x24e   :  { %v2828_v52 = vadd.f32 %v1962_v51, %v352_v49  ;;  %v1964_v54 = vpop.f32.mrb[5].mxu1 }
 0x24f   :  { %v2829_v55 = vadd.f32 %v1964_v54, %v356_v50  ;;  %v1966_v56 = vpop.f32.mrb[6].mxu1 }
 0x250   :  { %v1971_v57 = vmul.f32 0.2, %v2828_v52  ;;  %v1967_v58 = vpop.f32.mrb[7].mxu1 }
 0x251   :  { %v1972_v59 = vmul.f32 0.2, %v2829_v55 }
 0x252   :  { %v1975_v60 = vmax.f32 %v2828_v52, %v1971_v57 }
 0x253   :  { %v1976_v1 = vmax.f32 %v2829_v55, %v1972_v59 }
 0x254   :  { %v1979_v2 = vpack.c.bf16 %v1975_v60, %v1975_v60 }
 0x255   :  { %v1980_v24 = vpack.c.bf16 %v1976_v1, %v1976_v1 }
 0x257   :  { %2450 = vmatprep.mubr.bf16.mxu0 %v1980_v24 }
 0x258   :  { %2451 = vmatmul.mubr.bf16.vlgmr.msra.gmra.mrb[4].mxu0 %v1979_v2 }
 0x32b   :  { %v2452_v4 = vpop.f32.mrb[4].mxu0 }
 0x32c   :  { %v2830_v6 = vadd.f32 %v2452_v4, %v2050_v63  ;;  %v2454_v7 = vpop.f32.mrb[5].mxu0 }
 0x32d   :  { %v2831_v8 = vadd.f32 %v2454_v7, %v2054_v3  ;;  %v2456_v10 = vpop.f32.mrb[6].mxu0 }
 0x32e   :  { %v2459_v11 = vmul.f32 0.2, %v2830_v6  ;;  %v2457_v13 = vpop.f32.mrb[7].mxu0 }
 0x32f   :  { %v2460_v15 = vmul.f32 0.2, %v2831_v8 }
 0x330   :  { %v2461_v18 = vmax.f32 %v2830_v6, %v2459_v11 }
 0x331   :  { %v2462_v19 = vmax.f32 %v2831_v8, %v2460_v15 }
 0x332   :  { %v2475_v20 = vmul.f32 %v2468_v14, %v2461_v18 }
 0x333   :  { %v2476_v21 = vmul.f32 %v2472_v16, %v2462_v19 }
 0x335   :  { %v2477_v22 = vadd.f32 %v2476_v21, %v2475_v20 }
 0x337   :  { %2478 = vadd.xlane.f32.xlu0 %v2477_v22 }
 0x3c4   :  { %v2479_v26 = vpop.xlane.xlu0 %2478 }
 0x3c5   :  { %v2487_v27 = vadd.f32 %v2822_v23, %v2479_v26 }
 0x3c7   :  { %v2823_v28 = vmul.f32 -1.442695, %v2487_v27 }
 0x3c9   :  { %3343 = vpow2.f32 %v2823_v28 }
 0x3d3   :  { %v3344_v29 = vpop.eup %3343 }
 0x3d4   :  { %v2491_v30 = vadd.f32 1.0, %v3344_v29 }
 0x3d6   :  { %3345 = vrcp.f32 %v2491_v30 }
 0x3e0   :  { %v3346_v9 = vpop.eup %3345 }
 0x3e1   :  { %2495 = vst.msk [vmem:[%s3576_s7] sm:$0xff] %vm2494_vm0, %v3346_v9 }
 0x3e2   :  { %2500 = vsyncpa [#allocation4], 1 }
 0x3e3   :  { %2501 = vsyncpa [#allocation6], 1 }

</bundles_post_ra>
